<compile_context>
chip_gen: v7x
topology: tpu7x:2x2x1
jax: 0.10.0
libtpu: 0.0.40
codegen_flags: <defaults>
</compile_context>

<pallas_src>
import numpy as np
import jax
import jax.numpy as jnp
from jax import lax
from jax.experimental import pallas as pl
from jax.experimental.pallas import tpu as pltpu


def _gelu_exact(x):
    # torch.nn.GELU() default: 0.5 * x * (1 + erf(x / sqrt(2)))
    return 0.5 * x * (1.0 + lax.erf(x * 0.7071067811865476))


# ---------------------------------------------------------------------------
# Fused Pallas kernel factory: 4 x (conv3x3 s2 p1 + GELU) + global average pool.
# One image per grid step; every intermediate stays in VMEM / vregs.
# ---------------------------------------------------------------------------

def _make_fused_kernel(m_outs, m_pads):
    """m_outs[l] = Ho*Wo of layer l; m_pads[l] = per-tap row stride (multiple of 8)."""

    def kernel(x_ref,
               g1_ref, w1_ref, b1_ref,
               g2_ref, w2_ref, b2_ref,
               g3_ref, w3_ref, b3_ref,
               g4_ref, w4_ref, b4_ref,
               pool_ref, o_ref):

        def conv3x3_s2_gelu(act_f32, g_ref, w_ref, b_ref, m_out, m_pad):
            # act_f32: (H*W, Cin) f32 activation of this image.
            cout = w_ref.shape[2]
            act_bf = act_f32.astype(jnp.bfloat16)
            # One big gather matmul for all 9 taps: (9*m_pad, H*W) @ (H*W, Cin).
            # All-zero gather rows encode the zero padding / tap-block padding.
            gathered = jnp.dot(g_ref[...], act_bf,
                               preferred_element_type=jnp.float32)   # (9*m_pad, Cin)
            gathered_bf = gathered.astype(jnp.bfloat16)
            # Bias folded into the f32 accumulator init.
            acc = jnp.zeros((m_out, cout), jnp.float32) + b_ref[...]
            for t in range(9):  # statically unrolled; slice starts are 8-aligned
                tap = lax.slice_in_dim(gathered_bf,
                                       t * m_pad, t * m_pad + m_out, axis=0)
                acc = acc + jnp.dot(tap, w_ref[t],
                                    preferred_element_type=jnp.float32)
            return _gelu_exact(acc)

        act = x_ref[0].astype(jnp.float32)                      # (H*W, Cin)
        layer_refs = ((g1_ref, w1_ref, b1_ref),
                      (g2_ref, w2_ref, b2_ref),
                      (g3_ref, w3_ref, b3_ref),
                      (g4_ref, w4_ref, b4_ref))
        for li, (g_ref, w_ref, b_ref) in enumerate(layer_refs):
            act = conv3x3_s2_gelu(act, g_ref, w_ref, b_ref,
                                  m_outs[li], m_pads[li])        # (Ho*Wo, Cout)

        # AdaptiveAvgPool2d((1,1)) + flatten == mean over the remaining rows.
        pooled = jnp.dot(pool_ref[...], act, preferred_element_type=jnp.float32)
        o_ref[0] = pooled.astype(o_ref.dtype)                    # (1, dim)

    return kernel


# ---------------------------------------------------------------------------
# Host-side constants: stacked per-tap gather matrices (trace-time constants).
# ---------------------------------------------------------------------------

def _build_tap_gather_stacked(h, w):
    """0/1 matrix (9*m_pad, H*W) for Conv2d(3,3,stride=2,padding=1) patch select.

    Tap t occupies rows [t*m_pad, t*m_pad + Ho*Wo); m_pad is Ho*Wo rounded up to a
    multiple of 8 so in-kernel row slices stay sublane-aligned.  Row (t, oh*Wo+ow)
    selects input pixel (2*oh+kh-1, 2*ow+kw-1); out-of-bounds rows stay all-zero
    (this implements the zero padding).
    """
    ho, wo = (h + 1) // 2, (w + 1) // 2
    m_out = ho * wo
    m_pad = ((m_out + 7) // 8) * 8
    g = np.zeros((9 * m_pad, h * w), np.float32)
    for kh in range(3):
        for kw in range(3):
            t = kh * 3 + kw
            for oh in range(ho):
                ih = 2 * oh + kh - 1
                if ih < 0 or ih >= h:
                    continue
                for ow in range(wo):
                    iw = 2 * ow + kw - 1
                    if iw < 0 or iw >= w:
                        continue
                    g[t * m_pad + oh * wo + ow, ih * w + iw] = 1.0
    return g, m_out, m_pad


# ---------------------------------------------------------------------------
# Parameters and forward
# ---------------------------------------------------------------------------

def init_params(key, input_channels, dim):
    """Weights stored HWIO (Kh, Kw, Cin, Cout); bias (Cout,).
    NOTE: PyTorch Conv2d weights are OIHW; port with w.transpose(2, 3, 1, 0)."""
    channels = [input_channels, 32, 64, 128, dim]
    params = []
    for li in range(4):
        cin, cout = channels[li], channels[li + 1]
        key, kw_, kb_ = jax.random.split(key, 3)
        fan_in = 9 * cin
        w = jax.random.normal(kw_, (3, 3, cin, cout), jnp.float32) / jnp.sqrt(fan_in)
        b = jax.random.normal(kb_, (cout,), jnp.float32) * 0.01
        params.append((w, b))
    return params


def shallow_embedding_forward(x_nchw, params):
    """x_nchw: (N, Cin, H, W) f32; params: 4 x (w HWIO, b). Returns (N, dim) f32."""
    assert len(params) == 4
    n, cin, h, w = x_nchw.shape
    dim = params[-1][0].shape[-1]

    # NCHW -> (N, H*W, Cin): channel-last flat layout matching the gather matrices.
    x_flat = jnp.transpose(x_nchw, (0, 2, 3, 1)).astype(jnp.float32).reshape(n, h * w, cin)

    def const_spec(a):
        nd = a.ndim
        return pl.BlockSpec(a.shape, lambda i, _nd=nd: (0,) * _nd)

    operands = [x_flat]
    in_specs = [pl.BlockSpec((1, h * w, cin), lambda i: (i, 0, 0))]

    m_outs, m_pads = [], []
    hh, ww = h, w
    for (wt, b) in params:
        g_np, m_out, m_pad = _build_tap_gather_stacked(hh, ww)
        g = jnp.asarray(g_np, jnp.bfloat16)                                 # (9*m_pad, H*W)
        wt9 = wt.reshape(9, wt.shape[2], wt.shape[3]).astype(jnp.bfloat16)  # (9, Cin, Cout)
        b2 = b.reshape(1, -1).astype(jnp.float32)                           # (1, Cout)
        operands += [g, wt9, b2]
        in_specs += [const_spec(g), const_spec(wt9), const_spec(b2)]
        m_outs.append(m_out)
        m_pads.append(m_pad)
        hh, ww = (hh + 1) // 2, (ww + 1) // 2

    s_final = hh * ww
    pool = jnp.full((1, s_final), 1.0 / s_final, jnp.float32)
    operands.append(pool)
    in_specs.append(const_spec(pool))

    kernel = _make_fused_kernel(tuple(m_outs), tuple(m_pads))

    out = pl.pallas_call(
        kernel,
        out_shape=jax.ShapeDtypeStruct((n, 1, dim), jnp.float32),
        grid=(n,),
        in_specs=in_specs,
        out_specs=pl.BlockSpec((1, 1, dim), lambda i: (i, 0, 0)),
        compiler_params=pltpu.CompilerParams(
            dimension_semantics=("parallel",),      # batch across TCs on v7x
            vmem_limit_bytes=32 * 1024 * 1024),
    )(*operands)
    return out.reshape(n, dim)


# ---------------------------------------------------------------------------
# Plain-JAX reference (for correctness check)
# ---------------------------------------------------------------------------

def _reference_forward(x_nchw, params):
    x = jnp.transpose(x_nchw, (0, 2, 3, 1)).astype(jnp.float32)
    for wt, b in params:
        x = lax.conv_general_dilated(
            x, wt, window_strides=(2, 2), padding=((1, 1), (1, 1)),
            dimension_numbers=("NHWC", "HWIO", "NHWC"))
        x = x + b
        x = _gelu_exact(x)
    return jnp.mean(x, axis=(1, 2))   # AdaptiveAvgPool2d((1,1)) + flatten


# ---------------------------------------------------------------------------

if __name__ == "__main__":
    key = jax.random.PRNGKey(0)
    k_x, k_p = jax.random.split(key)

    batch, input_channels, spatial, dim = 2, 4, 16, 32
    x = jax.random.normal(k_x, (batch, input_channels, spatial, spatial), jnp.float32)
    params = init_params(k_p, input_channels, dim)

    fwd = jax.jit(shallow_embedding_forward)
    out = jax.block_until_ready(fwd(x, params))

    assert out.shape == (batch, dim), out.shape
    assert out.dtype == jnp.float32

    ref = jax.block_until_ready(_reference_forward(x, params))
    # bf16 MXU operands with f32 accumulation: allow small drift vs f32 reference.
    assert np.allclose(np.asarray(out), np.asarray(ref), rtol=5e-2, atol=5e-2), (
        float(np.max(np.abs(np.asarray(out) - np.asarray(ref)))))

    print("KERNEL_OK")
</pallas_src>

<mosaic_0001>
module attributes {stable_mosaic.version = 11 : i64} {
  func.func @kernel(%arg0: i32, %arg1: memref<1x256x4xf32, #tpu.memory_space<vmem>>, %arg2: memref<576x256xbf16, #tpu.memory_space<vmem>>, %arg3: memref<9x4x32xbf16, #tpu.memory_space<vmem>>, %arg4: memref<1x32xf32, #tpu.memory_space<vmem>>, %arg5: memref<144x64xbf16, #tpu.memory_space<vmem>>, %arg6: memref<9x32x64xbf16, #tpu.memory_space<vmem>>, %arg7: memref<1x64xf32, #tpu.memory_space<vmem>>, %arg8: memref<72x16xbf16, #tpu.memory_space<vmem>>, %arg9: memref<9x64x128xbf16, #tpu.memory_space<vmem>>, %arg10: memref<1x128xf32, #tpu.memory_space<vmem>>, %arg11: memref<72x4xbf16, #tpu.memory_space<vmem>>, %arg12: memref<9x128x32xbf16, #tpu.memory_space<vmem>>, %arg13: memref<1x32xf32, #tpu.memory_space<vmem>>, %arg14: memref<1x1xf32, #tpu.memory_space<vmem>>, %arg15: memref<1x1x32xf32, #tpu.memory_space<vmem>>) attributes {dimension_semantics = [#tpu.dimension_semantics<parallel>], iteration_bounds = array<i64: 2>, scalar_prefetch = 0 : i64, scratch_operands = 0 : i64, tpu.core_type = #tpu.core_type<tc>, window_params = [{transform_indices = @transform_0, window_bounds = array<i64: 1, 256, 4>}, {pipeline_mode = #tpu.pipeline_mode<synchronous>, transform_indices = @transform_1, window_bounds = array<i64: 576, 256>}, {pipeline_mode = #tpu.pipeline_mode<synchronous>, transform_indices = @transform_2, window_bounds = array<i64: 9, 4, 32>}, {pipeline_mode = #tpu.pipeline_mode<synchronous>, transform_indices = @transform_3, window_bounds = array<i64: 1, 32>}, {pipeline_mode = #tpu.pipeline_mode<synchronous>, transform_indices = @transform_4, window_bounds = array<i64: 144, 64>}, {pipeline_mode = #tpu.pipeline_mode<synchronous>, transform_indices = @transform_5, window_bounds = array<i64: 9, 32, 64>}, {pipeline_mode = #tpu.pipeline_mode<synchronous>, transform_indices = @transform_6, window_bounds = array<i64: 1, 64>}, {pipeline_mode = #tpu.pipeline_mode<synchronous>, transform_indices = @transform_7, window_bounds = array<i64: 72, 16>}, {pipeline_mode = #tpu.pipeline_mode<synchronous>, transform_indices = @transform_8, window_bounds = array<i64: 9, 64, 128>}, {pipeline_mode = #tpu.pipeline_mode<synchronous>, transform_indices = @transform_9, window_bounds = array<i64: 1, 128>}, {pipeline_mode = #tpu.pipeline_mode<synchronous>, transform_indices = @transform_10, window_bounds = array<i64: 72, 4>}, {pipeline_mode = #tpu.pipeline_mode<synchronous>, transform_indices = @transform_11, window_bounds = array<i64: 9, 128, 32>}, {pipeline_mode = #tpu.pipeline_mode<synchronous>, transform_indices = @transform_12, window_bounds = array<i64: 1, 32>}, {pipeline_mode = #tpu.pipeline_mode<synchronous>, transform_indices = @transform_13, window_bounds = array<i64: 1, 1>}, {transform_indices = @transform_14, window_bounds = array<i64: 1, 1, 32>}]} {
    %c0 = arith.constant 0 : index
    %c0_0 = arith.constant 0 : index
    %c0_1 = arith.constant 0 : index
    %0 = vector.load %arg1[%c0, %c0_0, %c0_1] : memref<1x256x4xf32, #tpu.memory_space<vmem>>, vector<1x256x4xf32>
    %1 = vector.shape_cast %0 : vector<1x256x4xf32> to vector<256x4xf32>
    %2 = arith.truncf %1 : vector<256x4xf32> to vector<256x4xbf16>
    %c0_2 = arith.constant 0 : index
    %c0_3 = arith.constant 0 : index
    %3 = vector.load %arg2[%c0_2, %c0_3] : memref<576x256xbf16, #tpu.memory_space<vmem>>, vector<576x256xbf16>
    %cst = arith.constant dense<0.000000e+00> : vector<576x4xf32>
    %4 = tpu.matmul %3, %2, %cst {dimension_numbers = #tpu.dot_dimension_numbers<[1], [0], [0], [1], [0, 0, 1, 1], [], []>} : vector<576x256xbf16>, vector<256x4xbf16>, vector<576x4xf32> -> vector<576x4xf32>
    %5 = arith.truncf %4 : vector<576x4xf32> to vector<576x4xbf16>
    %cst_4 = arith.constant 0.000000e+00 : f32
    %6 = vector.broadcast %cst_4 : f32 to vector<64x32xf32>
    %c0_5 = arith.constant 0 : index
    %c0_6 = arith.constant 0 : index
    %7 = vector.load %arg4[%c0_5, %c0_6] : memref<1x32xf32, #tpu.memory_space<vmem>>, vector<1x32xf32>
    %8 = vector.broadcast %7 : vector<1x32xf32> to vector<64x32xf32>
    %9 = arith.addf %6, %8 : vector<64x32xf32>
    %10 = vector.extract_strided_slice %5 {offsets = [0, 0], sizes = [64, 4], strides = [1, 1]} : vector<576x4xbf16> to vector<64x4xbf16>
    %c0_7 = arith.constant 0 : index
    %c0_8 = arith.constant 0 : index
    %c0_9 = arith.constant 0 : index
    %11 = vector.load %arg3[%c0_7, %c0_8, %c0_9] : memref<9x4x32xbf16, #tpu.memory_space<vmem>>, vector<1x4x32xbf16>
    %12 = vector.shape_cast %11 : vector<1x4x32xbf16> to vector<4x32xbf16>
    %cst_10 = arith.constant dense<0.000000e+00> : vector<64x32xf32>
    %13 = tpu.matmul %10, %12, %cst_10 {dimension_numbers = #tpu.dot_dimension_numbers<[1], [0], [0], [1], [0, 0, 1, 1], [], []>} : vector<64x4xbf16>, vector<4x32xbf16>, vector<64x32xf32> -> vector<64x32xf32>
    %14 = arith.addf %9, %13 : vector<64x32xf32>
    %15 = vector.extract_strided_slice %5 {offsets = [64, 0], sizes = [64, 4], strides = [1, 1]} : vector<576x4xbf16> to vector<64x4xbf16>
    %c1 = arith.constant 1 : index
    %c0_11 = arith.constant 0 : index
    %c0_12 = arith.constant 0 : index
    %16 = vector.load %arg3[%c1, %c0_11, %c0_12] : memref<9x4x32xbf16, #tpu.memory_space<vmem>>, vector<1x4x32xbf16>
    %17 = vector.shape_cast %16 : vector<1x4x32xbf16> to vector<4x32xbf16>
    %cst_13 = arith.constant dense<0.000000e+00> : vector<64x32xf32>
    %18 = tpu.matmul %15, %17, %cst_13 {dimension_numbers = #tpu.dot_dimension_numbers<[1], [0], [0], [1], [0, 0, 1, 1], [], []>} : vector<64x4xbf16>, vector<4x32xbf16>, vector<64x32xf32> -> vector<64x32xf32>
    %19 = arith.addf %14, %18 : vector<64x32xf32>
    %20 = vector.extract_strided_slice %5 {offsets = [128, 0], sizes = [64, 4], strides = [1, 1]} : vector<576x4xbf16> to vector<64x4xbf16>
    %c2 = arith.constant 2 : index
    %c0_14 = arith.constant 0 : index
    %c0_15 = arith.constant 0 : index
    %21 = vector.load %arg3[%c2, %c0_14, %c0_15] : memref<9x4x32xbf16, #tpu.memory_space<vmem>>, vector<1x4x32xbf16>
    %22 = vector.shape_cast %21 : vector<1x4x32xbf16> to vector<4x32xbf16>
    %cst_16 = arith.constant dense<0.000000e+00> : vector<64x32xf32>
    %23 = tpu.matmul %20, %22, %cst_16 {dimension_numbers = #tpu.dot_dimension_numbers<[1], [0], [0], [1], [0, 0, 1, 1], [], []>} : vector<64x4xbf16>, vector<4x32xbf16>, vector<64x32xf32> -> vector<64x32xf32>
    %24 = arith.addf %19, %23 : vector<64x32xf32>
    %25 = vector.extract_strided_slice %5 {offsets = [192, 0], sizes = [64, 4], strides = [1, 1]} : vector<576x4xbf16> to vector<64x4xbf16>
    %c3 = arith.constant 3 : index
    %c0_17 = arith.constant 0 : index
    %c0_18 = arith.constant 0 : index
    %26 = vector.load %arg3[%c3, %c0_17, %c0_18] : memref<9x4x32xbf16, #tpu.memory_space<vmem>>, vector<1x4x32xbf16>
    %27 = vector.shape_cast %26 : vector<1x4x32xbf16> to vector<4x32xbf16>
    %cst_19 = arith.constant dense<0.000000e+00> : vector<64x32xf32>
    %28 = tpu.matmul %25, %27, %cst_19 {dimension_numbers = #tpu.dot_dimension_numbers<[1], [0], [0], [1], [0, 0, 1, 1], [], []>} : vector<64x4xbf16>, vector<4x32xbf16>, vector<64x32xf32> -> vector<64x32xf32>
    %29 = arith.addf %24, %28 : vector<64x32xf32>
    %30 = vector.extract_strided_slice %5 {offsets = [256, 0], sizes = [64, 4], strides = [1, 1]} : vector<576x4xbf16> to vector<64x4xbf16>
    %c4 = arith.constant 4 : index
    %c0_20 = arith.constant 0 : index
    %c0_21 = arith.constant 0 : index
    %31 = vector.load %arg3[%c4, %c0_20, %c0_21] : memref<9x4x32xbf16, #tpu.memory_space<vmem>>, vector<1x4x32xbf16>
    %32 = vector.shape_cast %31 : vector<1x4x32xbf16> to vector<4x32xbf16>
    %cst_22 = arith.constant dense<0.000000e+00> : vector<64x32xf32>
    %33 = tpu.matmul %30, %32, %cst_22 {dimension_numbers = #tpu.dot_dimension_numbers<[1], [0], [0], [1], [0, 0, 1, 1], [], []>} : vector<64x4xbf16>, vector<4x32xbf16>, vector<64x32xf32> -> vector<64x32xf32>
    %34 = arith.addf %29, %33 : vector<64x32xf32>
    %35 = vector.extract_strided_slice %5 {offsets = [320, 0], sizes = [64, 4], strides = [1, 1]} : vector<576x4xbf16> to vector<64x4xbf16>
    %c5 = arith.constant 5 : index
    %c0_23 = arith.constant 0 : index
    %c0_24 = arith.constant 0 : index
    %36 = vector.load %arg3[%c5, %c0_23, %c0_24] : memref<9x4x32xbf16, #tpu.memory_space<vmem>>, vector<1x4x32xbf16>
    %37 = vector.shape_cast %36 : vector<1x4x32xbf16> to vector<4x32xbf16>
    %cst_25 = arith.constant dense<0.000000e+00> : vector<64x32xf32>
    %38 = tpu.matmul %35, %37, %cst_25 {dimension_numbers = #tpu.dot_dimension_numbers<[1], [0], [0], [1], [0, 0, 1, 1], [], []>} : vector<64x4xbf16>, vector<4x32xbf16>, vector<64x32xf32> -> vector<64x32xf32>
    %39 = arith.addf %34, %38 : vector<64x32xf32>
    %40 = vector.extract_strided_slice %5 {offsets = [384, 0], sizes = [64, 4], strides = [1, 1]} : vector<576x4xbf16> to vector<64x4xbf16>
    %c6 = arith.constant 6 : index
    %c0_26 = arith.constant 0 : index
    %c0_27 = arith.constant 0 : index
    %41 = vector.load %arg3[%c6, %c0_26, %c0_27] : memref<9x4x32xbf16, #tpu.memory_space<vmem>>, vector<1x4x32xbf16>
    %42 = vector.shape_cast %41 : vector<1x4x32xbf16> to vector<4x32xbf16>
    %cst_28 = arith.constant dense<0.000000e+00> : vector<64x32xf32>
    %43 = tpu.matmul %40, %42, %cst_28 {dimension_numbers = #tpu.dot_dimension_numbers<[1], [0], [0], [1], [0, 0, 1, 1], [], []>} : vector<64x4xbf16>, vector<4x32xbf16>, vector<64x32xf32> -> vector<64x32xf32>
    %44 = arith.addf %39, %43 : vector<64x32xf32>
    %45 = vector.extract_strided_slice %5 {offsets = [448, 0], sizes = [64, 4], strides = [1, 1]} : vector<576x4xbf16> to vector<64x4xbf16>
    %c7 = arith.constant 7 : index
    %c0_29 = arith.constant 0 : index
    %c0_30 = arith.constant 0 : index
    %46 = vector.load %arg3[%c7, %c0_29, %c0_30] : memref<9x4x32xbf16, #tpu.memory_space<vmem>>, vector<1x4x32xbf16>
    %47 = vector.shape_cast %46 : vector<1x4x32xbf16> to vector<4x32xbf16>
    %cst_31 = arith.constant dense<0.000000e+00> : vector<64x32xf32>
    %48 = tpu.matmul %45, %47, %cst_31 {dimension_numbers = #tpu.dot_dimension_numbers<[1], [0], [0], [1], [0, 0, 1, 1], [], []>} : vector<64x4xbf16>, vector<4x32xbf16>, vector<64x32xf32> -> vector<64x32xf32>
    %49 = arith.addf %44, %48 : vector<64x32xf32>
    %50 = vector.extract_strided_slice %5 {offsets = [512, 0], sizes = [64, 4], strides = [1, 1]} : vector<576x4xbf16> to vector<64x4xbf16>
    %c8 = arith.constant 8 : index
    %c0_32 = arith.constant 0 : index
    %c0_33 = arith.constant 0 : index
    %51 = vector.load %arg3[%c8, %c0_32, %c0_33] : memref<9x4x32xbf16, #tpu.memory_space<vmem>>, vector<1x4x32xbf16>
    %52 = vector.shape_cast %51 : vector<1x4x32xbf16> to vector<4x32xbf16>
    %cst_34 = arith.constant dense<0.000000e+00> : vector<64x32xf32>
    %53 = tpu.matmul %50, %52, %cst_34 {dimension_numbers = #tpu.dot_dimension_numbers<[1], [0], [0], [1], [0, 0, 1, 1], [], []>} : vector<64x4xbf16>, vector<4x32xbf16>, vector<64x32xf32> -> vector<64x32xf32>
    %54 = arith.addf %49, %53 : vector<64x32xf32>
    %cst_35 = arith.constant 5.000000e-01 : f32
    %55 = vector.broadcast %cst_35 : f32 to vector<64x32xf32>
    %56 = arith.mulf %55, %54 : vector<64x32xf32>
    %cst_36 = arith.constant 0.707106769 : f32
    %57 = vector.broadcast %cst_36 : f32 to vector<64x32xf32>
    %58 = arith.mulf %54, %57 : vector<64x32xf32>
    %59 = math.erf %58 : vector<64x32xf32>
    %cst_37 = arith.constant 1.000000e+00 : f32
    %60 = vector.broadcast %cst_37 : f32 to vector<64x32xf32>
    %61 = arith.addf %60, %59 : vector<64x32xf32>
    %62 = arith.mulf %56, %61 : vector<64x32xf32>
    %63 = arith.truncf %62 : vector<64x32xf32> to vector<64x32xbf16>
    %c0_38 = arith.constant 0 : index
    %c0_39 = arith.constant 0 : index
    %64 = vector.load %arg5[%c0_38, %c0_39] : memref<144x64xbf16, #tpu.memory_space<vmem>>, vector<144x64xbf16>
    %cst_40 = arith.constant dense<0.000000e+00> : vector<144x32xf32>
    %65 = tpu.matmul %64, %63, %cst_40 {dimension_numbers = #tpu.dot_dimension_numbers<[1], [0], [0], [1], [0, 0, 1, 1], [], []>} : vector<144x64xbf16>, vector<64x32xbf16>, vector<144x32xf32> -> vector<144x32xf32>
    %66 = arith.truncf %65 : vector<144x32xf32> to vector<144x32xbf16>
    %cst_41 = arith.constant 0.000000e+00 : f32
    %67 = vector.broadcast %cst_41 : f32 to vector<16x64xf32>
    %c0_42 = arith.constant 0 : index
    %c0_43 = arith.constant 0 : index
    %68 = vector.load %arg7[%c0_42, %c0_43] : memref<1x64xf32, #tpu.memory_space<vmem>>, vector<1x64xf32>
    %69 = vector.broadcast %68 : vector<1x64xf32> to vector<16x64xf32>
    %70 = arith.addf %67, %69 : vector<16x64xf32>
    %71 = vector.extract_strided_slice %66 {offsets = [0, 0], sizes = [16, 32], strides = [1, 1]} : vector<144x32xbf16> to vector<16x32xbf16>
    %c0_44 = arith.constant 0 : index
    %c0_45 = arith.constant 0 : index
    %c0_46 = arith.constant 0 : index
    %72 = vector.load %arg6[%c0_44, %c0_45, %c0_46] : memref<9x32x64xbf16, #tpu.memory_space<vmem>>, vector<1x32x64xbf16>
    %73 = vector.shape_cast %72 : vector<1x32x64xbf16> to vector<32x64xbf16>
    %cst_47 = arith.constant dense<0.000000e+00> : vector<16x64xf32>
    %74 = tpu.matmul %71, %73, %cst_47 {dimension_numbers = #tpu.dot_dimension_numbers<[1], [0], [0], [1], [0, 0, 1, 1], [], []>} : vector<16x32xbf16>, vector<32x64xbf16>, vector<16x64xf32> -> vector<16x64xf32>
    %75 = arith.addf %70, %74 : vector<16x64xf32>
    %76 = vector.extract_strided_slice %66 {offsets = [16, 0], sizes = [16, 32], strides = [1, 1]} : vector<144x32xbf16> to vector<16x32xbf16>
    %c1_48 = arith.constant 1 : index
    %c0_49 = arith.constant 0 : index
    %c0_50 = arith.constant 0 : index
    %77 = vector.load %arg6[%c1_48, %c0_49, %c0_50] : memref<9x32x64xbf16, #tpu.memory_space<vmem>>, vector<1x32x64xbf16>
    %78 = vector.shape_cast %77 : vector<1x32x64xbf16> to vector<32x64xbf16>
    %cst_51 = arith.constant dense<0.000000e+00> : vector<16x64xf32>
    %79 = tpu.matmul %76, %78, %cst_51 {dimension_numbers = #tpu.dot_dimension_numbers<[1], [0], [0], [1], [0, 0, 1, 1], [], []>} : vector<16x32xbf16>, vector<32x64xbf16>, vector<16x64xf32> -> vector<16x64xf32>
    %80 = arith.addf %75, %79 : vector<16x64xf32>
    %81 = vector.extract_strided_slice %66 {offsets = [32, 0], sizes = [16, 32], strides = [1, 1]} : vector<144x32xbf16> to vector<16x32xbf16>
    %c2_52 = arith.constant 2 : index
    %c0_53 = arith.constant 0 : index
    %c0_54 = arith.constant 0 : index
    %82 = vector.load %arg6[%c2_52, %c0_53, %c0_54] : memref<9x32x64xbf16, #tpu.memory_space<vmem>>, vector<1x32x64xbf16>
    %83 = vector.shape_cast %82 : vector<1x32x64xbf16> to vector<32x64xbf16>
    %cst_55 = arith.constant dense<0.000000e+00> : vector<16x64xf32>
    %84 = tpu.matmul %81, %83, %cst_55 {dimension_numbers = #tpu.dot_dimension_numbers<[1], [0], [0], [1], [0, 0, 1, 1], [], []>} : vector<16x32xbf16>, vector<32x64xbf16>, vector<16x64xf32> -> vector<16x64xf32>
    %85 = arith.addf %80, %84 : vector<16x64xf32>
    %86 = vector.extract_strided_slice %66 {offsets = [48, 0], sizes = [16, 32], strides = [1, 1]} : vector<144x32xbf16> to vector<16x32xbf16>
    %c3_56 = arith.constant 3 : index
    %c0_57 = arith.constant 0 : index
    %c0_58 = arith.constant 0 : index
    %87 = vector.load %arg6[%c3_56, %c0_57, %c0_58] : memref<9x32x64xbf16, #tpu.memory_space<vmem>>, vector<1x32x64xbf16>
    %88 = vector.shape_cast %87 : vector<1x32x64xbf16> to vector<32x64xbf16>
    %cst_59 = arith.constant dense<0.000000e+00> : vector<16x64xf32>
    %89 = tpu.matmul %86, %88, %cst_59 {dimension_numbers = #tpu.dot_dimension_numbers<[1], [0], [0], [1], [0, 0, 1, 1], [], []>} : vector<16x32xbf16>, vector<32x64xbf16>, vector<16x64xf32> -> vector<16x64xf32>
    %90 = arith.addf %85, %89 : vector<16x64xf32>
    %91 = vector.extract_strided_slice %66 {offsets = [64, 0], sizes = [16, 32], strides = [1, 1]} : vector<144x32xbf16> to vector<16x32xbf16>
    %c4_60 = arith.constant 4 : index
    %c0_61 = arith.constant 0 : index
    %c0_62 = arith.constant 0 : index
    %92 = vector.load %arg6[%c4_60, %c0_61, %c0_62] : memref<9x32x64xbf16, #tpu.memory_space<vmem>>, vector<1x32x64xbf16>
    %93 = vector.shape_cast %92 : vector<1x32x64xbf16> to vector<32x64xbf16>
    %cst_63 = arith.constant dense<0.000000e+00> : vector<16x64xf32>
    %94 = tpu.matmul %91, %93, %cst_63 {dimension_numbers = #tpu.dot_dimension_numbers<[1], [0], [0], [1], [0, 0, 1, 1], [], []>} : vector<16x32xbf16>, vector<32x64xbf16>, vector<16x64xf32> -> vector<16x64xf32>
    %95 = arith.addf %90, %94 : vector<16x64xf32>
    %96 = vector.extract_strided_slice %66 {offsets = [80, 0], sizes = [16, 32], strides = [1, 1]} : vector<144x32xbf16> to vector<16x32xbf16>
    %c5_64 = arith.constant 5 : index
    %c0_65 = arith.constant 0 : index
    %c0_66 = arith.constant 0 : index
    %97 = vector.load %arg6[%c5_64, %c0_65, %c0_66] : memref<9x32x64xbf16, #tpu.memory_space<vmem>>, vector<1x32x64xbf16>
    %98 = vector.shape_cast %97 : vector<1x32x64xbf16> to vector<32x64xbf16>
    %cst_67 = arith.constant dense<0.000000e+00> : vector<16x64xf32>
    %99 = tpu.matmul %96, %98, %cst_67 {dimension_numbers = #tpu.dot_dimension_numbers<[1], [0], [0], [1], [0, 0, 1, 1], [], []>} : vector<16x32xbf16>, vector<32x64xbf16>, vector<16x64xf32> -> vector<16x64xf32>
    %100 = arith.addf %95, %99 : vector<16x64xf32>
    %101 = vector.extract_strided_slice %66 {offsets = [96, 0], sizes = [16, 32], strides = [1, 1]} : vector<144x32xbf16> to vector<16x32xbf16>
    %c6_68 = arith.constant 6 : index
    %c0_69 = arith.constant 0 : index
    %c0_70 = arith.constant 0 : index
    %102 = vector.load %arg6[%c6_68, %c0_69, %c0_70] : memref<9x32x64xbf16, #tpu.memory_space<vmem>>, vector<1x32x64xbf16>
    %103 = vector.shape_cast %102 : vector<1x32x64xbf16> to vector<32x64xbf16>
    %cst_71 = arith.constant dense<0.000000e+00> : vector<16x64xf32>
    %104 = tpu.matmul %101, %103, %cst_71 {dimension_numbers = #tpu.dot_dimension_numbers<[1], [0], [0], [1], [0, 0, 1, 1], [], []>} : vector<16x32xbf16>, vector<32x64xbf16>, vector<16x64xf32> -> vector<16x64xf32>
    %105 = arith.addf %100, %104 : vector<16x64xf32>
    %106 = vector.extract_strided_slice %66 {offsets = [112, 0], sizes = [16, 32], strides = [1, 1]} : vector<144x32xbf16> to vector<16x32xbf16>
    %c7_72 = arith.constant 7 : index
    %c0_73 = arith.constant 0 : index
    %c0_74 = arith.constant 0 : index
    %107 = vector.load %arg6[%c7_72, %c0_73, %c0_74] : memref<9x32x64xbf16, #tpu.memory_space<vmem>>, vector<1x32x64xbf16>
    %108 = vector.shape_cast %107 : vector<1x32x64xbf16> to vector<32x64xbf16>
    %cst_75 = arith.constant dense<0.000000e+00> : vector<16x64xf32>
    %109 = tpu.matmul %106, %108, %cst_75 {dimension_numbers = #tpu.dot_dimension_numbers<[1], [0], [0], [1], [0, 0, 1, 1], [], []>} : vector<16x32xbf16>, vector<32x64xbf16>, vector<16x64xf32> -> vector<16x64xf32>
    %110 = arith.addf %105, %109 : vector<16x64xf32>
    %111 = vector.extract_strided_slice %66 {offsets = [128, 0], sizes = [16, 32], strides = [1, 1]} : vector<144x32xbf16> to vector<16x32xbf16>
    %c8_76 = arith.constant 8 : index
    %c0_77 = arith.constant 0 : index
    %c0_78 = arith.constant 0 : index
    %112 = vector.load %arg6[%c8_76, %c0_77, %c0_78] : memref<9x32x64xbf16, #tpu.memory_space<vmem>>, vector<1x32x64xbf16>
    %113 = vector.shape_cast %112 : vector<1x32x64xbf16> to vector<32x64xbf16>
    %cst_79 = arith.constant dense<0.000000e+00> : vector<16x64xf32>
    %114 = tpu.matmul %111, %113, %cst_79 {dimension_numbers = #tpu.dot_dimension_numbers<[1], [0], [0], [1], [0, 0, 1, 1], [], []>} : vector<16x32xbf16>, vector<32x64xbf16>, vector<16x64xf32> -> vector<16x64xf32>
    %115 = arith.addf %110, %114 : vector<16x64xf32>
    %cst_80 = arith.constant 5.000000e-01 : f32
    %116 = vector.broadcast %cst_80 : f32 to vector<16x64xf32>
    %117 = arith.mulf %116, %115 : vector<16x64xf32>
    %cst_81 = arith.constant 0.707106769 : f32
    %118 = vector.broadcast %cst_81 : f32 to vector<16x64xf32>
    %119 = arith.mulf %115, %118 : vector<16x64xf32>
    %120 = math.erf %119 : vector<16x64xf32>
    %cst_82 = arith.constant 1.000000e+00 : f32
    %121 = vector.broadcast %cst_82 : f32 to vector<16x64xf32>
    %122 = arith.addf %121, %120 : vector<16x64xf32>
    %123 = arith.mulf %117, %122 : vector<16x64xf32>
    %124 = arith.truncf %123 : vector<16x64xf32> to vector<16x64xbf16>
    %c0_83 = arith.constant 0 : index
    %c0_84 = arith.constant 0 : index
    %125 = vector.load %arg8[%c0_83, %c0_84] : memref<72x16xbf16, #tpu.memory_space<vmem>>, vector<72x16xbf16>
    %cst_85 = arith.constant dense<0.000000e+00> : vector<72x64xf32>
    %126 = tpu.matmul %125, %124, %cst_85 {dimension_numbers = #tpu.dot_dimension_numbers<[1], [0], [0], [1], [0, 0, 1, 1], [], []>} : vector<72x16xbf16>, vector<16x64xbf16>, vector<72x64xf32> -> vector<72x64xf32>
    %127 = arith.truncf %126 : vector<72x64xf32> to vector<72x64xbf16>
    %cst_86 = arith.constant 0.000000e+00 : f32
    %128 = vector.broadcast %cst_86 : f32 to vector<4x128xf32>
    %c0_87 = arith.constant 0 : index
    %c0_88 = arith.constant 0 : index
    %129 = vector.load %arg10[%c0_87, %c0_88] : memref<1x128xf32, #tpu.memory_space<vmem>>, vector<1x128xf32>
    %130 = vector.broadcast %129 : vector<1x128xf32> to vector<4x128xf32>
    %131 = arith.addf %128, %130 : vector<4x128xf32>
    %132 = vector.extract_strided_slice %127 {offsets = [0, 0], sizes = [4, 64], strides = [1, 1]} : vector<72x64xbf16> to vector<4x64xbf16>
    %c0_89 = arith.constant 0 : index
    %c0_90 = arith.constant 0 : index
    %c0_91 = arith.constant 0 : index
    %133 = vector.load %arg9[%c0_89, %c0_90, %c0_91] : memref<9x64x128xbf16, #tpu.memory_space<vmem>>, vector<1x64x128xbf16>
    %134 = vector.shape_cast %133 : vector<1x64x128xbf16> to vector<64x128xbf16>
    %cst_92 = arith.constant dense<0.000000e+00> : vector<4x128xf32>
    %135 = tpu.matmul %132, %134, %cst_92 {dimension_numbers = #tpu.dot_dimension_numbers<[1], [0], [0], [1], [0, 0, 1, 1], [], []>} : vector<4x64xbf16>, vector<64x128xbf16>, vector<4x128xf32> -> vector<4x128xf32>
    %136 = arith.addf %131, %135 : vector<4x128xf32>
    %137 = vector.extract_strided_slice %127 {offsets = [8, 0], sizes = [4, 64], strides = [1, 1]} : vector<72x64xbf16> to vector<4x64xbf16>
    %c1_93 = arith.constant 1 : index
    %c0_94 = arith.constant 0 : index
    %c0_95 = arith.constant 0 : index
    %138 = vector.load %arg9[%c1_93, %c0_94, %c0_95] : memref<9x64x128xbf16, #tpu.memory_space<vmem>>, vector<1x64x128xbf16>
    %139 = vector.shape_cast %138 : vector<1x64x128xbf16> to vector<64x128xbf16>
    %cst_96 = arith.constant dense<0.000000e+00> : vector<4x128xf32>
    %140 = tpu.matmul %137, %139, %cst_96 {dimension_numbers = #tpu.dot_dimension_numbers<[1], [0], [0], [1], [0, 0, 1, 1], [], []>} : vector<4x64xbf16>, vector<64x128xbf16>, vector<4x128xf32> -> vector<4x128xf32>
    %141 = arith.addf %136, %140 : vector<4x128xf32>
    %142 = vector.extract_strided_slice %127 {offsets = [16, 0], sizes = [4, 64], strides = [1, 1]} : vector<72x64xbf16> to vector<4x64xbf16>
    %c2_97 = arith.constant 2 : index
    %c0_98 = arith.constant 0 : index
    %c0_99 = arith.constant 0 : index
    %143 = vector.load %arg9[%c2_97, %c0_98, %c0_99] : memref<9x64x128xbf16, #tpu.memory_space<vmem>>, vector<1x64x128xbf16>
    %144 = vector.shape_cast %143 : vector<1x64x128xbf16> to vector<64x128xbf16>
    %cst_100 = arith.constant dense<0.000000e+00> : vector<4x128xf32>
    %145 = tpu.matmul %142, %144, %cst_100 {dimension_numbers = #tpu.dot_dimension_numbers<[1], [0], [0], [1], [0, 0, 1, 1], [], []>} : vector<4x64xbf16>, vector<64x128xbf16>, vector<4x128xf32> -> vector<4x128xf32>
    %146 = arith.addf %141, %145 : vector<4x128xf32>
    %147 = vector.extract_strided_slice %127 {offsets = [24, 0], sizes = [4, 64], strides = [1, 1]} : vector<72x64xbf16> to vector<4x64xbf16>
    %c3_101 = arith.constant 3 : index
    %c0_102 = arith.constant 0 : index
    %c0_103 = arith.constant 0 : index
    %148 = vector.load %arg9[%c3_101, %c0_102, %c0_103] : memref<9x64x128xbf16, #tpu.memory_space<vmem>>, vector<1x64x128xbf16>
    %149 = vector.shape_cast %148 : vector<1x64x128xbf16> to vector<64x128xbf16>
    %cst_104 = arith.constant dense<0.000000e+00> : vector<4x128xf32>
    %150 = tpu.matmul %147, %149, %cst_104 {dimension_numbers = #tpu.dot_dimension_numbers<[1], [0], [0], [1], [0, 0, 1, 1], [], []>} : vector<4x64xbf16>, vector<64x128xbf16>, vector<4x128xf32> -> vector<4x128xf32>
    %151 = arith.addf %146, %150 : vector<4x128xf32>
    %152 = vector.extract_strided_slice %127 {offsets = [32, 0], sizes = [4, 64], strides = [1, 1]} : vector<72x64xbf16> to vector<4x64xbf16>
    %c4_105 = arith.constant 4 : index
    %c0_106 = arith.constant 0 : index
    %c0_107 = arith.constant 0 : index
    %153 = vector.load %arg9[%c4_105, %c0_106, %c0_107] : memref<9x64x128xbf16, #tpu.memory_space<vmem>>, vector<1x64x128xbf16>
    %154 = vector.shape_cast %153 : vector<1x64x128xbf16> to vector<64x128xbf16>
    %cst_108 = arith.constant dense<0.000000e+00> : vector<4x128xf32>
    %155 = tpu.matmul %152, %154, %cst_108 {dimension_numbers = #tpu.dot_dimension_numbers<[1], [0], [0], [1], [0, 0, 1, 1], [], []>} : vector<4x64xbf16>, vector<64x128xbf16>, vector<4x128xf32> -> vector<4x128xf32>
    %156 = arith.addf %151, %155 : vector<4x128xf32>
    %157 = vector.extract_strided_slice %127 {offsets = [40, 0], sizes = [4, 64], strides = [1, 1]} : vector<72x64xbf16> to vector<4x64xbf16>
    %c5_109 = arith.constant 5 : index
    %c0_110 = arith.constant 0 : index
    %c0_111 = arith.constant 0 : index
    %158 = vector.load %arg9[%c5_109, %c0_110, %c0_111] : memref<9x64x128xbf16, #tpu.memory_space<vmem>>, vector<1x64x128xbf16>
    %159 = vector.shape_cast %158 : vector<1x64x128xbf16> to vector<64x128xbf16>
    %cst_112 = arith.constant dense<0.000000e+00> : vector<4x128xf32>
    %160 = tpu.matmul %157, %159, %cst_112 {dimension_numbers = #tpu.dot_dimension_numbers<[1], [0], [0], [1], [0, 0, 1, 1], [], []>} : vector<4x64xbf16>, vector<64x128xbf16>, vector<4x128xf32> -> vector<4x128xf32>
    %161 = arith.addf %156, %160 : vector<4x128xf32>
    %162 = vector.extract_strided_slice %127 {offsets = [48, 0], sizes = [4, 64], strides = [1, 1]} : vector<72x64xbf16> to vector<4x64xbf16>
    %c6_113 = arith.constant 6 : index
    %c0_114 = arith.constant 0 : index
    %c0_115 = arith.constant 0 : index
    %163 = vector.load %arg9[%c6_113, %c0_114, %c0_115] : memref<9x64x128xbf16, #tpu.memory_space<vmem>>, vector<1x64x128xbf16>
    %164 = vector.shape_cast %163 : vector<1x64x128xbf16> to vector<64x128xbf16>
    %cst_116 = arith.constant dense<0.000000e+00> : vector<4x128xf32>
    %165 = tpu.matmul %162, %164, %cst_116 {dimension_numbers = #tpu.dot_dimension_numbers<[1], [0], [0], [1], [0, 0, 1, 1], [], []>} : vector<4x64xbf16>, vector<64x128xbf16>, vector<4x128xf32> -> vector<4x128xf32>
    %166 = arith.addf %161, %165 : vector<4x128xf32>
    %167 = vector.extract_strided_slice %127 {offsets = [56, 0], sizes = [4, 64], strides = [1, 1]} : vector<72x64xbf16> to vector<4x64xbf16>
    %c7_117 = arith.constant 7 : index
    %c0_118 = arith.constant 0 : index
    %c0_119 = arith.constant 0 : index
    %168 = vector.load %arg9[%c7_117, %c0_118, %c0_119] : memref<9x64x128xbf16, #tpu.memory_space<vmem>>, vector<1x64x128xbf16>
    %169 = vector.shape_cast %168 : vector<1x64x128xbf16> to vector<64x128xbf16>
    %cst_120 = arith.constant dense<0.000000e+00> : vector<4x128xf32>
    %170 = tpu.matmul %167, %169, %cst_120 {dimension_numbers = #tpu.dot_dimension_numbers<[1], [0], [0], [1], [0, 0, 1, 1], [], []>} : vector<4x64xbf16>, vector<64x128xbf16>, vector<4x128xf32> -> vector<4x128xf32>
    %171 = arith.addf %166, %170 : vector<4x128xf32>
    %172 = vector.extract_strided_slice %127 {offsets = [64, 0], sizes = [4, 64], strides = [1, 1]} : vector<72x64xbf16> to vector<4x64xbf16>
    %c8_121 = arith.constant 8 : index
    %c0_122 = arith.constant 0 : index
    %c0_123 = arith.constant 0 : index
    %173 = vector.load %arg9[%c8_121, %c0_122, %c0_123] : memref<9x64x128xbf16, #tpu.memory_space<vmem>>, vector<1x64x128xbf16>
    %174 = vector.shape_cast %173 : vector<1x64x128xbf16> to vector<64x128xbf16>
    %cst_124 = arith.constant dense<0.000000e+00> : vector<4x128xf32>
    %175 = tpu.matmul %172, %174, %cst_124 {dimension_numbers = #tpu.dot_dimension_numbers<[1], [0], [0], [1], [0, 0, 1, 1], [], []>} : vector<4x64xbf16>, vector<64x128xbf16>, vector<4x128xf32> -> vector<4x128xf32>
    %176 = arith.addf %171, %175 : vector<4x128xf32>
    %cst_125 = arith.constant 5.000000e-01 : f32
    %177 = vector.broadcast %cst_125 : f32 to vector<4x128xf32>
    %178 = arith.mulf %177, %176 : vector<4x128xf32>
    %cst_126 = arith.constant 0.707106769 : f32
    %179 = vector.broadcast %cst_126 : f32 to vector<4x128xf32>
    %180 = arith.mulf %176, %179 : vector<4x128xf32>
    %181 = math.erf %180 : vector<4x128xf32>
    %cst_127 = arith.constant 1.000000e+00 : f32
    %182 = vector.broadcast %cst_127 : f32 to vector<4x128xf32>
    %183 = arith.addf %182, %181 : vector<4x128xf32>
    %184 = arith.mulf %178, %183 : vector<4x128xf32>
    %185 = arith.truncf %184 : vector<4x128xf32> to vector<4x128xbf16>
    %c0_128 = arith.constant 0 : index
    %c0_129 = arith.constant 0 : index
    %186 = vector.load %arg11[%c0_128, %c0_129] : memref<72x4xbf16, #tpu.memory_space<vmem>>, vector<72x4xbf16>
    %cst_130 = arith.constant dense<0.000000e+00> : vector<72x128xf32>
    %187 = tpu.matmul %186, %185, %cst_130 {dimension_numbers = #tpu.dot_dimension_numbers<[1], [0], [0], [1], [0, 0, 1, 1], [], []>} : vector<72x4xbf16>, vector<4x128xbf16>, vector<72x128xf32> -> vector<72x128xf32>
    %188 = arith.truncf %187 : vector<72x128xf32> to vector<72x128xbf16>
    %cst_131 = arith.constant 0.000000e+00 : f32
    %189 = vector.broadcast %cst_131 : f32 to vector<1x32xf32>
    %c0_132 = arith.constant 0 : index
    %c0_133 = arith.constant 0 : index
    %190 = vector.load %arg13[%c0_132, %c0_133] : memref<1x32xf32, #tpu.memory_space<vmem>>, vector<1x32xf32>
    %191 = arith.addf %189, %190 : vector<1x32xf32>
    %192 = vector.extract_strided_slice %188 {offsets = [0, 0], sizes = [1, 128], strides = [1, 1]} : vector<72x128xbf16> to vector<1x128xbf16>
    %c0_134 = arith.constant 0 : index
    %c0_135 = arith.constant 0 : index
    %c0_136 = arith.constant 0 : index
    %193 = vector.load %arg12[%c0_134, %c0_135, %c0_136] : memref<9x128x32xbf16, #tpu.memory_space<vmem>>, vector<1x128x32xbf16>
    %194 = vector.shape_cast %193 : vector<1x128x32xbf16> to vector<128x32xbf16>
    %cst_137 = arith.constant dense<0.000000e+00> : vector<1x32xf32>
    %195 = tpu.matmul %192, %194, %cst_137 {dimension_numbers = #tpu.dot_dimension_numbers<[1], [0], [0], [1], [0, 0, 1, 1], [], []>} : vector<1x128xbf16>, vector<128x32xbf16>, vector<1x32xf32> -> vector<1x32xf32>
    %196 = arith.addf %191, %195 : vector<1x32xf32>
    %197 = vector.extract_strided_slice %188 {offsets = [8, 0], sizes = [1, 128], strides = [1, 1]} : vector<72x128xbf16> to vector<1x128xbf16>
    %c1_138 = arith.constant 1 : index
    %c0_139 = arith.constant 0 : index
    %c0_140 = arith.constant 0 : index
    %198 = vector.load %arg12[%c1_138, %c0_139, %c0_140] : memref<9x128x32xbf16, #tpu.memory_space<vmem>>, vector<1x128x32xbf16>
    %199 = vector.shape_cast %198 : vector<1x128x32xbf16> to vector<128x32xbf16>
    %cst_141 = arith.constant dense<0.000000e+00> : vector<1x32xf32>
    %200 = tpu.matmul %197, %199, %cst_141 {dimension_numbers = #tpu.dot_dimension_numbers<[1], [0], [0], [1], [0, 0, 1, 1], [], []>} : vector<1x128xbf16>, vector<128x32xbf16>, vector<1x32xf32> -> vector<1x32xf32>
    %201 = arith.addf %196, %200 : vector<1x32xf32>
    %202 = vector.extract_strided_slice %188 {offsets = [16, 0], sizes = [1, 128], strides = [1, 1]} : vector<72x128xbf16> to vector<1x128xbf16>
    %c2_142 = arith.constant 2 : index
    %c0_143 = arith.constant 0 : index
    %c0_144 = arith.constant 0 : index
    %203 = vector.load %arg12[%c2_142, %c0_143, %c0_144] : memref<9x128x32xbf16, #tpu.memory_space<vmem>>, vector<1x128x32xbf16>
    %204 = vector.shape_cast %203 : vector<1x128x32xbf16> to vector<128x32xbf16>
    %cst_145 = arith.constant dense<0.000000e+00> : vector<1x32xf32>
    %205 = tpu.matmul %202, %204, %cst_145 {dimension_numbers = #tpu.dot_dimension_numbers<[1], [0], [0], [1], [0, 0, 1, 1], [], []>} : vector<1x128xbf16>, vector<128x32xbf16>, vector<1x32xf32> -> vector<1x32xf32>
    %206 = arith.addf %201, %205 : vector<1x32xf32>
    %207 = vector.extract_strided_slice %188 {offsets = [24, 0], sizes = [1, 128], strides = [1, 1]} : vector<72x128xbf16> to vector<1x128xbf16>
    %c3_146 = arith.constant 3 : index
    %c0_147 = arith.constant 0 : index
    %c0_148 = arith.constant 0 : index
    %208 = vector.load %arg12[%c3_146, %c0_147, %c0_148] : memref<9x128x32xbf16, #tpu.memory_space<vmem>>, vector<1x128x32xbf16>
    %209 = vector.shape_cast %208 : vector<1x128x32xbf16> to vector<128x32xbf16>
    %cst_149 = arith.constant dense<0.000000e+00> : vector<1x32xf32>
    %210 = tpu.matmul %207, %209, %cst_149 {dimension_numbers = #tpu.dot_dimension_numbers<[1], [0], [0], [1], [0, 0, 1, 1], [], []>} : vector<1x128xbf16>, vector<128x32xbf16>, vector<1x32xf32> -> vector<1x32xf32>
    %211 = arith.addf %206, %210 : vector<1x32xf32>
    %212 = vector.extract_strided_slice %188 {offsets = [32, 0], sizes = [1, 128], strides = [1, 1]} : vector<72x128xbf16> to vector<1x128xbf16>
    %c4_150 = arith.constant 4 : index
    %c0_151 = arith.constant 0 : index
    %c0_152 = arith.constant 0 : index
    %213 = vector.load %arg12[%c4_150, %c0_151, %c0_152] : memref<9x128x32xbf16, #tpu.memory_space<vmem>>, vector<1x128x32xbf16>
    %214 = vector.shape_cast %213 : vector<1x128x32xbf16> to vector<128x32xbf16>
    %cst_153 = arith.constant dense<0.000000e+00> : vector<1x32xf32>
    %215 = tpu.matmul %212, %214, %cst_153 {dimension_numbers = #tpu.dot_dimension_numbers<[1], [0], [0], [1], [0, 0, 1, 1], [], []>} : vector<1x128xbf16>, vector<128x32xbf16>, vector<1x32xf32> -> vector<1x32xf32>
    %216 = arith.addf %211, %215 : vector<1x32xf32>
    %217 = vector.extract_strided_slice %188 {offsets = [40, 0], sizes = [1, 128], strides = [1, 1]} : vector<72x128xbf16> to vector<1x128xbf16>
    %c5_154 = arith.constant 5 : index
    %c0_155 = arith.constant 0 : index
    %c0_156 = arith.constant 0 : index
    %218 = vector.load %arg12[%c5_154, %c0_155, %c0_156] : memref<9x128x32xbf16, #tpu.memory_space<vmem>>, vector<1x128x32xbf16>
    %219 = vector.shape_cast %218 : vector<1x128x32xbf16> to vector<128x32xbf16>
    %cst_157 = arith.constant dense<0.000000e+00> : vector<1x32xf32>
    %220 = tpu.matmul %217, %219, %cst_157 {dimension_numbers = #tpu.dot_dimension_numbers<[1], [0], [0], [1], [0, 0, 1, 1], [], []>} : vector<1x128xbf16>, vector<128x32xbf16>, vector<1x32xf32> -> vector<1x32xf32>
    %221 = arith.addf %216, %220 : vector<1x32xf32>
    %222 = vector.extract_strided_slice %188 {offsets = [48, 0], sizes = [1, 128], strides = [1, 1]} : vector<72x128xbf16> to vector<1x128xbf16>
    %c6_158 = arith.constant 6 : index
    %c0_159 = arith.constant 0 : index
    %c0_160 = arith.constant 0 : index
    %223 = vector.load %arg12[%c6_158, %c0_159, %c0_160] : memref<9x128x32xbf16, #tpu.memory_space<vmem>>, vector<1x128x32xbf16>
    %224 = vector.shape_cast %223 : vector<1x128x32xbf16> to vector<128x32xbf16>
    %cst_161 = arith.constant dense<0.000000e+00> : vector<1x32xf32>
    %225 = tpu.matmul %222, %224, %cst_161 {dimension_numbers = #tpu.dot_dimension_numbers<[1], [0], [0], [1], [0, 0, 1, 1], [], []>} : vector<1x128xbf16>, vector<128x32xbf16>, vector<1x32xf32> -> vector<1x32xf32>
    %226 = arith.addf %221, %225 : vector<1x32xf32>
    %227 = vector.extract_strided_slice %188 {offsets = [56, 0], sizes = [1, 128], strides = [1, 1]} : vector<72x128xbf16> to vector<1x128xbf16>
    %c7_162 = arith.constant 7 : index
    %c0_163 = arith.constant 0 : index
    %c0_164 = arith.constant 0 : index
    %228 = vector.load %arg12[%c7_162, %c0_163, %c0_164] : memref<9x128x32xbf16, #tpu.memory_space<vmem>>, vector<1x128x32xbf16>
    %229 = vector.shape_cast %228 : vector<1x128x32xbf16> to vector<128x32xbf16>
    %cst_165 = arith.constant dense<0.000000e+00> : vector<1x32xf32>
    %230 = tpu.matmul %227, %229, %cst_165 {dimension_numbers = #tpu.dot_dimension_numbers<[1], [0], [0], [1], [0, 0, 1, 1], [], []>} : vector<1x128xbf16>, vector<128x32xbf16>, vector<1x32xf32> -> vector<1x32xf32>
    %231 = arith.addf %226, %230 : vector<1x32xf32>
    %232 = vector.extract_strided_slice %188 {offsets = [64, 0], sizes = [1, 128], strides = [1, 1]} : vector<72x128xbf16> to vector<1x128xbf16>
    %c8_166 = arith.constant 8 : index
    %c0_167 = arith.constant 0 : index
    %c0_168 = arith.constant 0 : index
    %233 = vector.load %arg12[%c8_166, %c0_167, %c0_168] : memref<9x128x32xbf16, #tpu.memory_space<vmem>>, vector<1x128x32xbf16>
    %234 = vector.shape_cast %233 : vector<1x128x32xbf16> to vector<128x32xbf16>
    %cst_169 = arith.constant dense<0.000000e+00> : vector<1x32xf32>
    %235 = tpu.matmul %232, %234, %cst_169 {dimension_numbers = #tpu.dot_dimension_numbers<[1], [0], [0], [1], [0, 0, 1, 1], [], []>} : vector<1x128xbf16>, vector<128x32xbf16>, vector<1x32xf32> -> vector<1x32xf32>
    %236 = arith.addf %231, %235 : vector<1x32xf32>
    %cst_170 = arith.constant 5.000000e-01 : f32
    %237 = vector.broadcast %cst_170 : f32 to vector<1x32xf32>
    %238 = arith.mulf %237, %236 : vector<1x32xf32>
    %cst_171 = arith.constant 0.707106769 : f32
    %239 = vector.broadcast %cst_171 : f32 to vector<1x32xf32>
    %240 = arith.mulf %236, %239 : vector<1x32xf32>
    %241 = math.erf %240 : vector<1x32xf32>
    %cst_172 = arith.constant 1.000000e+00 : f32
    %242 = vector.broadcast %cst_172 : f32 to vector<1x32xf32>
    %243 = arith.addf %242, %241 : vector<1x32xf32>
    %244 = arith.mulf %238, %243 : vector<1x32xf32>
    %c0_173 = arith.constant 0 : index
    %c0_174 = arith.constant 0 : index
    %245 = vector.load %arg14[%c0_173, %c0_174] : memref<1x1xf32, #tpu.memory_space<vmem>>, vector<1x1xf32>
    %cst_175 = arith.constant dense<0.000000e+00> : vector<1x32xf32>
    %246 = tpu.matmul %245, %244, %cst_175 {dimension_numbers = #tpu.dot_dimension_numbers<[1], [0], [0], [1], [0, 0, 1, 1], [], []>} : vector<1x1xf32>, vector<1x32xf32>, vector<1x32xf32> -> vector<1x32xf32>
    %c0_176 = arith.constant 0 : index
    %c0_177 = arith.constant 0 : index
    %c0_178 = arith.constant 0 : index
    %247 = vector.load %arg15[%c0_176, %c0_177, %c0_178] : memref<1x1x32xf32, #tpu.memory_space<vmem>>, vector<1x1x32xf32>
    %248 = vector.shape_cast %247 : vector<1x1x32xf32> to vector<1x32xf32>
    %249 = vector.shape_cast %246 : vector<1x32xf32> to vector<1x1x32xf32>
    tpu.vector_store %arg15[%c0_176, %c0_177, %c0_178], %249 {strides = array<i32>} : memref<1x1x32xf32, #tpu.memory_space<vmem>>, vector<1x1x32xf32>,
    return
  }
  func.func @transform_0(%arg0: i32) -> (i32, i32, i32) {
    %c0_i32 = arith.constant 0 : i32
    %c0_i32_0 = arith.constant 0 : i32
    %c0_i32_1 = arith.constant 0 : i32
    return %arg0, %c0_i32, %c0_i32_0 : i32, i32, i32
  }
  func.func @transform_1(%arg0: i32) -> (i32, i32) {
    %c0_i32 = arith.constant 0 : i32
    %c0_i32_0 = arith.constant 0 : i32
    %c0_i32_1 = arith.constant 0 : i32
    return %c0_i32, %c0_i32_0 : i32, i32
  }
  func.func @transform_2(%arg0: i32) -> (i32, i32, i32) {
    %c0_i32 = arith.constant 0 : i32
    %c0_i32_0 = arith.constant 0 : i32
    %c0_i32_1 = arith.constant 0 : i32
    %c0_i32_2 = arith.constant 0 : i32
    return %c0_i32, %c0_i32_0, %c0_i32_1 : i32, i32, i32
  }
  func.func @transform_3(%arg0: i32) -> (i32, i32) {
    %c0_i32 = arith.constant 0 : i32
    %c0_i32_0 = arith.constant 0 : i32
    %c0_i32_1 = arith.constant 0 : i32
    return %c0_i32, %c0_i32_0 : i32, i32
  }
  func.func @transform_4(%arg0: i32) -> (i32, i32) {
    %c0_i32 = arith.constant 0 : i32
    %c0_i32_0 = arith.constant 0 : i32
    %c0_i32_1 = arith.constant 0 : i32
    return %c0_i32, %c0_i32_0 : i32, i32
  }
  func.func @transform_5(%arg0: i32) -> (i32, i32, i32) {
    %c0_i32 = arith.constant 0 : i32
    %c0_i32_0 = arith.constant 0 : i32
    %c0_i32_1 = arith.constant 0 : i32
    %c0_i32_2 = arith.constant 0 : i32
    return %c0_i32, %c0_i32_0, %c0_i32_1 : i32, i32, i32
  }
  func.func @transform_6(%arg0: i32) -> (i32, i32) {
    %c0_i32 = arith.constant 0 : i32
    %c0_i32_0 = arith.constant 0 : i32
    %c0_i32_1 = arith.constant 0 : i32
    return %c0_i32, %c0_i32_0 : i32, i32
  }
  func.func @transform_7(%arg0: i32) -> (i32, i32) {
    %c0_i32 = arith.constant 0 : i32
    %c0_i32_0 = arith.constant 0 : i32
    %c0_i32_1 = arith.constant 0 : i32
    return %c0_i32, %c0_i32_0 : i32, i32
  }
  func.func @transform_8(%arg0: i32) -> (i32, i32, i32) {
    %c0_i32 = arith.constant 0 : i32
    %c0_i32_0 = arith.constant 0 : i32
    %c0_i32_1 = arith.constant 0 : i32
    %c0_i32_2 = arith.constant 0 : i32
    return %c0_i32, %c0_i32_0, %c0_i32_1 : i32, i32, i32
  }
  func.func @transform_9(%arg0: i32) -> (i32, i32) {
    %c0_i32 = arith.constant 0 : i32
    %c0_i32_0 = arith.constant 0 : i32
    %c0_i32_1 = arith.constant 0 : i32
    return %c0_i32, %c0_i32_0 : i32, i32
  }
  func.func @transform_10(%arg0: i32) -> (i32, i32) {
    %c0_i32 = arith.constant 0 : i32
    %c0_i32_0 = arith.constant 0 : i32
    %c0_i32_1 = arith.constant 0 : i32
    return %c0_i32, %c0_i32_0 : i32, i32
  }
  func.func @transform_11(%arg0: i32) -> (i32, i32, i32) {
    %c0_i32 = arith.constant 0 : i32
    %c0_i32_0 = arith.constant 0 : i32
    %c0_i32_1 = arith.constant 0 : i32
    %c0_i32_2 = arith.constant 0 : i32
    return %c0_i32, %c0_i32_0, %c0_i32_1 : i32, i32, i32
  }
  func.func @transform_12(%arg0: i32) -> (i32, i32) {
    %c0_i32 = arith.constant 0 : i32
    %c0_i32_0 = arith.constant 0 : i32
    %c0_i32_1 = arith.constant 0 : i32
    return %c0_i32, %c0_i32_0 : i32, i32
  }
  func.func @transform_13(%arg0: i32) -> (i32, i32) {
    %c0_i32 = arith.constant 0 : i32
    %c0_i32_0 = arith.constant 0 : i32
    %c0_i32_1 = arith.constant 0 : i32
    return %c0_i32, %c0_i32_0 : i32, i32
  }
  func.func @transform_14(%arg0: i32) -> (i32, i32, i32) {
    %c0_i32 = arith.constant 0 : i32
    %c0_i32_0 = arith.constant 0 : i32
    %c0_i32_1 = arith.constant 0 : i32
    return %arg0, %c0_i32, %c0_i32_0 : i32, i32, i32
  }
}

</mosaic_0001>

<bundles_post_ra>
// kernel: shallow_embedding_forward.1
= control target key start
LH: loop header
LB: loop body
LE: loop exit
PB: predicated region body
PF: predicated region fallthrough
CT: control target
= control target key end

     0   :  { %s8302_s0 = inlined_call_operand.vmem [shape: f32[2,256,4], index: 0, kind: input, shape index: {}]   ;;  %s8303_s1 = inlined_call_operand.vmem [shape: bf16[576,256], index: 1, kind: input, shape index: {}]   ;;  %s8304_s2 = inlined_call_operand.vmem [shape: bf16[9,4,32], index: 2, kind: input, shape index: {}]   ;;  %s8305_s3 = inlined_call_operand.vmem [shape: f32[1,32], index: 3, kind: input, shape index: {}]   ;;  %s8306_s4 = inlined_call_operand.vmem [shape: bf16[144,64], index: 4, kind: input, shape index: {}]   ;;  %s8307_s5 = inlined_call_operand.vmem [shape: bf16[9,32,64], index: 5, kind: input, shape index: {}]   ;;  %s8308_s6 = inlined_call_operand.vmem [shape: f32[1,64], index: 6, kind: input, shape index: {}]   ;;  %s8309_s7 = inlined_call_operand.vmem [shape: bf16[72,16], index: 7, kind: input, shape index: {}]   ;;  %s8310_s8 = inlined_call_operand.vmem [shape: bf16[9,64,128], index: 8, kind: input, shape index: {}]   ;;  %s8311_s9 = inlined_call_operand.vmem [shape: f32[1,128], index: 9, kind: input, shape index: {}]   ;;  %s8312_s10 = inlined_call_operand.vmem [shape: bf16[72,4], index: 10, kind: input, shape index: {}]   ;;  %s8313_s11 = inlined_call_operand.vmem [shape: bf16[9,128,32], index: 11, kind: input, shape index: {}]   ;;  %s8314_s12 = inlined_call_operand.vmem [shape: f32[1,32], index: 12, kind: input, shape index: {}]   ;;  %s8315_s13 = inlined_call_operand.<no memory space> [shape: f32[1,1], index: 13, kind: input, shape index: {}]   ;;  %s8316_s14 = inlined_call_operand.hbm [shape: f32[2,1,32], index: 14, kind: output, shape index: {}]  }
   0x1   :  { %8317 = sst [smem:[#allocation7_spill]] %s8302_s0  ;;  %v19_v0 = vstv %s8315_s13 }
   0x2   :  { %20 = vst [vmem:[#allocation2] sm:$0x1] %v19_v0 }
   0x3   :  { %21 = vsyncpa [#allocation4], 0 }
   0x4   :  { %23 = vsyncpa [#allocation4 + $0x1], 0  ;;  %s7031_s15 = smov 0   ;;  %s7033_s16 = smov 0  }
   0x5   :  { %s7035_s17 = smov 0   ;;  %s7037_s18 = smov 0  }
   0x6 LB: > { %s7052_s13 = sadd.s32 4294967295, %s6947_s18   ;;  %s5046_s19 = sadd.s32 4294967294, %s6947_s18   ;;  %s6947_s18 = sphi %s7037_s18, %s8326_s18   ;;  %s6943_s17 = sphi %s7035_s17, %s8325_s17   ;;  %s6939_s16 = sphi %s7033_s16, %s8324_s16   ;;  %s6935_s15 = sphi %s7031_s15, %s8323_s15  }
   0x7   : > { %s7056_s20 = sadd.s32 1, %s6947_s18   ;;  %s335_s21 = sadd.s32 1, %s6943_s17 }
   0x8   : > { %s332_s22 = ssub.s32 %s6947_s18, %s7056_s20  ;;  %p345_p0 = scmp.ne.s32.totalorder %s6943_s17, %s6939_s16 }
   0x9   : > { %p333_p1 = scmp.eq.s32.totalorder %s332_s22, 0  ;;  %p346_p2 = scmp.eq.s32.totalorder %s7052_s13, 1 }
   0xa   : > { %p351_p3 = scmp.ne.s32.totalorder %s6939_s16, %s6935_s15  ;;  %p352_p4 = scmp.eq.s32.totalorder %s5046_s19, 1 }
   0xb   : > { %s7067_s23 = scalar_select %p333_p1, %s6943_s17, %s335_s21  }
   0xc   : > { %p7069_p5 = por %p346_p2, %p345_p0  ;;  %p7073_p6 = por %p352_p4, %p351_p3 }
   0xd   : > { %8318 = sst [smem:[#allocation6_spill]] %s7067_s23  ;;  %p5049_p7 = scmp.ge.s32.totalorder %s6947_s18, 1 }
   0xe   : > { %p417_p8 = scmp.lt.s32.totalorder %s6947_s18, 3 }
  0x10   : > { %p418_p9 = pnand %p5049_p7, %p417_p8 }
  0x11   : > { %p462_p10 = scmp.lt.s32.totalorder (!%p418_p9), %s7052_s13, 1  ;;  %v6949_v1 = vmov (!%p418_p9), 0   ;;  %v6610_v2 = vld [vmem:[%s8303_s1 + $0x4] ss:$8 sps:$4 sm:$0xff] (!%p418_p9)   ;;  %s8321_s0 = sld [smem:[#allocation7_spill]] (!%p418_p9)  ;;  %vm1327_vm0 = vcmask (!%p418_p9), 1041408  }
  0x12   : > { %421 = sbr.rel (%p418_p9) target bundleno = 2864 (0xb30), region = 76  ;;  %948 = vmatprep.subr.bf16.mxu0 (!%p418_p9), %v6949_v1  ;;  %6351 = vmatprep.subr.bf16.mxu1 (!%p418_p9), %v6949_v1  ;;  %v6608_v51 = vld [vmem:[%s8303_s1] ss:$8 sps:$4 sm:$0xff] (!%p418_p9)   ;;  %v6611_v52 = vld [vmem:[%s8303_s1 + $0x14] ss:$8 sps:$4 sm:$0xff] (!%p418_p9)   ;;  %vm1314_vm1 = vcmask (!%p418_p9), 31744  }
  0x13   : > { %980 = vmatprep.mubr.bf16.mxu0 (!%p418_p9), %v6610_v2  ;;  %v6613_v53 = vld [vmem:[%s8303_s1 + $0x10] ss:$8 sps:$4 sm:$0xff] (!%p418_p9)   ;;  %v6614_v54 = vld [vmem:[%s8303_s1 + $0x24] ss:$8 sps:$4 sm:$0xff] (!%p418_p9)   ;;  %v6616_v55 = vld [vmem:[%s8303_s1 + $0x20] ss:$8 sps:$4 sm:$0xff] (!%p418_p9)  }
  0x14   : > { %v6617_v56 = vld [vmem:[%s8303_s1 + $0x34] ss:$8 sps:$4 sm:$0xff] (!%p418_p9)   ;;  %v6619_v57 = vld [vmem:[%s8303_s1 + $0x30] ss:$8 sps:$4 sm:$0xff] (!%p418_p9)   ;;  %v6620_v58 = vld [vmem:[%s8303_s1 + $0x44] ss:$8 sps:$4 sm:$0xff] (!%p418_p9)  }
  0x15   : > { %v6622_v59 = vld [vmem:[%s8303_s1 + $0x40] ss:$8 sps:$4 sm:$0xff] (!%p418_p9)   ;;  %v6623_v60 = vld [vmem:[%s8303_s1 + $0x54] ss:$8 sps:$4 sm:$0xff] (!%p418_p9)   ;;  %v6671_v61 = vld [vmem:[%s8303_s1 + $0x1d0] ss:$8 sps:$4 sm:$0xff] (!%p418_p9)  }
  0x16   : > { %v6673_v62 = vld [vmem:[%s8303_s1 + $0x1d4] ss:$8 sps:$4 sm:$0xff] (!%p418_p9)   ;;  %v6625_v63 = vld [vmem:[%s8303_s1 + $0x50] ss:$8 sps:$4 sm:$0xff] (!%p418_p9)   ;;  %v6626_v0 = vld [vmem:[%s8303_s1 + $0x64] ss:$8 sps:$4 sm:$0xff] (!%p418_p9)  }
  0x17   : > { %1212 = vmatprep.mubr.bf16.mxu1 (!%p418_p9), %v6673_v62  ;;  %v6681_v2 = vld [vmem:[%s8303_s1 + $0x1e0] ss:$8 sps:$4 sm:$0xff] (!%p418_p9)   ;;  %v6713_v62 = vld [vmem:[%s8303_s1 + $0x1c4] ss:$8 sps:$4 sm:$0xff] (!%p418_p9)   ;;  %vm6951_vm2 = vmmov (!%p418_p9), 0   ;;  %vm2231_vm3 = vcmask (!%p418_p9), 523264  }
  0x18   : > { %vm2397_vm4 = vcmask (!%p418_p9), 261120   ;;  %vm2991_vm5 = vcmask (!%p418_p9), 130048   ;;  %vm4902_vm6 = vcmask (!%p418_p9), 1040384   ;;  %vm4898_vm7 = vcmask (!%p418_p9), 7168   ;;  %s460_s22 = sand.u32 (!%p418_p9), 1, %s6939_s16   ;;  %s5579_s26 = sshll.u32 (!%p418_p9), %s7052_s13, 4 }
  0x19   : > { %s463_s28 = scalar_select %p462_p10, %s7052_s13, 1  ;;  %vm4976_vm8 = vcmask 253952  }
  0x1a   : > { %s461_s27 = scalar_lea.vmem [#allocation3], %s460_s22  ;;  %s4979_s30 = scalar_lea.sflag [#allocation4], %s460_s22 }
  0x1b   : > { %s5582_s29 = sshll.u32 %s463_s28, 8  ;;  %s4991_s28 = sshll.u32 %s461_s27, 4  ;;  %s8262_s28 = int_to_ptr.vmem [resolvable:$true] %s4991_s28 }
  0x1c   : > { %s7089_s21 = scalar_lea.vmem %s8321_s0, %s5582_s29  ;;  %s8260_s29 = scalar_lea.hbm %s8316_s14, %s5579_s26 }
  0x1d   : > { %v468_v3 = vld [vmem:[%s7089_s21] sm:$0xff]  ;;  %v469_v4 = vld [vmem:[%s7089_s21 + $0x8] sm:$0xff]  ;;  %v470_v5 = vld [vmem:[%s7089_s21 + $0x10] sm:$0xff]  ;;  %s6885_s19 = scalar_lea.vmem %s8262_s28, 16  ;;  %s6952_s13 = smov [#allocation3]  }
  0x1e   : > { %v500_v6 = vpack.c.bf16 %v469_v4, %v468_v3  ;;  %v471_v7 = vld [vmem:[%s7089_s21 + $0x18] sm:$0xff]  ;;  %v472_v9 = vld [vmem:[%s7089_s21 + $0x20] sm:$0xff]  ;;  %v473_v10 = vld [vmem:[%s7089_s21 + $0x28] sm:$0xff]  ;;  %p6886_p11 = scmp.ne.s32.totalorder %s8262_s28, %s6885_s19 }
  0x1f   : > { %v501_v8 = vpack.c.bf16 %v471_v7, %v470_v5  ;;  %v502_v11 = vpack.c.bf16 %v473_v10, %v472_v9  ;;  %v474_v12 = vld [vmem:[%s7089_s21 + $0x30] sm:$0xff]  ;;  %v475_v13 = vld [vmem:[%s7089_s21 + $0x38] sm:$0xff]  ;;  %v476_v15 = vld [vmem:[%s7089_s21 + $0x40] sm:$0xff] }
  0x20   : > { %949 = vmatpush1.bf16.msra.mxu0 %v500_v6  ;;  %6367 = vmatpush1.bf16.msra.mxu1 %v500_v6  ;;  %v503_v14 = vpack.c.bf16 %v475_v13, %v474_v12  ;;  %v477_v16 = vld [vmem:[%s7089_s21 + $0x48] sm:$0xff]  ;;  %v478_v18 = vld [vmem:[%s7089_s21 + $0x50] sm:$0xff]  ;;  %v479_v19 = vld [vmem:[%s7089_s21 + $0x58] sm:$0xff]  ;;  %p6887_p12 = pnand %p6886_p11, %p7069_p5 }
  0x21   : > { %950 = vmatprep.subr.bf16.mxu0 %v6949_v1  ;;  %6352 = vmatprep.subr.bf16.mxu1 %v6949_v1  ;;  %v504_v17 = vpack.c.bf16 %v477_v16, %v476_v15  ;;  %v505_v20 = vpack.c.bf16 %v479_v19, %v478_v18  ;;  %v480_v21 = vld [vmem:[%s7089_s21 + $0x60] sm:$0xff]  ;;  %v481_v22 = vld [vmem:[%s7089_s21 + $0x68] sm:$0xff]  ;;  %v482_v23 = vld [vmem:[%s7089_s21 + $0x70] sm:$0xff] }
  0x22   : > { %v483_v24 = vld [vmem:[%s7089_s21 + $0x78] sm:$0xff]  ;;  %v506_v25 = vpack.c.bf16 %v481_v22, %v480_v21  ;;  %v484_v26 = vld [vmem:[%s7089_s21 + $0x80] sm:$0xff]  ;;  %v485_v28 = vld [vmem:[%s7089_s21 + $0x88] sm:$0xff]  ;;  %p6888_p13 = pneg %p6887_p12 }
  0x23   : > { %v507_v27 = vpack.c.bf16 %v483_v24, %v482_v23  ;;  %v486_v29 = vld [vmem:[%s7089_s21 + $0x90] sm:$0xff]  ;;  %v487_v30 = vld [vmem:[%s7089_s21 + $0x98] sm:$0xff]  ;;  %v508_v31 = vpack.c.bf16 %v485_v28, %v484_v26  ;;  %v488_v32 = vld [vmem:[%s7089_s21 + $0xa0] sm:$0xff] }
  0x24   : > { %951 = vmatpush1.bf16.msra.mxu0 %v501_v8  ;;  %6368 = vmatpush1.bf16.msra.mxu1 %v501_v8  ;;  %v509_v33 = vpack.c.bf16 %v487_v30, %v486_v29  ;;  %v489_v34 = vld [vmem:[%s7089_s21 + $0xa8] sm:$0xff]  ;;  %v490_v35 = vld [vmem:[%s7089_s21 + $0xb0] sm:$0xff]  ;;  %v491_v36 = vld [vmem:[%s7089_s21 + $0xb8] sm:$0xff] }
  0x25   : > { %952 = vmatprep.subr.bf16.mxu0 %v6949_v1  ;;  %6353 = vmatprep.subr.bf16.mxu1 %v6949_v1  ;;  %v510_v37 = vpack.c.bf16 %v489_v34, %v488_v32  ;;  %v492_v38 = vld [vmem:[%s7089_s21 + $0xc0] sm:$0xff]  ;;  %v511_v39 = vpack.c.bf16 %v491_v36, %v490_v35  ;;  %v493_v40 = vld [vmem:[%s7089_s21 + $0xc8] sm:$0xff]  ;;  %v494_v41 = vld [vmem:[%s7089_s21 + $0xd0] sm:$0xff] }
  0x26   : > { %v495_v42 = vld [vmem:[%s7089_s21 + $0xd8] sm:$0xff]  ;;  %v512_v43 = vpack.c.bf16 %v493_v40, %v492_v38  ;;  %v496_v44 = vld [vmem:[%s7089_s21 + $0xe0] sm:$0xff]  ;;  %v497_v46 = vld [vmem:[%s7089_s21 + $0xe8] sm:$0xff] }
  0x27   : > { %v513_v45 = vpack.c.bf16 %v495_v42, %v494_v41  ;;  %v498_v47 = vld [vmem:[%s7089_s21 + $0xf0] sm:$0xff]  ;;  %v499_v48 = vld [vmem:[%s7089_s21 + $0xf8] sm:$0xff]  ;;  %v514_v49 = vpack.c.bf16 %v497_v46, %v496_v44  ;;  %v6628_v3 = vld [vmem:[%s8303_s1 + $0x60] ss:$8 sps:$4 sm:$0xff]   ;;  %s6889_s21 = sshll.u32 %s6952_s13, 4  ;;  %s6890_s21 = int_to_ptr.vmem [resolvable:$false] %s6889_s21 }
  0x28   : > { %953 = vmatpush1.bf16.msra.mxu0 %v502_v11  ;;  %6369 = vmatpush1.bf16.msra.mxu1 %v502_v11  ;;  %v515_v50 = vpack.c.bf16 %v499_v48, %v498_v47  ;;  %v6629_v4 = vld [vmem:[%s8303_s1 + $0x74] ss:$8 sps:$4 sm:$0xff]   ;;  %v6687_v6 = vld [vmem:[%s8303_s1 + $0x1f0] ss:$8 sps:$4 sm:$0xff]   ;;  %v6632_v8 = vld [vmem:[%s8303_s1 + $0x84] ss:$8 sps:$4 sm:$0xff]   ;;  %p6892_p0 = scmp.lt.s32.totalorder %s8262_s28, %s6890_s21 }
  0x29   : > { %954 = vmatprep.subr.bf16.mxu0 %v6949_v1  ;;  %6354 = vmatprep.subr.bf16.mxu1 %v6949_v1  ;;  %v6683_v5 = vld [vmem:[%s8303_s1 + $0x1f4] ss:$8 sps:$4 sm:$0xff]   ;;  %v6631_v7 = vld [vmem:[%s8303_s1 + $0x70] ss:$8 sps:$4 sm:$0xff]   ;;  %v6689_v9 = vld [vmem:[%s8303_s1 + $0x204] ss:$8 sps:$4 sm:$0xff]  }
  0x2a   : > { %v6693_v10 = vld [vmem:[%s8303_s1 + $0x200] ss:$8 sps:$4 sm:$0xff]   ;;  %v6635_v12 = vld [vmem:[%s8303_s1 + $0x94] ss:$8 sps:$4 sm:$0xff]   ;;  %v6637_v15 = vld [vmem:[%s8303_s1 + $0x90] ss:$8 sps:$4 sm:$0xff]  }
  0x2b   : > { %v6634_v11 = vld [vmem:[%s8303_s1 + $0x80] ss:$8 sps:$4 sm:$0xff]   ;;  %v6695_v13 = vld [vmem:[%s8303_s1 + $0x214] ss:$8 sps:$4 sm:$0xff]   ;;  %v6638_v16 = vld [vmem:[%s8303_s1 + $0xa4] ss:$8 sps:$4 sm:$0xff]  }
  0x2c   : > { %955 = vmatpush1.bf16.msra.mxu0 %v503_v14  ;;  %6370 = vmatpush1.bf16.msra.mxu1 %v503_v14  ;;  %v6699_v14 = vld [vmem:[%s8303_s1 + $0x210] ss:$8 sps:$4 sm:$0xff]   ;;  %v6705_v18 = vld [vmem:[%s8303_s1 + $0x220] ss:$8 sps:$4 sm:$0xff]   ;;  %v6707_v22 = vld [vmem:[%s8303_s1 + $0x234] ss:$8 sps:$4 sm:$0xff]  }
  0x2d   : > { %956 = vmatprep.subr.bf16.mxu0 %v6949_v1  ;;  %6355 = vmatprep.subr.bf16.mxu1 %v6949_v1  ;;  %v6640_v19 = vld [vmem:[%s8303_s1 + $0xa0] ss:$8 sps:$4 sm:$0xff]   ;;  %v6643_v21 = vld [vmem:[%s8303_s1 + $0xb0] ss:$8 sps:$4 sm:$0xff]   ;;  %v6644_v23 = vld [vmem:[%s8303_s1 + $0xc4] ss:$8 sps:$4 sm:$0xff]  }
  0x2e   : > { %v6711_v24 = vld [vmem:[%s8303_s1 + $0x230] ss:$8 sps:$4 sm:$0xff]   ;;  %v6646_v26 = vld [vmem:[%s8303_s1 + $0xc0] ss:$8 sps:$4 sm:$0xff]   ;;  %v6647_v28 = vld [vmem:[%s8303_s1 + $0xd4] ss:$8 sps:$4 sm:$0xff]  }
  0x2f   : > { %v6649_v29 = vld [vmem:[%s8303_s1 + $0xd0] ss:$8 sps:$4 sm:$0xff]   ;;  %v6650_v30 = vld [vmem:[%s8303_s1 + $0xe4] ss:$8 sps:$4 sm:$0xff]   ;;  %v6653_v32 = vld [vmem:[%s8303_s1 + $0xf4] ss:$8 sps:$4 sm:$0xff]  }
  0x30   : > { %957 = vmatpush1.bf16.msra.mxu0 %v504_v17  ;;  %6371 = vmatpush1.bf16.msra.mxu1 %v504_v17  ;;  %v6701_v17 = vld [vmem:[%s8303_s1 + $0x224] ss:$8 sps:$4 sm:$0xff]   ;;  %v7299_v35 = vld [vmem:[%s8304_s2 + $0x2] sm:$0x3]  ;;  %v6661_v38 = vld [vmem:[%s8303_s1 + $0x110] ss:$8 sps:$4 sm:$0xff]  }
  0x31   : > { %958 = vmatprep.subr.bf16.mxu0 %v6949_v1  ;;  %6356 = vmatprep.subr.bf16.mxu1 %v6949_v1  ;;  %v6656_v34 = vld [vmem:[%s8303_s1 + $0x104] ss:$8 sps:$4 sm:$0xff]   ;;  %v6658_v36 = vld [vmem:[%s8303_s1 + $0x100] ss:$8 sps:$4 sm:$0xff]   ;;  %v6665_v41 = vld [vmem:[%s8303_s1 + $0x134] ss:$8 sps:$4 sm:$0xff]  }
  0x32   : > { %v6664_v40 = vld [vmem:[%s8303_s1 + $0x120] ss:$8 sps:$4 sm:$0xff]   ;;  %v6667_v42 = vld [vmem:[%s8303_s1 + $0x130] ss:$8 sps:$4 sm:$0xff]   ;;  %v6679_v47 = vld [vmem:[%s8303_s1 + $0x164] ss:$8 sps:$4 sm:$0xff]  }
  0x33   : > { %v6670_v44 = vld [vmem:[%s8303_s1 + $0x140] ss:$8 sps:$4 sm:$0xff]   ;;  %v6676_v46 = vld [vmem:[%s8303_s1 + $0x150] ss:$8 sps:$4 sm:$0xff]   ;;  %s6891_s0 = scalar_lea.vmem %s6890_s21, 32 }
  0x34   : > { %959 = vmatpush1.bf16.msra.mxu0 %v505_v20  ;;  %6372 = vmatpush1.bf16.msra.mxu1 %v505_v20  ;;  %v6641_v20 = vld [vmem:[%s8303_s1 + $0xb4] ss:$8 sps:$4 sm:$0xff]   ;;  %v6682_v48 = vld [vmem:[%s8303_s1 + $0x160] ss:$8 sps:$4 sm:$0xff]   ;;  %p6893_p1 = scmp.lt.s32.totalorder %s6891_s0, %s6885_s19 }
  0x35   : > { %960 = vmatprep.subr.bf16.mxu0 %v6949_v1  ;;  %6357 = vmatprep.subr.bf16.mxu1 %v6949_v1 }
  0x36   : > { %p6894_p2 = por %p6893_p1, %p6892_p0 }
  0x38   : > { %961 = vmatpush1.bf16.msra.mxu0 %v506_v25  ;;  %6373 = vmatpush1.bf16.msra.mxu1 %v506_v25  ;;  %v1313_v25 = vld [vmem:[%s8304_s2] sm:$0x3]  ;;  %p6895_p3 = pnand %p6894_p2, %p6888_p13 }
  0x39   : > { %962 = vmatprep.subr.bf16.mxu0 %v6949_v1  ;;  %6358 = vmatprep.subr.bf16.mxu1 %v6949_v1 }
  0x3c   : > { %963 = vmatpush1.bf16.msra.mxu0 %v507_v27  ;;  %6374 = vmatpush1.bf16.msra.mxu1 %v507_v27  ;;  %v1329_v27 = vsel %vm1327_vm0, %v1313_v25, 0 }
  0x3d   : > { %964 = vmatprep.subr.bf16.mxu0 %v6949_v1  ;;  %6359 = vmatprep.subr.bf16.mxu1 %v6949_v1 }
  0x40   : > { %965 = vmatpush1.bf16.msra.mxu0 %v508_v31  ;;  %6375 = vmatpush1.bf16.msra.mxu1 %v508_v31  ;;  %v6652_v31 = vld [vmem:[%s8303_s1 + $0xe0] ss:$8 sps:$4 sm:$0xff]  }
  0x41   : > { %966 = vmatprep.subr.bf16.mxu0 %v6949_v1  ;;  %6360 = vmatprep.subr.bf16.mxu1 %v6949_v1 }
  0x44   : > { %967 = vmatpush1.bf16.msra.mxu0 %v509_v33  ;;  %6376 = vmatpush1.bf16.msra.mxu1 %v509_v33  ;;  %v6655_v33 = vld [vmem:[%s8303_s1 + $0xf0] ss:$8 sps:$4 sm:$0xff]  }
  0x45   : > { %968 = vmatprep.subr.bf16.mxu0 %v6949_v1  ;;  %6361 = vmatprep.subr.bf16.mxu1 %v6949_v1 }
  0x48   : > { %969 = vmatpush1.bf16.msra.mxu0 %v510_v37  ;;  %6377 = vmatpush1.bf16.msra.mxu1 %v510_v37  ;;  %v6659_v37 = vld [vmem:[%s8303_s1 + $0x114] ss:$8 sps:$4 sm:$0xff]  }
  0x49   : > { %970 = vmatprep.subr.bf16.mxu0 %v6949_v1  ;;  %6362 = vmatprep.subr.bf16.mxu1 %v6949_v1 }
  0x4c   : > { %971 = vmatpush1.bf16.msra.mxu0 %v511_v39  ;;  %6378 = vmatpush1.bf16.msra.mxu1 %v511_v39  ;;  %v6662_v39 = vld [vmem:[%s8303_s1 + $0x124] ss:$8 sps:$4 sm:$0xff]  }
  0x4d   : > { %972 = vmatprep.subr.bf16.mxu0 %v6949_v1  ;;  %6363 = vmatprep.subr.bf16.mxu1 %v6949_v1 }
  0x50   : > { %973 = vmatpush1.bf16.msra.mxu0 %v512_v43  ;;  %6379 = vmatpush1.bf16.msra.mxu1 %v512_v43  ;;  %v6668_v43 = vld [vmem:[%s8303_s1 + $0x144] ss:$8 sps:$4 sm:$0xff]  }
  0x51   : > { %974 = vmatprep.subr.bf16.mxu0 %v6949_v1  ;;  %6364 = vmatprep.subr.bf16.mxu1 %v6949_v1 }
  0x54   : > { %975 = vmatpush1.bf16.msra.mxu0 %v513_v45  ;;  %6380 = vmatpush1.bf16.msra.mxu1 %v513_v45  ;;  %v6674_v45 = vld [vmem:[%s8303_s1 + $0x154] ss:$8 sps:$4 sm:$0xff]  }
  0x55   : > { %976 = vmatprep.subr.bf16.mxu0 %v6949_v1  ;;  %6365 = vmatprep.subr.bf16.mxu1 %v6949_v1 }
  0x58   : > { %977 = vmatpush1.bf16.msra.mxu0 %v514_v49  ;;  %6381 = vmatpush1.bf16.msra.mxu1 %v514_v49  ;;  %v6685_v49 = vld [vmem:[%s8303_s1 + $0x174] ss:$8 sps:$4 sm:$0xff]  }
  0x59   : > { %978 = vmatprep.subr.bf16.mxu0 %v6949_v1  ;;  %6366 = vmatprep.subr.bf16.mxu1 %v6949_v1  ;;  %v6677_v1 = vld [vmem:[%s8303_s1 + $0x1e4] ss:$8 sps:$4 sm:$0xff]  }
  0x5c   : > { %979 = vmatpush1.bf16.msra.mxu0 %v515_v50  ;;  %6382 = vmatpush1.bf16.msra.mxu1 %v515_v50  ;;  %v6688_v50 = vld [vmem:[%s8303_s1 + $0x170] ss:$8 sps:$4 sm:$0xff]  }
  0x5d   : > { %6557 = vmatprep.subr.msk.bf16.mxu1 %vm1327_vm0, %v1313_v25 }
  0x5f   : > { %981 = vmatmul.mubr.bf16.vlgmr.msra.gmra.mrb[0].mxu0 %v6608_v51  ;;  %1213 = vmatmul.mubr.bf16.vlgmr.msra.gmra.mrb[0].mxu1 %v6671_v61  ;;  %v6691_v51 = vld [vmem:[%s8303_s1 + $0x184] ss:$8 sps:$4 sm:$0xff]  }
  0x60   : > { %988 = vmatprep.mubr.bf16.mxu0 %v6611_v52  ;;  %1220 = vmatprep.mubr.bf16.mxu1 %v6677_v1  ;;  %v6694_v52 = vld [vmem:[%s8303_s1 + $0x180] ss:$8 sps:$4 sm:$0xff]  }
  0x61   : > { %5809 = vmatpush3.bf16.msra.mxu1 %v1329_v27 }
  0x62   : > { %6558 = vmatprep.subr.msk.bf16.mxu1 %vm1327_vm0, %v7299_v35 }
  0x67   : > { %989 = vmatmul.mubr.bf16.gmra.mrb[4].mxu0 %v6613_v53  ;;  %1221 = vmatmul.mubr.bf16.gmra.mrb[4].mxu1 %v6681_v2  ;;  %v6697_v53 = vld [vmem:[%s8303_s1 + $0x194] ss:$8 sps:$4 sm:$0xff]  }
  0x68   : > { %996 = vmatprep.mubr.bf16.mxu0 %v6614_v54  ;;  %1228 = vmatprep.mubr.bf16.mxu1 %v6683_v5  ;;  %v6700_v54 = vld [vmem:[%s8303_s1 + $0x190] ss:$8 sps:$4 sm:$0xff]  }
  0x6f   : > { %997 = vmatmul.mubr.bf16.gmra.mrb[8].mxu0 %v6616_v55  ;;  %1229 = vmatmul.mubr.bf16.gmra.mrb[8].mxu1 %v6687_v6  ;;  %v6703_v55 = vld [vmem:[%s8303_s1 + $0x1a4] ss:$8 sps:$4 sm:$0xff]  }
  0x70   : > { %1004 = vmatprep.mubr.bf16.mxu0 %v6617_v56  ;;  %1236 = vmatprep.mubr.bf16.mxu1 %v6689_v9  ;;  %v6706_v56 = vld [vmem:[%s8303_s1 + $0x1a0] ss:$8 sps:$4 sm:$0xff]  }
  0x77   : > { %1005 = vmatmul.mubr.bf16.gmra.mrb[12].mxu0 %v6619_v57  ;;  %1237 = vmatmul.mubr.bf16.gmra.mrb[12].mxu1 %v6693_v10  ;;  %v6709_v57 = vld [vmem:[%s8303_s1 + $0x1b4] ss:$8 sps:$4 sm:$0xff]  }
  0x78   : > { %1012 = vmatprep.mubr.bf16.mxu0 %v6620_v58  ;;  %1244 = vmatprep.mubr.bf16.mxu1 %v6695_v13 }
  0x7f   : > { %1013 = vmatmul.mubr.bf16.gmra.mrb[16].mxu0 %v6622_v59  ;;  %1245 = vmatmul.mubr.bf16.gmra.mrb[16].mxu1 %v6699_v14 }
  0x80   : > { %1020 = vmatprep.mubr.bf16.mxu0 %v6623_v60  ;;  %1252 = vmatprep.mubr.bf16.mxu1 %v6701_v17  ;;  %v6712_v60 = vld [vmem:[%s8303_s1 + $0x1b0] ss:$8 sps:$4 sm:$0xff]  }
  0x87   : > { %1021 = vmatmul.mubr.bf16.gmra.mrb[20].mxu0 %v6625_v63  ;;  %1253 = vmatmul.mubr.bf16.gmra.mrb[20].mxu1 %v6705_v18 }
  0x88   : > { %1028 = vmatprep.mubr.bf16.mxu0 %v6626_v0  ;;  %1260 = vmatprep.mubr.bf16.mxu1 %v6707_v22 }
  0x8f   : > { %1029 = vmatmul.mubr.bf16.gmra.mrb[24].mxu0 %v6628_v3  ;;  %1261 = vmatmul.mubr.bf16.gmra.mrb[24].mxu1 %v6711_v24  ;;  %v6715_v3 = vld [vmem:[%s8303_s1 + $0x1c0] ss:$8 sps:$4 sm:$0xff]  }
  0x90   : > { %1036 = vmatprep.mubr.bf16.mxu0 %v6629_v4 }
  0x97   : > { %1037 = vmatmul.mubr.bf16.gmra.mrb[28].mxu0 %v6631_v7  ;;  %v1419_v7 = vsel %vm1327_vm0, %v7299_v35, 0 }
  0x98   : > { %1044 = vmatprep.mubr.bf16.mxu0 %v6632_v8  ;;  %v5134_v8 = vld [vmem:[%s8304_s2 + $0x4] sm:$0x3] }
  0x9f   : > { %1045 = vmatmul.mubr.bf16.gmra.mrb[32].mxu0 %v6634_v11 }
  0xa0   : > { %1052 = vmatprep.mubr.bf16.mxu0 %v6635_v12 }
  0xa7   : > { %1053 = vmatmul.mubr.bf16.gmra.mrb[36].mxu0 %v6637_v15 }
  0xa8   : > { %1060 = vmatprep.mubr.bf16.mxu0 %v6638_v16 }
  0xaf   : > { %1061 = vmatmul.mubr.bf16.gmra.mrb[40].mxu0 %v6640_v19 }
  0xb0   : > { %1068 = vmatprep.mubr.bf16.mxu0 %v6641_v20 }
  0xb7   : > { %1069 = vmatmul.mubr.bf16.gmra.mrb[44].mxu0 %v6643_v21 }
  0xb8   : > { %1076 = vmatprep.mubr.bf16.mxu0 %v6644_v23 }
  0xbf   : > { %1077 = vmatmul.mubr.bf16.gmra.mrb[48].mxu0 %v6646_v26 }
  0xc0   : > { %1084 = vmatprep.mubr.bf16.mxu0 %v6647_v28 }
  0xc7   : > { %1085 = vmatmul.mubr.bf16.gmra.mrb[52].mxu0 %v6649_v29  ;;  %v1509_v29 = vsel %vm1327_vm0, %v5134_v8, 0 }
  0xc8   : > { %1092 = vmatprep.mubr.bf16.mxu0 %v6650_v30  ;;  %v5139_v30 = vld [vmem:[%s8304_s2 + $0x6] sm:$0x3] }
  0xcf   : > { %1093 = vmatmul.mubr.bf16.gmra.mrb[56].mxu0 %v6652_v31 }
  0xd0   : > { %1100 = vmatprep.mubr.bf16.mxu0 %v6653_v32 }
  0xd7   : > { %1101 = vmatmul.mubr.bf16.gmra.mrb[60].mxu0 %v6655_v33 }
  0xd8   : > { %1108 = vmatprep.mubr.bf16.mxu0 %v6656_v34 }
  0xdf   : > { %1109 = vmatmul.mubr.bf16.gmra.mrb[64].mxu0 %v6658_v36 }
  0xe0   : > { %1116 = vmatprep.mubr.bf16.mxu0 %v6659_v37 }
  0xe7   : > { %1117 = vmatmul.mubr.bf16.gmra.mrb[68].mxu0 %v6661_v38 }
  0xe8   : > { %1124 = vmatprep.mubr.bf16.mxu0 %v6662_v39 }
  0xef   : > { %1125 = vmatmul.mubr.bf16.gmra.mrb[72].mxu0 %v6664_v40 }
  0xf0   : > { %1132 = vmatprep.mubr.bf16.mxu0 %v6665_v41 }
  0xf7   : > { %1133 = vmatmul.mubr.bf16.gmra.mrb[76].mxu0 %v6667_v42 }
  0xf8   : > { %1140 = vmatprep.mubr.bf16.mxu0 %v6668_v43 }
  0xff   : > { %1141 = vmatmul.mubr.bf16.gmra.mrb[80].mxu0 %v6670_v44 }
 0x100   : > { %1148 = vmatprep.mubr.bf16.mxu0 %v6674_v45 }
 0x107   : > { %1149 = vmatmul.mubr.bf16.gmra.mrb[84].mxu0 %v6676_v46 }
 0x108   : > { %1156 = vmatprep.mubr.bf16.mxu0 %v6679_v47 }
 0x10f   : > { %1157 = vmatmul.mubr.bf16.gmra.mrb[88].mxu0 %v6682_v48 }
 0x110   : > { %1164 = vmatprep.mubr.bf16.mxu0 %v6685_v49 }
 0x117   : > { %1165 = vmatmul.mubr.bf16.gmra.mrb[92].mxu0 %v6688_v50 }
 0x118   : > { %1172 = vmatprep.mubr.bf16.mxu0 %v6691_v51 }
 0x11f   : > { %1173 = vmatmul.mubr.bf16.gmra.mrb[96].mxu0 %v6694_v52 }
 0x120   : > { %1180 = vmatprep.mubr.bf16.mxu0 %v6697_v53 }
 0x127   : > { %1181 = vmatmul.mubr.bf16.gmra.mrb[100].mxu0 %v6700_v54 }
 0x128   : > { %1188 = vmatprep.mubr.bf16.mxu0 %v6703_v55 }
 0x12f   : > { %1189 = vmatmul.mubr.bf16.gmra.mrb[104].mxu0 %v6706_v56  ;;  %v1599_v56 = vsel %vm1327_vm0, %v5139_v30, 0 }
 0x130   : > { %1196 = vmatprep.mubr.bf16.mxu0 %v6709_v57  ;;  %v5144_v57 = vld [vmem:[%s8304_s2 + $0x8] sm:$0x3] }
 0x132   : > { %v982_v58 = vpop.f32.mrb[0].mxu0  ;;  %v7398_v46 = vpop.f32.mrb[0].mxu1 }
 0x133   : > { %v984_v59 = vpop.f32.mrb[1].mxu0  ;;  %v1216_v47 = vpop.f32.mrb[1].mxu1 }
 0x134   : > { %v985_v61 = vpop.f32.mrb[2].mxu0  ;;  %v7400_v49 = vpop.f32.mrb[2].mxu1 }
 0x135   : > { %v1269_v63 = vpack.c.bf16 %v985_v61, %v982_v58  ;;  %v987_v0 = vpop.f32.mrb[3].mxu0  ;;  %v1298_v51 = vpack.c.bf16 %v7400_v49, %v7398_v46  ;;  %v1219_v52 = vpop.f32.mrb[3].mxu1  ;;  %v6950_v46 = vmov 0.0   ;;  %v5124_v49 = vld [vmem:[%s8305_s3] ss:$0 sm:$0xff] }
 0x136   : > { %6144 = vmatprep.subr.bf16.mxu0 %v6950_v46 }
 0x137   : > { %1197 = vmatmul.mubr.bf16.gmra.mrb[108].mxu0 %v6712_v60  ;;  %5810 = vmatprep.mubr.msk.bf16.mxu1 %vm1314_vm1, %v1269_v63 }
 0x138   : > { %1204 = vmatprep.mubr.bf16.mxu0 %v6713_v62 }
 0x13a   : > { %v990_v1 = vpop.f32.mrb[4].mxu0  ;;  %v7409_v58 = vpop.f32.mrb[4].mxu1 }
 0x13b   : > { %v992_v2 = vpop.f32.mrb[5].mxu0  ;;  %v1224_v59 = vpop.f32.mrb[5].mxu1 }
 0x13c   : > { %v993_v4 = vpop.f32.mrb[6].mxu0  ;;  %v7412_v61 = vpop.f32.mrb[6].mxu1 }
 0x13d   : > { %v1270_v5 = vpack.c.bf16 %v993_v4, %v990_v1  ;;  %v995_v6 = vpop.f32.mrb[7].mxu0  ;;  %v1299_v63 = vpack.c.bf16 %v7412_v61, %v7409_v58  ;;  %v1227_v0 = vpop.f32.mrb[7].mxu1 }
 0x13f   : > { %1205 = vmatmul.mubr.bf16.gmra.mrb[112].mxu0 %v6715_v3  ;;  %5811 = vmatmul.mubr.msk.bf16.vlgmr.msra.gmra.mrb[28].mxu1 %vm1314_vm1, %v1270_v5 }
 0x140   : > { %5819 = vmatpush3.bf16.msra.mxu1 %v1419_v7  ;;  %6146 = vmatprep.mubr.msk.bf16.mxu0 %vm6951_vm2, %v6950_v46 }
 0x141   : > { %6559 = vmatprep.subr.msk.bf16.mxu1 %vm1327_vm0, %v5134_v8 }
 0x142   : > { %v998_v9 = vpop.f32.mrb[8].mxu0  ;;  %v7417_v4 = vpop.f32.mrb[8].mxu1 }
 0x143   : > { %v1000_v10 = vpop.f32.mrb[9].mxu0  ;;  %v1232_v5 = vpop.f32.mrb[9].mxu1 }
 0x144   : > { %v1001_v11 = vpop.f32.mrb[10].mxu0  ;;  %v7419_v7 = vpop.f32.mrb[10].mxu1 }
 0x145   : > { %v1271_v12 = vpack.c.bf16 %v1001_v11, %v998_v9  ;;  %v1003_v13 = vpop.f32.mrb[11].mxu0  ;;  %v1300_v9 = vpack.c.bf16 %v7419_v7, %v7417_v4  ;;  %v1235_v10 = vpop.f32.mrb[11].mxu1 }
 0x147   : > { %5814 = vmatprep.mubr.msk.bf16.mxu1 %vm1314_vm1, %v1271_v12 }
 0x14a   : > { %v1006_v14 = vpop.f32.mrb[12].mxu0 }
 0x14b   : > { %v1008_v15 = vpop.f32.mrb[13].mxu0 }
 0x14c   : > { %v1009_v16 = vpop.f32.mrb[14].mxu0 }
 0x14d   : > { %v1272_v17 = vpack.c.bf16 %v1009_v16, %v1006_v14  ;;  %v1011_v18 = vpop.f32.mrb[15].mxu0  ;;  %v7424_v14 = vpop.f32.mrb[12].mxu1 }
 0x14e   : > { %v1240_v15 = vpop.f32.mrb[13].mxu1 }
 0x14f   : > { %5815 = vmatmul.mubr.msk.bf16.gmra.mrb[32].mxu1 %vm1314_vm1, %v1272_v17  ;;  %v7426_v17 = vpop.f32.mrb[14].mxu1 }
 0x152   : > { %v1014_v19 = vpop.f32.mrb[16].mxu0 }
 0x153   : > { %v1016_v20 = vpop.f32.mrb[17].mxu0 }
 0x154   : > { %v1017_v21 = vpop.f32.mrb[18].mxu0  ;;  %v1243_v20 = vpop.f32.mrb[15].mxu1 }
 0x155   : > { %v1273_v22 = vpack.c.bf16 %v1017_v21, %v1014_v19  ;;  %v1019_v23 = vpop.f32.mrb[19].mxu0  ;;  %v1301_v19 = vpack.c.bf16 %v7426_v17, %v7424_v14 }
 0x157   : > { %5820 = vmatprep.mubr.msk.bf16.mxu1 %vm1314_vm1, %v1273_v22 }
 0x15a   : > { %v1022_v24 = vpop.f32.mrb[20].mxu0 }
 0x15b   : > { %v1024_v25 = vpop.f32.mrb[21].mxu0 }
 0x15c   : > { %v1025_v26 = vpop.f32.mrb[22].mxu0 }
 0x15d   : > { %v1274_v27 = vpack.c.bf16 %v1025_v26, %v1022_v24  ;;  %v1027_v28 = vpop.f32.mrb[23].mxu0  ;;  %v7431_v24 = vpop.f32.mrb[16].mxu1 }
 0x15e   : > { %v1248_v25 = vpop.f32.mrb[17].mxu1 }
 0x15f   : > { %5821 = vmatmul.mubr.msk.bf16.vlgmr.msra.gmra.mrb[28].mxu1 %vm1314_vm1, %v1274_v27  ;;  %v7433_v26 = vpop.f32.mrb[18].mxu1 }
 0x160   : > { %5829 = vmatpush3.bf16.msra.mxu1 %v1509_v29  ;;  %v1302_v28 = vpack.c.bf16 %v7433_v26, %v7431_v24  ;;  %v1251_v29 = vpop.f32.mrb[19].mxu1 }
 0x161   : > { %6560 = vmatprep.subr.msk.bf16.mxu1 %vm1327_vm0, %v5139_v30 }
 0x162   : > { %v1030_v31 = vpop.f32.mrb[24].mxu0 }
 0x163   : > { %v1032_v32 = vpop.f32.mrb[25].mxu0 }
 0x164   : > { %v1033_v33 = vpop.f32.mrb[26].mxu0 }
 0x165   : > { %v1275_v34 = vpack.c.bf16 %v1033_v33, %v1030_v31  ;;  %v1035_v35 = vpop.f32.mrb[27].mxu0  ;;  %v7437_v31 = vpop.f32.mrb[20].mxu1 }
 0x166   : > { %v1256_v33 = vpop.f32.mrb[21].mxu1 }
 0x167   : > { %5824 = vmatprep.mubr.msk.bf16.mxu1 %vm1314_vm1, %v1275_v34 }
 0x16a   : > { %v1038_v36 = vpop.f32.mrb[28].mxu0 }
 0x16b   : > { %v1040_v37 = vpop.f32.mrb[29].mxu0 }
 0x16c   : > { %v1041_v38 = vpop.f32.mrb[30].mxu0  ;;  %v5149_v37 = vld [vmem:[%s8304_s2 + $0xa] sm:$0x3] }
 0x16d   : > { %v1276_v39 = vpack.c.bf16 %v1041_v38, %v1038_v36  ;;  %v1043_v40 = vpop.f32.mrb[31].mxu0  ;;  %v1689_v36 = vsel %vm1327_vm0, %v5144_v57, 0  ;;  %v7445_v38 = vpop.f32.mrb[22].mxu1 }
 0x16e   : > { %v1303_v40 = vpack.c.bf16 %v7445_v38, %v7437_v31 }
 0x16f   : > { %5825 = vmatmul.mubr.msk.bf16.gmra.mrb[32].mxu1 %vm1314_vm1, %v1276_v39 }
 0x172   : > { %v1046_v41 = vpop.f32.mrb[32].mxu0 }
 0x173   : > { %v1048_v42 = vpop.f32.mrb[33].mxu0 }
 0x174   : > { %v1049_v43 = vpop.f32.mrb[34].mxu0 }
 0x175   : > { %v1277_v44 = vpack.c.bf16 %v1049_v43, %v1046_v41  ;;  %v1051_v45 = vpop.f32.mrb[35].mxu0  ;;  %v1259_v41 = vpop.f32.mrb[23].mxu1 }
 0x176   : > { %v7449_v43 = vpop.f32.mrb[24].mxu1 }
 0x177   : > { %5830 = vmatprep.mubr.msk.bf16.mxu1 %vm1314_vm1, %v1277_v44  ;;  %v1264_v45 = vpop.f32.mrb[25].mxu1 }
 0x17a   : > { %v1054_v48 = vpop.f32.mrb[36].mxu0 }
 0x17b   : > { %v1056_v50 = vpop.f32.mrb[37].mxu0 }
 0x17c   : > { %v1057_v53 = vpop.f32.mrb[38].mxu0  ;;  %v7452_v50 = vpop.f32.mrb[26].mxu1 }
 0x17d   : > { %v1278_v54 = vpack.c.bf16 %v1057_v53, %v1054_v48  ;;  %v1059_v55 = vpop.f32.mrb[39].mxu0  ;;  %v1304_v53 = vpack.c.bf16 %v7452_v50, %v7449_v43 }
 0x17f   : > { %5831 = vmatmul.mubr.msk.bf16.vlgmr.msra.gmra.mrb[28].mxu1 %vm1314_vm1, %v1278_v54  ;;  %v1267_v54 = vpop.f32.mrb[27].mxu1 }
 0x180   : > { %5839 = vmatpush3.bf16.msra.mxu1 %v1599_v56 }
 0x181   : > { %6561 = vmatprep.subr.msk.bf16.mxu1 %vm1327_vm0, %v5144_v57 }
 0x182   : > { %v1062_v60 = vpop.f32.mrb[40].mxu0 }
 0x183   : > { %v1064_v62 = vpop.f32.mrb[41].mxu0 }
 0x184   : > { %v1065_v1 = vpop.f32.mrb[42].mxu0 }
 0x185   : > { %v1279_v2 = vpack.c.bf16 %v1065_v1, %v1062_v60  ;;  %v1067_v3 = vpop.f32.mrb[43].mxu0 }
 0x187   : > { %5834 = vmatprep.mubr.msk.bf16.mxu1 %vm1314_vm1, %v1279_v2 }
 0x18a   : > { %v1070_v6 = vpop.f32.mrb[44].mxu0 }
 0x18b   : > { %v1072_v8 = vpop.f32.mrb[45].mxu0 }
 0x18c   : > { %v1073_v11 = vpop.f32.mrb[46].mxu0 }
 0x18d   : > { %v1280_v12 = vpack.c.bf16 %v1073_v11, %v1070_v6  ;;  %v1075_v13 = vpop.f32.mrb[47].mxu0  ;;  %v1779_v11 = vsel %vm1327_vm0, %v5149_v37, 0 }
 0x18f   : > { %5835 = vmatmul.mubr.msk.bf16.gmra.mrb[32].mxu1 %vm1314_vm1, %v1280_v12  ;;  %v5154_v12 = vld [vmem:[%s8304_s2 + $0xc] sm:$0x3] }
 0x192   : > { %v1078_v16 = vpop.f32.mrb[48].mxu0 }
 0x193   : > { %v1080_v18 = vpop.f32.mrb[49].mxu0 }
 0x194   : > { %v1081_v21 = vpop.f32.mrb[50].mxu0 }
 0x195   : > { %v1281_v22 = vpack.c.bf16 %v1081_v21, %v1078_v16  ;;  %v1083_v23 = vpop.f32.mrb[51].mxu0 }
 0x197   : > { %5840 = vmatprep.mubr.msk.bf16.mxu1 %vm1314_vm1, %v1281_v22 }
 0x19a   : > { %v1086_v27 = vpop.f32.mrb[52].mxu0 }
 0x19b   : > { %v1088_v30 = vpop.f32.mrb[53].mxu0 }
 0x19c   : > { %v1089_v32 = vpop.f32.mrb[54].mxu0 }
 0x19d   : > { %v1282_v34 = vpack.c.bf16 %v1089_v32, %v1086_v27  ;;  %v1091_v35 = vpop.f32.mrb[55].mxu0 }
 0x19f   : > { %5841 = vmatmul.mubr.msk.bf16.vlgmr.msra.gmra.mrb[28].mxu1 %vm1314_vm1, %v1282_v34 }
 0x1a0   : > { %5849 = vmatpush3.bf16.msra.mxu1 %v1689_v36 }
 0x1a1   : > { %6562 = vmatprep.subr.msk.bf16.mxu1 %vm1327_vm0, %v5149_v37 }
 0x1a2   : > { %v1094_v39 = vpop.f32.mrb[56].mxu0 }
 0x1a3   : > { %v1096_v42 = vpop.f32.mrb[57].mxu0 }
 0x1a4   : > { %v1097_v44 = vpop.f32.mrb[58].mxu0  ;;  %v1869_v42 = vsel %vm1327_vm0, %v5154_v12, 0 }
 0x1a5   : > { %v1283_v47 = vpack.c.bf16 %v1097_v44, %v1094_v39  ;;  %v1099_v48 = vpop.f32.mrb[59].mxu0  ;;  %v5159_v44 = vld [vmem:[%s8304_s2 + $0xe] sm:$0x3] }
 0x1a7   : > { %5844 = vmatprep.mubr.msk.bf16.mxu1 %vm1314_vm1, %v1283_v47 }
 0x1aa   : > { %v1102_v52 = vpop.f32.mrb[60].mxu0 }
 0x1ab   : > { %v1104_v55 = vpop.f32.mrb[61].mxu0 }
 0x1ac   : > { %v1105_v56 = vpop.f32.mrb[62].mxu0 }
 0x1ad   : > { %v1284_v57 = vpack.c.bf16 %v1105_v56, %v1102_v52  ;;  %v1107_v59 = vpop.f32.mrb[63].mxu0 }
 0x1af   : > { %5845 = vmatmul.mubr.msk.bf16.gmra.mrb[32].mxu1 %vm1314_vm1, %v1284_v57 }
 0x1b2   : > { %v1110_v60 = vpop.f32.mrb[64].mxu0 }
 0x1b3   : > { %v1112_v62 = vpop.f32.mrb[65].mxu0 }
 0x1b4   : > { %v1113_v0 = vpop.f32.mrb[66].mxu0 }
 0x1b5   : > { %v1285_v1 = vpack.c.bf16 %v1113_v0, %v1110_v60  ;;  %v1115_v2 = vpop.f32.mrb[67].mxu0 }
 0x1b7   : > { %5850 = vmatprep.mubr.msk.bf16.mxu1 %vm1314_vm1, %v1285_v1 }
 0x1ba   : > { %v1118_v3 = vpop.f32.mrb[68].mxu0 }
 0x1bb   : > { %v1120_v5 = vpop.f32.mrb[69].mxu0 }
 0x1bc   : > { %v1121_v6 = vpop.f32.mrb[70].mxu0 }
 0x1bd   : > { %v1286_v8 = vpack.c.bf16 %v1121_v6, %v1118_v3  ;;  %v1123_v10 = vpop.f32.mrb[71].mxu0 }
 0x1bf   : > { %5851 = vmatmul.mubr.msk.bf16.vlgmr.msra.gmra.mrb[28].mxu1 %vm1314_vm1, %v1286_v8 }
 0x1c0   : > { %5859 = vmatpush3.bf16.msra.mxu1 %v1779_v11 }
 0x1c1   : > { %6563 = vmatprep.subr.msk.bf16.mxu1 %vm1327_vm0, %v5154_v12  ;;  %v1959_v12 = vsel %vm1327_vm0, %v5159_v44, 0 }
 0x1c2   : > { %v1126_v13 = vpop.f32.mrb[72].mxu0 }
 0x1c3   : > { %v1128_v15 = vpop.f32.mrb[73].mxu0 }
 0x1c4   : > { %v1129_v16 = vpop.f32.mrb[74].mxu0 }
 0x1c5   : > { %v1287_v18 = vpack.c.bf16 %v1129_v16, %v1126_v13  ;;  %v1131_v20 = vpop.f32.mrb[75].mxu0  ;;  %v5164_v13 = vld [vmem:[%s8304_s2 + $0x10] sm:$0x3] }
 0x1c7   : > { %5854 = vmatprep.mubr.msk.bf16.mxu1 %vm1314_vm1, %v1287_v18 }
 0x1ca   : > { %v1134_v21 = vpop.f32.mrb[76].mxu0 }
 0x1cb   : > { %v1136_v22 = vpop.f32.mrb[77].mxu0 }
 0x1cc   : > { %v1137_v23 = vpop.f32.mrb[78].mxu0 }
 0x1cd   : > { %v1288_v25 = vpack.c.bf16 %v1137_v23, %v1134_v21  ;;  %v1139_v27 = vpop.f32.mrb[79].mxu0 }
 0x1cf   : > { %5855 = vmatmul.mubr.msk.bf16.gmra.mrb[32].mxu1 %vm1314_vm1, %v1288_v25 }
 0x1d2   : > { %v1142_v29 = vpop.f32.mrb[80].mxu0 }
 0x1d3   : > { %v1144_v30 = vpop.f32.mrb[81].mxu0 }
 0x1d4   : > { %v1145_v32 = vpop.f32.mrb[82].mxu0 }
 0x1d5   : > { %v1289_v33 = vpack.c.bf16 %v1145_v32, %v1142_v29  ;;  %v1147_v34 = vpop.f32.mrb[83].mxu0 }
 0x1d7   : > { %5860 = vmatprep.mubr.msk.bf16.mxu1 %vm1314_vm1, %v1289_v33 }
 0x1da   : > { %v1150_v35 = vpop.f32.mrb[84].mxu0 }
 0x1db   : > { %v1152_v36 = vpop.f32.mrb[85].mxu0 }
 0x1dc   : > { %v1153_v37 = vpop.f32.mrb[86].mxu0  ;;  %v2049_v36 = vsel %vm1327_vm0, %v5164_v13, 0 }
 0x1dd   : > { %v1290_v39 = vpack.c.bf16 %v1153_v37, %v1150_v35  ;;  %v1155_v41 = vpop.f32.mrb[87].mxu0 }
 0x1df   : > { %5861 = vmatmul.mubr.msk.bf16.vlgmr.msra.gmra.mrb[28].mxu1 %vm1314_vm1, %v1290_v39 }
 0x1e0   : > { %5869 = vmatpush3.bf16.msra.mxu1 %v1869_v42 }
 0x1e1   : > { %6564 = vmatprep.subr.msk.bf16.mxu1 %vm1327_vm0, %v5159_v44 }
 0x1e2   : > { %v1158_v45 = vpop.f32.mrb[88].mxu0 }
 0x1e3   : > { %v1160_v47 = vpop.f32.mrb[89].mxu0 }
 0x1e4   : > { %v1161_v48 = vpop.f32.mrb[90].mxu0 }
 0x1e5   : > { %v1291_v52 = vpack.c.bf16 %v1161_v48, %v1158_v45  ;;  %v1163_v54 = vpop.f32.mrb[91].mxu0 }
 0x1e7   : > { %5864 = vmatprep.mubr.msk.bf16.mxu1 %vm1314_vm1, %v1291_v52 }
 0x1ea   : > { %v1166_v55 = vpop.f32.mrb[92].mxu0 }
 0x1eb   : > { %v1168_v56 = vpop.f32.mrb[93].mxu0 }
 0x1ec   : > { %v1169_v57 = vpop.f32.mrb[94].mxu0 }
 0x1ed   : > { %v1292_v59 = vpack.c.bf16 %v1169_v57, %v1166_v55  ;;  %v1171_v60 = vpop.f32.mrb[95].mxu0 }
 0x1ef   : > { %5865 = vmatmul.mubr.msk.bf16.gmra.mrb[32].mxu1 %vm1314_vm1, %v1292_v59 }
 0x1f2   : > { %v1174_v62 = vpop.f32.mrb[96].mxu0 }
 0x1f3   : > { %v1176_v0 = vpop.f32.mrb[97].mxu0 }
 0x1f4   : > { %v1177_v1 = vpop.f32.mrb[98].mxu0 }
 0x1f5   : > { %v1293_v2 = vpack.c.bf16 %v1177_v1, %v1174_v62  ;;  %v1179_v3 = vpop.f32.mrb[99].mxu0 }
 0x1f7   : > { %5870 = vmatprep.mubr.msk.bf16.mxu1 %vm1314_vm1, %v1293_v2 }
 0x1fa   : > { %v1182_v5 = vpop.f32.mrb[100].mxu0 }
 0x1fb   : > { %v1184_v6 = vpop.f32.mrb[101].mxu0 }
 0x1fc   : > { %v1185_v8 = vpop.f32.mrb[102].mxu0 }
 0x1fd   : > { %v1294_v10 = vpack.c.bf16 %v1185_v8, %v1182_v5  ;;  %v1187_v11 = vpop.f32.mrb[103].mxu0 }
 0x1ff   : > { %5871 = vmatmul.mubr.msk.bf16.vlgmr.msra.gmra.mrb[28].mxu1 %vm1314_vm1, %v1294_v10 }
 0x200   : > { %5879 = vmatpush3.bf16.msra.mxu1 %v1959_v12 }
 0x201   : > { %6565 = vmatprep.subr.msk.bf16.mxu1 %vm1327_vm0, %v5164_v13 }
 0x202   : > { %v1190_v15 = vpop.f32.mrb[104].mxu0 }
 0x203   : > { %v1192_v16 = vpop.f32.mrb[105].mxu0 }
 0x204   : > { %v1193_v18 = vpop.f32.mrb[106].mxu0 }
 0x205   : > { %v1295_v20 = vpack.c.bf16 %v1193_v18, %v1190_v15  ;;  %v1195_v21 = vpop.f32.mrb[107].mxu0 }
 0x207   : > { %5874 = vmatprep.mubr.msk.bf16.mxu1 %vm1314_vm1, %v1295_v20 }
 0x20a   : > { %v1198_v22 = vpop.f32.mrb[108].mxu0 }
 0x20b   : > { %v1200_v23 = vpop.f32.mrb[109].mxu0 }
 0x20c   : > { %v1201_v25 = vpop.f32.mrb[110].mxu0 }
 0x20d   : > { %v1296_v27 = vpack.c.bf16 %v1201_v25, %v1198_v22  ;;  %v1203_v29 = vpop.f32.mrb[111].mxu0 }
 0x20f   : > { %5875 = vmatmul.mubr.msk.bf16.gmra.mrb[32].mxu1 %vm1314_vm1, %v1296_v27 }
 0x212   : > { %v1206_v30 = vpop.f32.mrb[112].mxu0 }
 0x213   : > { %v1208_v32 = vpop.f32.mrb[113].mxu0 }
 0x214   : > { %v1209_v33 = vpop.f32.mrb[114].mxu0 }
 0x215   : > { %v1297_v34 = vpack.c.bf16 %v1209_v33, %v1206_v30  ;;  %v1211_v35 = vpop.f32.mrb[115].mxu0 }
 0x216   : > { %v6716_v35 = vld [vmem:[%s8306_s4] sm:$0xff]  }
 0x217   : > { %5880 = vmatprep.mubr.msk.bf16.mxu1 %vm1314_vm1, %v1297_v34 }
 0x218   : > { %5881 = vmatmul.mubr.msk.bf16.vlgmr.msra.gmra.mrb[28].mxu1 %vm1314_vm1, %v1298_v51 }
 0x219   : > { %5884 = vmatprep.mubr.msk.bf16.mxu1 %vm1314_vm1, %v1299_v63  ;;  %5889 = vmatpush3.bf16.msra.mxu1 %v2049_v36  ;;  %v6725_v36 = vld [vmem:[%s8307_s5] sm:$0xff]  }
 0x21a   : > { %5898 = vmatprep.subr.bf16.mxu1 %v6950_v46 }
 0x220   : > { %5885 = vmatmul.mubr.msk.bf16.gmra.mrb[32].mxu1 %vm1314_vm1, %v1300_v9 }
 0x221   : > { %5890 = vmatprep.mubr.msk.bf16.mxu1 %vm1314_vm1, %v1301_v19 }
 0x228   : > { %5891 = vmatmul.mubr.msk.bf16.vlgmr.msra.gmra.mrb[28].mxu1 %vm1314_vm1, %v1302_v28 }
 0x229   : > { %5894 = vmatprep.mubr.msk.bf16.mxu1 %vm1314_vm1, %v1303_v40 }
 0x230   : > { %5895 = vmatmul.mubr.msk.bf16.gmra.mrb[32].mxu1 %vm1314_vm1, %v1304_v53 }
 0x231   : > { %5906 = vmatprep.mubr.msk.bf16.mxu1 %vm6951_vm2, %v6950_v46 }
 0x2fb   : > { %v5892_v51 = vpop.f32.mrb[28].mxu1 }
 0x2fc   : > { %v6385_v58 = vadd.f32 %v5892_v51, %v5124_v49  ;;  %v2085_v61 = vpop.f32.mrb[29].mxu1  ;;  %v6718_v51 = vld [vmem:[%s8306_s4 + $0x10] sm:$0xff]  }
 0x2fd   : > { %v6386_v63 = vadd.f32 %v5124_v49, %v2085_v61  ;;  %v5893_v4 = vpop.f32.mrb[30].mxu1  ;;  %v6720_v61 = vld [vmem:[%s8306_s4 + $0x20] sm:$0xff]  }
 0x2fe   : > { %v2134_v7 = vmul.f32 0.70710677, %v6385_v58  ;;  %v6387_v9 = vadd.f32 %v5893_v4, %v5124_v49  ;;  %v2088_v14 = vpop.f32.mrb[31].mxu1  ;;  %v2126_v56 = vmul.f32 0.5, %v6385_v58  ;;  %v6719_v58 = vld [vmem:[%s8306_s4 + $0x18] sm:$0xff]   ;;  %v6722_v4 = vld [vmem:[%s8306_s4 + $0x30] sm:$0xff]  }
 0x2ff   : > { %v2132_v17 = vmul.f32 0.70710677, %v6386_v63  ;;  %v6388_v19 = vadd.f32 %v5124_v49, %v2088_v14  ;;  %v2124_v60 = vmul.f32 0.5, %v6386_v63  ;;  %v6721_v63 = vld [vmem:[%s8306_s4 + $0x28] sm:$0xff]  }
 0x300   : > { %6861 = verf.f32 %v2134_v7  ;;  %v2135_v24 = vmul.f32 0.70710677, %v6387_v9  ;;  %v2127_v57 = vmul.f32 0.5, %v6387_v9  ;;  %v6723_v7 = vld [vmem:[%s8306_s4 + $0x38] sm:$0xff]   ;;  %v6724_v9 = vld [vmem:[%s8306_s4 + $0x40] sm:$0xff]   ;;  %v6726_v14 = vld [vmem:[%s8307_s5 + $0x8] sm:$0xff]  }
 0x301   : > { %6863 = verf.f32 %v2132_v17  ;;  %v2133_v26 = vmul.f32 0.70710677, %v6388_v19  ;;  %v2125_v62 = vmul.f32 0.5, %v6388_v19 }
 0x302   : > { %6865 = verf.f32 %v2135_v24 }
 0x303   : > { %6867 = verf.f32 %v2133_v26  ;;  %v5896_v28 = vpop.f32.mrb[32].mxu1  ;;  %v6727_v26 = vld [vmem:[%s8307_s5 + $0x10] sm:$0xff]  }
 0x304   : > { %v6389_v31 = vadd.f32 %v5896_v28, %v5124_v49  ;;  %v2101_v38 = vpop.f32.mrb[33].mxu1 }
 0x305   : > { %v6390_v40 = vadd.f32 %v5124_v49, %v2101_v38  ;;  %v5897_v43 = vpop.f32.mrb[34].mxu1  ;;  %v6728_v38 = vld [vmem:[%s8307_s5 + $0x18] sm:$0xff]  }
 0x306   : > { %v2138_v50 = vmul.f32 0.70710677, %v6389_v31  ;;  %v6391_v53 = vadd.f32 %v5897_v43, %v5124_v49  ;;  %v2104_v37 = vpop.f32.mrb[35].mxu1  ;;  %v2130_v18 = vmul.f32 0.5, %v6389_v31 }
 0x307   : > { %v2136_v39 = vmul.f32 0.70710677, %v6390_v40  ;;  %v6392_v41 = vadd.f32 %v5124_v49, %v2104_v37  ;;  %v2128_v22 = vmul.f32 0.5, %v6390_v40  ;;  %v6717_v49 = vld [vmem:[%s8306_s4 + $0x8] sm:$0xff]  }
 0x308   : > { %6869 = verf.f32 %v2138_v50  ;;  %v2139_v42 = vmul.f32 0.70710677, %v6391_v53  ;;  %v2131_v20 = vmul.f32 0.5, %v6391_v53 }
 0x309   : > { %6871 = verf.f32 %v2136_v39  ;;  %v2137_v44 = vmul.f32 0.70710677, %v6392_v41  ;;  %v2129_v23 = vmul.f32 0.5, %v6392_v41  ;;  %v6729_v39 = vld [vmem:[%s8307_s5 + $0x20] sm:$0xff]  }
 0x30a   : > { %v6862_v45 = vpop.eup %6861  ;;  %6873 = verf.f32 %v2139_v42 }
 0x30b   : > { %v6864_v47 = vpop.eup %6863  ;;  %v2150_v48 = vadd.f32 1.0, %v6862_v45  ;;  %6875 = verf.f32 %v2137_v44  ;;  %v6730_v45 = vld [vmem:[%s8307_s5 + $0x28] sm:$0xff]  }
 0x30c   : > { %v6866_v52 = vpop.eup %6865  ;;  %v2148_v54 = vadd.f32 1.0, %v6864_v47 }
 0x30d   : > { %v6868_v55 = vpop.eup %6867  ;;  %v2151_v59 = vadd.f32 1.0, %v6866_v52  ;;  %v2158_v1 = vmul.f32 %v2150_v48, %v2126_v56 }
 0x30e   : > { %v2149_v0 = vadd.f32 1.0, %v6868_v55  ;;  %v2156_v3 = vmul.f32 %v2148_v54, %v2124_v60  ;;  %v6731_v55 = vld [vmem:[%s8307_s5 + $0x30] sm:$0xff]   ;;  %v6732_v60 = vld [vmem:[%s8307_s5 + $0x38] sm:$0xff]  }
 0x30f   : > { %v2159_v2 = vmul.f32 %v2151_v59, %v2127_v57 }
 0x310   : > { %v2157_v5 = vmul.f32 %v2149_v0, %v2125_v62 }
 0x311   : > { %v2165_v6 = vpack.c.bf16 %v2159_v2, %v2158_v1 }
 0x312   : > { %v6870_v8 = vpop.eup %6869  ;;  %v2164_v10 = vpack.c.bf16 %v2157_v5, %v2156_v3  ;;  %v6733_v5 = vld [vmem:[%s8307_s5 + $0x40] sm:$0xff]  }
 0x313   : > { %v6872_v11 = vpop.eup %6871  ;;  %v2154_v12 = vadd.f32 1.0, %v6870_v8 }
 0x314   : > { %v6874_v13 = vpop.eup %6873  ;;  %v2152_v15 = vadd.f32 1.0, %v6872_v11  ;;  %5899 = vmatpush3.bf16.msra.mxu1 %v2164_v10  ;;  %v6734_v10 = vld [vmem:[%s8307_s5 + $0x48] sm:$0xff]  }
 0x315   : > { %v6876_v16 = vpop.eup %6875  ;;  %v2155_v21 = vadd.f32 1.0, %v6874_v13  ;;  %5900 = vmatprep.subr.bf16.mxu1 %v6950_v46  ;;  %v2162_v27 = vmul.f32 %v2154_v12, %v2130_v18  ;;  %v6735_v18 = vld [vmem:[%s8307_s5 + $0x50] sm:$0xff]  }
 0x316   : > { %v2153_v25 = vadd.f32 1.0, %v6876_v16  ;;  %v2160_v30 = vmul.f32 %v2152_v15, %v2128_v22 }
 0x317   : > { %v2163_v29 = vmul.f32 %v2155_v21, %v2131_v20 }
 0x318   : > { %v2161_v32 = vmul.f32 %v2153_v25, %v2129_v23  ;;  %5901 = vmatpush3.bf16.msra.mxu1 %v2165_v6  ;;  %v6736_v23 = vld [vmem:[%s8307_s5 + $0x58] sm:$0xff]  }
 0x319   : > { %v2167_v33 = vpack.c.bf16 %v2163_v29, %v2162_v27  ;;  %5902 = vmatprep.subr.bf16.mxu1 %v6950_v46 }
 0x31a   : > { %v2166_v34 = vpack.c.bf16 %v2161_v32, %v2160_v30 }
 0x31c   : > { %5903 = vmatpush3.bf16.msra.mxu1 %v2166_v34 }
 0x31d   : > { %5904 = vmatprep.subr.bf16.mxu1 %v6950_v46 }
 0x320   : > { %5905 = vmatpush3.bf16.msra.mxu1 %v2167_v33  ;;  %v6737_v33 = vld [vmem:[%s8307_s5 + $0x60] sm:$0xff]  }
 0x321   : > { %5942 = vmatprep.subr.bf16.mxu1 %v6950_v46 }
 0x323   : > { %5907 = vmatmul.mubr.msk.bf16.vlgmr.msra.gmra.mrb[36].mxu1 %vm2231_vm3, %v6716_v35 }
 0x324   : > { %5910 = vmatprep.mubr.msk.bf16.mxu1 %vm6951_vm2, %v6950_v46  ;;  %5943 = vmatpush3.bf16.msra.mxu1 %v6725_v36  ;;  %v6738_v36 = vld [vmem:[%s8307_s5 + $0x68] sm:$0xff]  }
 0x325   : > { %5944 = vmatprep.subr.bf16.mxu1 %v6950_v46 }
 0x328   : > { %5945 = vmatpush3.bf16.msra.mxu1 %v6726_v14 }
 0x329   : > { %5950 = vmatprep.subr.bf16.mxu1 %v6950_v46 }
 0x32b   : > { %5911 = vmatmul.mubr.msk.bf16.gmra.mrb[40].mxu1 %vm2231_vm3, %v6717_v49 }
 0x32c   : > { %5914 = vmatprep.mubr.msk.bf16.mxu1 %vm6951_vm2, %v6950_v46 }
 0x333   : > { %5915 = vmatmul.mubr.msk.bf16.gmra.mrb[44].mxu1 %vm2231_vm3, %v6718_v51 }
 0x334   : > { %5918 = vmatprep.mubr.msk.bf16.mxu1 %vm6951_vm2, %v6950_v46 }
 0x33b   : > { %5919 = vmatmul.mubr.msk.bf16.gmra.mrb[48].mxu1 %vm2231_vm3, %v6719_v58 }
 0x33c   : > { %5922 = vmatprep.mubr.msk.bf16.mxu1 %vm6951_vm2, %v6950_v46 }
 0x343   : > { %5923 = vmatmul.mubr.msk.bf16.gmra.mrb[52].mxu1 %vm2231_vm3, %v6720_v61  ;;  %v6739_v61 = vld [vmem:[%s8307_s5 + $0x70] sm:$0xff]  }
 0x344   : > { %5926 = vmatprep.mubr.msk.bf16.mxu1 %vm6951_vm2, %v6950_v46 }
 0x34b   : > { %5927 = vmatmul.mubr.msk.bf16.gmra.mrb[56].mxu1 %vm2231_vm3, %v6721_v63  ;;  %v6740_v63 = vld [vmem:[%s8307_s5 + $0x78] sm:$0xff]  }
 0x34c   : > { %5930 = vmatprep.mubr.msk.bf16.mxu1 %vm6951_vm2, %v6950_v46 }
 0x353   : > { %5931 = vmatmul.mubr.msk.bf16.gmra.mrb[60].mxu1 %vm2231_vm3, %v6722_v4  ;;  %v6741_v4 = vld [vmem:[%s8307_s5 + $0x80] sm:$0xff]  }
 0x354   : > { %5934 = vmatprep.mubr.msk.bf16.mxu1 %vm6951_vm2, %v6950_v46 }
 0x35b   : > { %5935 = vmatmul.mubr.msk.bf16.gmra.mrb[64].mxu1 %vm2231_vm3, %v6723_v7  ;;  %v6742_v7 = vld [vmem:[%s8307_s5 + $0x88] sm:$0xff]  }
 0x35c   : > { %5938 = vmatprep.mubr.msk.bf16.mxu1 %vm6951_vm2, %v6950_v46 }
 0x363   : > { %5939 = vmatmul.mubr.msk.bf16.gmra.mrb[68].mxu1 %vm2231_vm3, %v6724_v9  ;;  %v5187_v9 = vld [vmem:[%s8308_s6] ss:$0 sm:$0xff] }
 0x364   : > { %5946 = vmatprep.mubr.msk.bf16.mxu1 %vm6951_vm2, %v6950_v46 }
 0x3f6   : > { %v2293_v17 = vpop.f32.mrb[36].mxu1 }
 0x3f7   : > { %v5908_v19 = vpop.f32.mrb[37].mxu1 }
 0x3f8   : > { %v2296_v24 = vpop.f32.mrb[38].mxu1 }
 0x3f9   : > { %v2364_v28 = vpack.c.bf16 %v2296_v24, %v2293_v17  ;;  %v5909_v31 = vpop.f32.mrb[39].mxu1 }
 0x3fb   : > { %5947 = vmatmul.mubr.msk.bf16.vlgmr.msra.gmra.mrb[72].mxu1 %vm2397_vm4, %v2364_v28 }
 0x3fc   : > { %5951 = vmatpush3.bf16.msra.mxu1 %v6727_v26  ;;  %5954 = vmatprep.mubr.msk.bf16.mxu1 %vm6951_vm2, %v6950_v46 }
 0x3fd   : > { %5952 = vmatprep.subr.bf16.mxu1 %v6950_v46 }
 0x3fe   : > { %v2301_v40 = vpop.f32.mrb[40].mxu1 }
 0x3ff   : > { %v5912_v43 = vpop.f32.mrb[41].mxu1 }
 0x400   : > { %v2304_v50 = vpop.f32.mrb[42].mxu1  ;;  %5953 = vmatpush3.bf16.msra.mxu1 %v6728_v38 }
 0x401   : > { %v2365_v53 = vpack.c.bf16 %v2304_v50, %v2301_v40  ;;  %v5913_v37 = vpop.f32.mrb[43].mxu1  ;;  %5958 = vmatprep.subr.bf16.mxu1 %v6950_v46 }
 0x406   : > { %v2309_v41 = vpop.f32.mrb[44].mxu1 }
 0x407   : > { %5955 = vmatmul.mubr.msk.bf16.vlgmr.msra.gmra.mrb[72].mxu1 %vm2397_vm4, %v2365_v53  ;;  %v5916_v42 = vpop.f32.mrb[45].mxu1 }
 0x408   : > { %5959 = vmatpush3.bf16.msra.mxu1 %v6729_v39  ;;  %v2312_v44 = vpop.f32.mrb[46].mxu1  ;;  %5962 = vmatprep.mubr.msk.bf16.mxu1 %vm6951_vm2, %v6950_v46 }
 0x409   : > { %v2366_v47 = vpack.c.bf16 %v2312_v44, %v2309_v41  ;;  %v5917_v48 = vpop.f32.mrb[47].mxu1  ;;  %5960 = vmatprep.subr.bf16.mxu1 %v6950_v46 }
 0x40a   : > { %v6749_v48 = vld [vmem:[%s8310_s8 + $0x8] sm:$0xff]  }
 0x40c   : > { %5961 = vmatpush3.bf16.msra.mxu1 %v6730_v45  ;;  %v6743_v45 = vld [vmem:[%s8309_s7] sm:$0xff]  }
 0x40d   : > { %5966 = vmatprep.subr.bf16.mxu1 %v6950_v46 }
 0x40e   : > { %v2317_v52 = vpop.f32.mrb[48].mxu1 }
 0x40f   : > { %v5920_v54 = vpop.f32.mrb[49].mxu1 }
 0x410   : > { %v2320_v56 = vpop.f32.mrb[50].mxu1  ;;  %v6750_v54 = vld [vmem:[%s8310_s8 + $0x10] sm:$0xff]  }
 0x411   : > { %v2367_v57 = vpack.c.bf16 %v2320_v56, %v2317_v52  ;;  %v5921_v59 = vpop.f32.mrb[51].mxu1  ;;  %v6744_v52 = vld [vmem:[%s8309_s7 + $0x8] sm:$0xff]   ;;  %v6746_v56 = vld [vmem:[%s8309_s7 + $0x18] sm:$0xff]  }
 0x412   : > { %v6751_v59 = vld [vmem:[%s8310_s8 + $0x18] sm:$0xff]  }
 0x413   : > { %5963 = vmatmul.mubr.msk.bf16.vlgmr.msra.gmra.mrb[72].mxu1 %vm2397_vm4, %v2366_v47  ;;  %v6748_v47 = vld [vmem:[%s8310_s8] sm:$0xff]  }
 0x414   : > { %5967 = vmatpush3.bf16.msra.mxu1 %v6731_v55  ;;  %5970 = vmatprep.mubr.msk.bf16.mxu1 %vm6951_vm2, %v6950_v46  ;;  %v6745_v55 = vld [vmem:[%s8309_s7 + $0x10] sm:$0xff]  }
 0x415   : > { %5968 = vmatprep.subr.bf16.mxu1 %v6950_v46 }
 0x416   : > { %v2325_v62 = vpop.f32.mrb[52].mxu1 }
 0x417   : > { %v5924_v0 = vpop.f32.mrb[53].mxu1 }
 0x418   : > { %5969 = vmatpush3.bf16.msra.mxu1 %v6732_v60  ;;  %v2328_v1 = vpop.f32.mrb[54].mxu1 }
 0x419   : > { %5974 = vmatprep.subr.bf16.mxu1 %v6950_v46  ;;  %v2368_v2 = vpack.c.bf16 %v2328_v1, %v2325_v62  ;;  %v5925_v3 = vpop.f32.mrb[55].mxu1  ;;  %v6752_v1 = vld [vmem:[%s8310_s8 + $0x20] sm:$0xff]  }
 0x41e   : > { %v2333_v6 = vpop.f32.mrb[56].mxu1 }
 0x41f   : > { %5971 = vmatmul.mubr.msk.bf16.vlgmr.msra.gmra.mrb[72].mxu1 %vm2397_vm4, %v2367_v57  ;;  %v5928_v8 = vpop.f32.mrb[57].mxu1  ;;  %v6747_v57 = vld [vmem:[%s8309_s7 + $0x20] ss:$0 sps:$4 sm:$0xff]  }
 0x420   : > { %5975 = vmatpush3.bf16.msra.mxu1 %v6733_v5  ;;  %5978 = vmatprep.mubr.msk.bf16.mxu1 %vm6951_vm2, %v6950_v46  ;;  %v2336_v11 = vpop.f32.mrb[58].mxu1  ;;  %v6753_v5 = vld [vmem:[%s8310_s8 + $0x28] sm:$0xff]  }
 0x421   : > { %5976 = vmatprep.subr.bf16.mxu1 %v6950_v46  ;;  %v2369_v12 = vpack.c.bf16 %v2336_v11, %v2333_v6  ;;  %v5929_v13 = vpop.f32.mrb[59].mxu1 }
 0x424   : > { %5977 = vmatpush3.bf16.msra.mxu1 %v6734_v10  ;;  %v6754_v10 = vld [vmem:[%s8310_s8 + $0x30] sm:$0xff]  }
 0x425   : > { %5982 = vmatprep.subr.bf16.mxu1 %v6950_v46 }
 0x426   : > { %v2341_v15 = vpop.f32.mrb[60].mxu1 }
 0x427   : > { %v5932_v16 = vpop.f32.mrb[61].mxu1 }
 0x428   : > { %v2344_v20 = vpop.f32.mrb[62].mxu1 }
 0x429   : > { %v2370_v21 = vpack.c.bf16 %v2344_v20, %v2341_v15  ;;  %v5933_v22 = vpop.f32.mrb[63].mxu1  ;;  %v6755_v15 = vld [vmem:[%s8310_s8 + $0x38] sm:$0xff]   ;;  %v6756_v20 = vld [vmem:[%s8310_s8 + $0x40] sm:$0xff]  }
 0x42b   : > { %5979 = vmatmul.mubr.msk.bf16.vlgmr.msra.gmra.mrb[72].mxu1 %vm2397_vm4, %v2368_v2 }
 0x42c   : > { %5983 = vmatpush3.bf16.msra.mxu1 %v6735_v18  ;;  %5986 = vmatprep.mubr.msk.bf16.mxu1 %vm6951_vm2, %v6950_v46 }
 0x42d   : > { %5984 = vmatprep.subr.bf16.mxu1 %v6950_v46 }
 0x42e   : > { %v2349_v25 = vpop.f32.mrb[64].mxu1 }
 0x42f   : > { %v5936_v27 = vpop.f32.mrb[65].mxu1 }
 0x430   : > { %5985 = vmatpush3.bf16.msra.mxu1 %v6736_v23  ;;  %v2352_v29 = vpop.f32.mrb[66].mxu1  ;;  %v6757_v27 = vld [vmem:[%s8310_s8 + $0x48] sm:$0xff]  }
 0x431   : > { %5990 = vmatprep.subr.bf16.mxu1 %v6950_v46  ;;  %v2371_v30 = vpack.c.bf16 %v2352_v29, %v2349_v25  ;;  %v5937_v32 = vpop.f32.mrb[67].mxu1 }
 0x432   : > { %v6758_v32 = vld [vmem:[%s8310_s8 + $0x50] sm:$0xff]  }
 0x436   : > { %v2357_v34 = vpop.f32.mrb[68].mxu1 }
 0x437   : > { %5987 = vmatmul.mubr.msk.bf16.vlgmr.msra.gmra.mrb[72].mxu1 %vm2397_vm4, %v2369_v12  ;;  %v5940_v35 = vpop.f32.mrb[69].mxu1 }
 0x438   : > { %5991 = vmatpush3.bf16.msra.mxu1 %v6737_v33  ;;  %5994 = vmatprep.mubr.msk.bf16.mxu1 %vm6951_vm2, %v6950_v46  ;;  %v2360_v49 = vpop.f32.mrb[70].mxu1 }
 0x439   : > { %5992 = vmatprep.subr.bf16.mxu1 %v6950_v46  ;;  %v2372_v51 = vpack.c.bf16 %v2360_v49, %v2357_v34  ;;  %v5941_v58 = vpop.f32.mrb[71].mxu1 }
 0x43a   : > { %v6760_v58 = vld [vmem:[%s8310_s8 + $0x60] sm:$0xff]  }
 0x43c   : > { %5993 = vmatpush3.bf16.msra.mxu1 %v6738_v36  ;;  %v6759_v36 = vld [vmem:[%s8310_s8 + $0x58] sm:$0xff]  }
 0x43d   : > { %5998 = vmatprep.subr.bf16.mxu1 %v6950_v46 }
 0x443   : > { %5995 = vmatmul.mubr.msk.bf16.vlgmr.msra.gmra.mrb[72].mxu1 %vm2397_vm4, %v2370_v21 }
 0x444   : > { %5999 = vmatpush3.bf16.msra.mxu1 %v6739_v61  ;;  %6002 = vmatprep.mubr.msk.bf16.mxu1 %vm6951_vm2, %v6950_v46 }
 0x445   : > { %6000 = vmatprep.subr.bf16.mxu1 %v6950_v46 }
 0x448   : > { %6001 = vmatpush3.bf16.msra.mxu1 %v6740_v63 }
 0x449   : > { %6006 = vmatprep.subr.bf16.mxu1 %v6950_v46 }
 0x44f   : > { %6003 = vmatmul.mubr.msk.bf16.vlgmr.msra.gmra.mrb[72].mxu1 %vm2397_vm4, %v2371_v30 }
 0x450   : > { %6007 = vmatpush3.bf16.msra.mxu1 %v6741_v4  ;;  %6010 = vmatprep.mubr.msk.bf16.mxu1 %vm6951_vm2, %v6950_v46  ;;  %v6761_v4 = vld [vmem:[%s8310_s8 + $0x68] sm:$0xff]  }
 0x451   : > { %6008 = vmatprep.subr.bf16.mxu1 %v6950_v46 }
 0x454   : > { %6009 = vmatpush3.bf16.msra.mxu1 %v6742_v7  ;;  %v6762_v7 = vld [vmem:[%s8310_s8 + $0x70] sm:$0xff]  }
 0x455   : > { %6014 = vmatprep.subr.bf16.mxu1 %v6950_v46 }
 0x45b   : > { %6011 = vmatmul.mubr.msk.bf16.vlgmr.msra.gmra.mrb[72].mxu1 %vm2397_vm4, %v2372_v51 }
 0x45c   : > { %6016 = vmatprep.mubr.msk.bf16.mxu1 %vm6951_vm2, %v6950_v46 }
 0x52e   : > { %v2939_v14 = vpop.f32.mrb[72].mxu1 }
 0x52f   : > { %v6393_v17 = vadd.f32 %v5187_v9, %v2939_v14  ;;  %v6012_v19 = vpop.f32.mrb[73].mxu1  ;;  %v6764_v14 = vld [vmem:[%s8310_s8 + $0x80] sm:$0xff]  }
 0x530   : > { %v2942_v24 = vpop.f32.mrb[74].mxu1  ;;  %v6765_v19 = vld [vmem:[%s8310_s8 + $0x88] sm:$0xff]  }
 0x531   : > { %v2950_v26 = vmul.f32 0.70710677, %v6393_v17  ;;  %v6394_v28 = vadd.f32 %v5187_v9, %v2942_v24  ;;  %v6013_v31 = vpop.f32.mrb[75].mxu1  ;;  %v2948_v53 = vmul.f32 0.5, %v6393_v17  ;;  %v6763_v9 = vld [vmem:[%s8310_s8 + $0x78] sm:$0xff]   ;;  %v6766_v24 = vld [vmem:[%s8310_s8 + $0x90] sm:$0xff]  }
 0x532   : > { %v6769_v31 = vld [vmem:[%s8310_s8 + $0xa8] sm:$0xff]  }
 0x533   : > { %6877 = verf.f32 %v2950_v26  ;;  %v2951_v38 = vmul.f32 0.70710677, %v6394_v28  ;;  %v2949_v37 = vmul.f32 0.5, %v6394_v28  ;;  %v6767_v26 = vld [vmem:[%s8310_s8 + $0x98] sm:$0xff]   ;;  %v6768_v28 = vld [vmem:[%s8310_s8 + $0xa0] sm:$0xff]  }
 0x535   : > { %6879 = verf.f32 %v2951_v38  ;;  %v6770_v38 = vld [vmem:[%s8310_s8 + $0xb0] sm:$0xff]  }
 0x53d   : > { %v6878_v40 = vpop.eup %6877 }
 0x53e   : > { %v2954_v43 = vadd.f32 1.0, %v6878_v40  ;;  %v6771_v40 = vld [vmem:[%s8310_s8 + $0xb8] sm:$0xff]  }
 0x53f   : > { %v6880_v50 = vpop.eup %6879 }
 0x540   : > { %v2955_v39 = vadd.f32 1.0, %v6880_v50  ;;  %v2956_v41 = vmul.f32 %v2954_v43, %v2948_v53  ;;  %v6772_v43 = vld [vmem:[%s8310_s8 + $0xc0] sm:$0xff]   ;;  %v6773_v53 = vld [vmem:[%s8310_s8 + $0xc8] sm:$0xff]  }
 0x542   : > { %v2957_v42 = vmul.f32 %v2955_v39, %v2949_v37  ;;  %v6774_v37 = vld [vmem:[%s8310_s8 + $0xd0] sm:$0xff]   ;;  %v6775_v39 = vld [vmem:[%s8310_s8 + $0xd8] sm:$0xff]  }
 0x544   : > { %v2958_v44 = vpack.c.bf16 %v2957_v42, %v2956_v41  ;;  %v6776_v41 = vld [vmem:[%s8310_s8 + $0xe0] sm:$0xff]   ;;  %v6777_v42 = vld [vmem:[%s8310_s8 + $0xe8] sm:$0xff]  }
 0x546   : > { %6015 = vmatpush3.bf16.msra.mxu1 %v2958_v44  ;;  %v6778_v44 = vld [vmem:[%s8310_s8 + $0xf0] sm:$0xff]  }
 0x547   : > { %6036 = vmatprep.subr.bf16.mxu1 %v6950_v46 }
 0x549   : > { %6017 = vmatmul.mubr.msk.bf16.vlgmr.msra.gmra.mrb[76].mxu1 %vm2991_vm5, %v6743_v45  ;;  %v6779_v45 = vld [vmem:[%s8310_s8 + $0xf8] sm:$0xff]  }
 0x54a   : > { %6020 = vmatprep.mubr.msk.bf16.mxu1 %vm6951_vm2, %v6950_v46  ;;  %6037 = vmatpush3.bf16.msra.mxu1 %v6748_v47  ;;  %v6780_v47 = vld [vmem:[%s8310_s8 + $0x100] sm:$0xff]  }
 0x54b   : > { %6038 = vmatprep.subr.bf16.mxu1 %v6950_v46 }
 0x54e   : > { %6039 = vmatpush3.bf16.msra.mxu1 %v6749_v48 }
 0x54f   : > { %6040 = vmatprep.subr.bf16.mxu1 %v6950_v46 }
 0x551   : > { %6021 = vmatmul.mubr.msk.bf16.gmra.mrb[80].mxu1 %vm2991_vm5, %v6744_v52  ;;  %v6781_v52 = vld [vmem:[%s8310_s8 + $0x108] sm:$0xff]  }
 0x552   : > { %6024 = vmatprep.mubr.msk.bf16.mxu1 %vm6951_vm2, %v6950_v46  ;;  %6041 = vmatpush3.bf16.msra.mxu1 %v6750_v54  ;;  %v6782_v54 = vld [vmem:[%s8310_s8 + $0x110] sm:$0xff]  }
 0x553   : > { %6042 = vmatprep.subr.bf16.mxu1 %v6950_v46 }
 0x556   : > { %6043 = vmatpush3.bf16.msra.mxu1 %v6751_v59 }
 0x557   : > { %6048 = vmatprep.subr.bf16.mxu1 %v6950_v46 }
 0x559   : > { %6025 = vmatmul.mubr.msk.bf16.gmra.mrb[84].mxu1 %vm2991_vm5, %v6745_v55  ;;  %v6783_v55 = vld [vmem:[%s8310_s8 + $0x118] sm:$0xff]  }
 0x55a   : > { %6028 = vmatprep.mubr.msk.bf16.mxu1 %vm6951_vm2, %v6950_v46 }
 0x561   : > { %6029 = vmatmul.mubr.msk.bf16.gmra.mrb[88].mxu1 %vm2991_vm5, %v6746_v56 }
 0x562   : > { %6032 = vmatprep.mubr.msk.bf16.mxu1 %vm6951_vm2, %v6950_v46 }
 0x569   : > { %6033 = vmatmul.mubr.msk.bf16.gmra.mrb[92].mxu1 %vm2991_vm5, %v6747_v57  ;;  %v5257_v57 = vld [vmem:[%s8311_s9] ss:$0 sm:$0xff] }
 0x56a   : > { %6044 = vmatprep.mubr.msk.bf16.mxu1 %vm6951_vm2, %v6950_v46 }
 0x61c   : > { %v3041_v60 = vpop.f32.mrb[76].mxu1 }
 0x61d   : > { %v6018_v62 = vpop.f32.mrb[77].mxu1 }
 0x61e   : > { %v3044_v0 = vpop.f32.mrb[78].mxu1 }
 0x61f   : > { %v3079_v2 = vpack.c.bf16 %v3044_v0, %v3041_v60  ;;  %v6019_v3 = vpop.f32.mrb[79].mxu1 }
 0x621   : > { %6045 = vmatmul.mubr.msk.bf16.vlgmr.msra.gmra.mrb[96].mxu1 %vm2231_vm3, %v3079_v2  ;;  %v3178_v22 = vrot.slane %v3079_v2, 4 }
 0x622   : > { %6049 = vmatpush3.bf16.msra.mxu1 %v6752_v1  ;;  %6056 = vmatprep.mubr.msk.bf16.mxu1 %vm6951_vm2, %v6950_v46 }
 0x623   : > { %6050 = vmatprep.subr.bf16.mxu1 %v6950_v46 }
 0x624   : > { %v3049_v6 = vpop.f32.mrb[80].mxu1 }
 0x625   : > { %v6022_v8 = vpop.f32.mrb[81].mxu1 }
 0x626   : > { %6051 = vmatpush3.bf16.msra.mxu1 %v6753_v5  ;;  %v3052_v11 = vpop.f32.mrb[82].mxu1 }
 0x627   : > { %6052 = vmatprep.subr.bf16.mxu1 %v6950_v46  ;;  %v3080_v12 = vpack.c.bf16 %v3052_v11, %v3049_v6  ;;  %v6023_v13 = vpop.f32.mrb[83].mxu1 }
 0x628   : > { %v6787_v13 = vld [vmem:[%s8313_s11] sm:$0xff]  }
 0x629   : > { %v3334_v17 = vrot.slane %v3080_v12, 4 }
 0x62a   : > { %6053 = vmatpush3.bf16.msra.mxu1 %v6754_v10 }
 0x62b   : > { %6054 = vmatprep.subr.bf16.mxu1 %v6950_v46 }
 0x62c   : > { %v3057_v16 = vpop.f32.mrb[84].mxu1 }
 0x62d   : > { %v6026_v18 = vpop.f32.mrb[85].mxu1 }
 0x62e   : > { %6055 = vmatpush3.bf16.msra.mxu1 %v6755_v15  ;;  %v3060_v21 = vpop.f32.mrb[86].mxu1  ;;  %v6788_v15 = vld [vmem:[%s8313_s11 + $0x8] sm:$0xff]   ;;  %v6790_v18 = vld [vmem:[%s8313_s11 + $0x10] sm:$0xff]  }
 0x62f   : > { %6060 = vmatprep.subr.bf16.mxu1 %v6950_v46  ;;  %v7752_v23 = vpack.c.bf16 %v3060_v21, %v3057_v16  ;;  %v6027_v25 = vpop.f32.mrb[87].mxu1  ;;  %v6785_v16 = vld [vmem:[%s8312_s10 + $0x8] sm:$0xff]   ;;  %v6786_v21 = vld [vmem:[%s8312_s10 + $0x10] sm:$0xff]  }
 0x630   : > { %v6789_v25 = vld [vmem:[%s8312_s10 + $0x18] sm:$0xff]  }
 0x631   : > { %6057 = vmatmul.mubr.msk.bf16.vlgmr.msra.gmra.mrb[96].mxu1 %vm2231_vm3, %v3178_v22  ;;  %v3490_v50 = vrot.slane %v7752_v23, 4  ;;  %v6792_v22 = vld [vmem:[%s8313_s11 + $0x20] sm:$0xff]  }
 0x632   : > { %6061 = vmatpush3.bf16.msra.mxu1 %v6756_v20  ;;  %6068 = vmatprep.mubr.msk.bf16.mxu1 %vm6951_vm2, %v6950_v46  ;;  %v6791_v20 = vld [vmem:[%s8313_s11 + $0x18] sm:$0xff]  }
 0x633   : > { %6062 = vmatprep.subr.bf16.mxu1 %v6950_v46 }
 0x634   : > { %v3065_v29 = vpop.f32.mrb[88].mxu1 }
 0x635   : > { %v6030_v30 = vpop.f32.mrb[89].mxu1 }
 0x636   : > { %6063 = vmatpush3.bf16.msra.mxu1 %v6757_v27  ;;  %v3068_v33 = vpop.f32.mrb[90].mxu1  ;;  %v6794_v27 = vld [vmem:[%s8313_s11 + $0x30] sm:$0xff]   ;;  %v6807_v30 = vld [vmem:[%s8312_s10 + $0x20] ss:$0 sps:$4 sm:$0xff]  }
 0x637   : > { %6064 = vmatprep.subr.bf16.mxu1 %v6950_v46  ;;  %v7765_v34 = vpack.c.bf16 %v3068_v33, %v3065_v29  ;;  %v6031_v35 = vpop.f32.mrb[91].mxu1  ;;  %v6795_v29 = vld [vmem:[%s8313_s11 + $0x38] sm:$0xff]  }
 0x638   : > { %v6796_v35 = vld [vmem:[%s8313_s11 + $0x40] sm:$0xff]  }
 0x639   : > { %v3646_v48 = vrot.slane %v7765_v34, 4 }
 0x63a   : > { %6065 = vmatpush3.bf16.msra.mxu1 %v6758_v32 }
 0x63b   : > { %6066 = vmatprep.subr.bf16.mxu1 %v6950_v46 }
 0x63c   : > { %v7771_v49 = vpop.f32.mrb[92].mxu1 }
 0x63d   : > { %v6034_v51 = vpop.f32.mrb[93].mxu1  ;;  %v3083_v56 = vpack.c.bf16 %v7771_v49, %v7771_v49 }
 0x63e   : > { %6067 = vmatpush3.bf16.msra.mxu1 %v6759_v36  ;;  %v3076_v61 = vpop.f32.mrb[94].mxu1  ;;  %v6797_v51 = vld [vmem:[%s8313_s11 + $0x48] sm:$0xff]  }
 0x63f   : > { %6072 = vmatprep.subr.bf16.mxu1 %v6950_v46  ;;  %v6035_v63 = vpop.f32.mrb[95].mxu1 }
 0x640   : > { %v6798_v63 = vld [vmem:[%s8313_s11 + $0x50] sm:$0xff]  }
 0x641   : > { %6069 = vmatmul.mubr.msk.bf16.vlgmr.msra.gmra.mrb[96].mxu1 %vm2231_vm3, %v3080_v12  ;;  %v6784_v12 = vld [vmem:[%s8312_s10] sm:$0xff]  }
 0x642   : > { %6073 = vmatpush3.bf16.msra.mxu1 %v6760_v58  ;;  %6080 = vmatprep.mubr.msk.bf16.mxu1 %vm6951_vm2, %v6950_v46 }
 0x643   : > { %6074 = vmatprep.subr.bf16.mxu1 %v6950_v46 }
 0x646   : > { %6075 = vmatpush3.bf16.msra.mxu1 %v6761_v4 }
 0x647   : > { %6076 = vmatprep.subr.bf16.mxu1 %v6950_v46 }
 0x64a   : > { %6077 = vmatpush3.bf16.msra.mxu1 %v6762_v7 }
 0x64b   : > { %6078 = vmatprep.subr.bf16.mxu1 %v6950_v46 }
 0x64e   : > { %6079 = vmatpush3.bf16.msra.mxu1 %v6763_v9 }
 0x64f   : > { %6084 = vmatprep.subr.bf16.mxu1 %v6950_v46 }
 0x651   : > { %6081 = vmatmul.mubr.msk.bf16.vlgmr.msra.gmra.mrb[96].mxu1 %vm2231_vm3, %v3334_v17 }
 0x652   : > { %6085 = vmatpush3.bf16.msra.mxu1 %v6764_v14  ;;  %6092 = vmatprep.mubr.msk.bf16.mxu1 %vm6951_vm2, %v6950_v46  ;;  %v6799_v14 = vld [vmem:[%s8313_s11 + $0x58] sm:$0xff]  }
 0x653   : > { %6086 = vmatprep.subr.bf16.mxu1 %v6950_v46 }
 0x656   : > { %6087 = vmatpush3.bf16.msra.mxu1 %v6765_v19 }
 0x657   : > { %6088 = vmatprep.subr.bf16.mxu1 %v6950_v46 }
 0x65a   : > { %6089 = vmatpush3.bf16.msra.mxu1 %v6766_v24  ;;  %v6800_v24 = vld [vmem:[%s8313_s11 + $0x60] sm:$0xff]  }
 0x65b   : > { %6090 = vmatprep.subr.bf16.mxu1 %v6950_v46 }
 0x65e   : > { %6091 = vmatpush3.bf16.msra.mxu1 %v6767_v26 }
 0x65f   : > { %6096 = vmatprep.subr.bf16.mxu1 %v6950_v46 }
 0x661   : > { %6093 = vmatmul.mubr.msk.bf16.vlgmr.msra.gmra.mrb[96].mxu1 %vm2231_vm3, %v7752_v23  ;;  %v6793_v23 = vld [vmem:[%s8313_s11 + $0x28] sm:$0xff]  }
 0x662   : > { %6097 = vmatpush3.bf16.msra.mxu1 %v6768_v28  ;;  %6104 = vmatprep.mubr.msk.bf16.mxu1 %vm6951_vm2, %v6950_v46 }
 0x663   : > { %6098 = vmatprep.subr.bf16.mxu1 %v6950_v46 }
 0x666   : > { %6099 = vmatpush3.bf16.msra.mxu1 %v6769_v31 }
 0x667   : > { %6100 = vmatprep.subr.bf16.mxu1 %v6950_v46 }
 0x66a   : > { %6101 = vmatpush3.bf16.msra.mxu1 %v6770_v38  ;;  %v6801_v38 = vld [vmem:[%s8313_s11 + $0x68] sm:$0xff]  }
 0x66b   : > { %6102 = vmatprep.subr.bf16.mxu1 %v6950_v46 }
 0x66e   : > { %6103 = vmatpush3.bf16.msra.mxu1 %v6771_v40  ;;  %v6802_v40 = vld [vmem:[%s8313_s11 + $0x70] sm:$0xff]  }
 0x66f   : > { %6108 = vmatprep.subr.bf16.mxu1 %v6950_v46 }
 0x671   : > { %6105 = vmatmul.mubr.msk.bf16.vlgmr.msra.gmra.mrb[96].mxu1 %vm2231_vm3, %v3490_v50  ;;  %v6804_v50 = vld [vmem:[%s8313_s11 + $0x80] sm:$0xff]  }
 0x672   : > { %6109 = vmatpush3.bf16.msra.mxu1 %v6772_v43  ;;  %6116 = vmatprep.mubr.msk.bf16.mxu1 %vm6951_vm2, %v6950_v46  ;;  %v6803_v43 = vld [vmem:[%s8313_s11 + $0x78] sm:$0xff]  }
 0x673   : > { %6110 = vmatprep.subr.bf16.mxu1 %v6950_v46 }
 0x676   : > { %6111 = vmatpush3.bf16.msra.mxu1 %v6773_v53 }
 0x677   : > { %6112 = vmatprep.subr.bf16.mxu1 %v6950_v46 }
 0x67a   : > { %6113 = vmatpush3.bf16.msra.mxu1 %v6774_v37  ;;  %v6805_v37 = vld [vmem:[%s8313_s11 + $0x88] sm:$0xff]  }
 0x67b   : > { %6114 = vmatprep.subr.bf16.mxu1 %v6950_v46 }
 0x67e   : > { %6115 = vmatpush3.bf16.msra.mxu1 %v6775_v39  ;;  %v6806_v39 = vld [vmem:[%s8313_s11 + $0x90] sm:$0xff]  }
 0x67f   : > { %6120 = vmatprep.subr.bf16.mxu1 %v6950_v46 }
 0x681   : > { %6117 = vmatmul.mubr.msk.bf16.vlgmr.msra.gmra.mrb[96].mxu1 %vm2231_vm3, %v7765_v34 }
 0x682   : > { %6121 = vmatpush3.bf16.msra.mxu1 %v6776_v41  ;;  %6128 = vmatprep.mubr.msk.bf16.mxu1 %vm6951_vm2, %v6950_v46  ;;  %v6808_v41 = vld [vmem:[%s8313_s11 + $0x98] sm:$0xff]  }
 0x683   : > { %6122 = vmatprep.subr.bf16.mxu1 %v6950_v46 }
 0x686   : > { %6123 = vmatpush3.bf16.msra.mxu1 %v6777_v42  ;;  %v6809_v42 = vld [vmem:[%s8313_s11 + $0xa0] sm:$0xff]  }
 0x687   : > { %6124 = vmatprep.subr.bf16.mxu1 %v6950_v46 }
 0x68a   : > { %6125 = vmatpush3.bf16.msra.mxu1 %v6778_v44  ;;  %v6810_v44 = vld [vmem:[%s8313_s11 + $0xa8] sm:$0xff]  }
 0x68b   : > { %6126 = vmatprep.subr.bf16.mxu1 %v6950_v46 }
 0x68e   : > { %6127 = vmatpush3.bf16.msra.mxu1 %v6779_v45  ;;  %v6811_v45 = vld [vmem:[%s8313_s11 + $0xb0] sm:$0xff]  }
 0x68f   : > { %6132 = vmatprep.subr.bf16.mxu1 %v6950_v46 }
 0x691   : > { %6129 = vmatmul.mubr.msk.bf16.vlgmr.msra.gmra.mrb[96].mxu1 %vm2231_vm3, %v3646_v48 }
 0x692   : > { %6133 = vmatpush3.bf16.msra.mxu1 %v6780_v47  ;;  %6140 = vmatprep.mubr.msk.bf16.mxu1 %vm6951_vm2, %v6950_v46  ;;  %v6812_v47 = vld [vmem:[%s8313_s11 + $0xb8] sm:$0xff]  }
 0x693   : > { %6134 = vmatprep.subr.bf16.mxu1 %v6950_v46 }
 0x696   : > { %6135 = vmatpush3.bf16.msra.mxu1 %v6781_v52 }
 0x697   : > { %6136 = vmatprep.subr.bf16.mxu1 %v6950_v46 }
 0x69a   : > { %6137 = vmatpush3.bf16.msra.mxu1 %v6782_v54 }
 0x69b   : > { %6138 = vmatprep.subr.bf16.mxu1 %v6950_v46 }
 0x69e   : > { %6139 = vmatpush3.bf16.msra.mxu1 %v6783_v55 }
 0x69f   : > { %6383 = vmatprep.subr.bf16.mxu1 %v6950_v46 }
 0x6a1   : > { %6141 = vmatmul.mubr.msk.bf16.vlgmr.msra.gmra.mrb[96].mxu1 %vm2231_vm3, %v3083_v56  ;;  %v6813_v56 = vld [vmem:[%s8313_s11 + $0xc0] sm:$0xff]  }
 0x6a2   : > { %6162 = vmatprep.mubr.msk.bf16.mxu1 %vm6951_vm2, %v6950_v46 }
 0x774   : > { %v3785_v59 = vpop.f32.mrb[96].mxu1 }
 0x775   : > { %v6395_v60 = vadd.f32 %v5257_v57, %v3785_v59  ;;  %v6142_v62 = vpop.f32.mrb[97].mxu1  ;;  %v6814_v59 = vld [vmem:[%s8313_s11 + $0xc8] sm:$0xff]  }
 0x776   : > { %v3788_v0 = vpop.f32.mrb[98].mxu1  ;;  %v6816_v62 = vld [vmem:[%s8313_s11 + $0xd8] sm:$0xff]  }
 0x777   : > { %v3793_v1 = vmul.f32 0.70710677, %v6395_v60  ;;  %v6143_v2 = vpop.f32.mrb[99].mxu1  ;;  %v3792_v5 = vmul.f32 0.5, %v6395_v60  ;;  %v6815_v60 = vld [vmem:[%s8313_s11 + $0xd0] sm:$0xff]   ;;  %v6817_v0 = vld [vmem:[%s8313_s11 + $0xe0] sm:$0xff]  }
 0x778   : > { %v6819_v2 = vld [vmem:[%s8313_s11 + $0xf0] sm:$0xff]  }
 0x779   : > { %6881 = verf.f32 %v3793_v1  ;;  %v6818_v1 = vld [vmem:[%s8313_s11 + $0xe8] sm:$0xff]  }
 0x783   : > { %v6882_v3 = vpop.eup %6881 }
 0x784   : > { %v3795_v6 = vadd.f32 1.0, %v6882_v3  ;;  %v6820_v3 = vld [vmem:[%s8313_s11 + $0xf8] sm:$0xff]  }
 0x786   : > { %v3796_v8 = vmul.f32 %v3795_v6, %v3792_v5  ;;  %v6821_v5 = vld [vmem:[%s8313_s11 + $0x100] sm:$0xff]  }
 0x788   : > { %v3797_v10 = vpack.c.bf16 %v3796_v8, %v3796_v8  ;;  %v6822_v8 = vld [vmem:[%s8313_s11 + $0x108] sm:$0xff]  }
 0x78a   : > { %v3846_v11 = vsel %vm1327_vm0, %v3797_v10, 0  ;;  %v6823_v10 = vld [vmem:[%s8313_s11 + $0x110] sm:$0xff]  }
 0x78b   : > { %6145 = vmatpush3.bf16.msra.mxu0 %v3846_v11  ;;  %6384 = vmatpush3.bf16.msra.mxu1 %v3846_v11  ;;  %v6824_v11 = vld [vmem:[%s8313_s11 + $0x118] sm:$0xff]  }
 0x78c   : > { %6166 = vmatprep.subr.bf16.mxu0 %v6950_v46  ;;  %6346 = vmatprep.subr.mxu1 %v6950_v46 }
 0x78e   : > { %6147 = vmatmul.mubr.msk.bf16.vlgmr.msra.gmra.mrb[116].mxu0 %vm1314_vm1, %v6784_v12  ;;  %6163 = vmatmul.mubr.msk.bf16.vlgmr.msra.gmra.mrb[100].mxu1 %vm1314_vm1, %v6807_v30  ;;  %v6825_v12 = vld [vmem:[%s8313_s11 + $0x120] sm:$0xff]  }
 0x78f   : > { %6150 = vmatprep.mubr.msk.bf16.mxu0 %vm6951_vm2, %v6950_v46  ;;  %6167 = vmatpush3.bf16.msra.mxu0 %v6787_v13  ;;  %v6826_v13 = vld [vmem:[%s8313_s11 + $0x128] sm:$0xff]   ;;  %v6833_v30 = vld [vmem:[%s8313_s11 + $0x160] sm:$0xff]  }
 0x790   : > { %6168 = vmatprep.subr.bf16.mxu0 %v6950_v46  ;;  %6348 = vmatprep.mubr.msk.f32.mxu1 %vm6951_vm2, %v6950_v46 }
 0x793   : > { %6169 = vmatpush3.bf16.msra.mxu0 %v6788_v15  ;;  %v6827_v15 = vld [vmem:[%s8313_s11 + $0x130] sm:$0xff]  }
 0x794   : > { %6170 = vmatprep.subr.bf16.mxu0 %v6950_v46 }
 0x796   : > { %6151 = vmatmul.mubr.msk.bf16.gmra.mrb[120].mxu0 %vm1314_vm1, %v6785_v16  ;;  %v6828_v16 = vld [vmem:[%s8313_s11 + $0x138] sm:$0xff]  }
 0x797   : > { %6154 = vmatprep.mubr.msk.bf16.mxu0 %vm6951_vm2, %v6950_v46  ;;  %6171 = vmatpush3.bf16.msra.mxu0 %v6790_v18 }
 0x798   : > { %6172 = vmatprep.subr.bf16.mxu0 %v6950_v46 }
 0x79b   : > { %6173 = vmatpush3.bf16.msra.mxu0 %v6791_v20 }
 0x79c   : > { %6174 = vmatprep.subr.bf16.mxu0 %v6950_v46 }
 0x79e   : > { %6155 = vmatmul.mubr.msk.bf16.gmra.mrb[124].mxu0 %vm1314_vm1, %v6786_v21 }
 0x79f   : > { %6158 = vmatprep.mubr.msk.bf16.mxu0 %vm6951_vm2, %v6950_v46  ;;  %6175 = vmatpush3.bf16.msra.mxu0 %v6792_v22  ;;  %v6829_v22 = vld [vmem:[%s8313_s11 + $0x140] sm:$0xff]  }
 0x7a0   : > { %6176 = vmatprep.subr.bf16.mxu0 %v6950_v46 }
 0x7a3   : > { %6177 = vmatpush3.bf16.msra.mxu0 %v6793_v23 }
 0x7a4   : > { %6178 = vmatprep.subr.bf16.mxu0 %v6950_v46 }
 0x7a6   : > { %6159 = vmatmul.mubr.msk.bf16.gmra.mrb[128].mxu0 %vm1314_vm1, %v6789_v25  ;;  %v6830_v25 = vld [vmem:[%s8313_s11 + $0x148] sm:$0xff]  }
 0x7a7   : > { %6179 = vmatpush3.bf16.msra.mxu0 %v6794_v27  ;;  %6182 = vmatprep.mubr.msk.bf16.mxu0 %vm6951_vm2, %v6950_v46  ;;  %v6831_v27 = vld [vmem:[%s8313_s11 + $0x150] sm:$0xff]  }
 0x7a8   : > { %6180 = vmatprep.subr.bf16.mxu0 %v6950_v46 }
 0x7ab   : > { %6181 = vmatpush3.bf16.msra.mxu0 %v6795_v29  ;;  %v6832_v29 = vld [vmem:[%s8313_s11 + $0x158] sm:$0xff]  }
 0x7ac   : > { %6186 = vmatprep.subr.bf16.mxu0 %v6950_v46 }
 0x861   : > { %v3882_v32 = vpop.f32.mrb[116].mxu0  ;;  %v8108_v18 = vpop.f32.mrb[100].mxu1 }
 0x862   : > { %v6148_v33 = vpop.f32.mrb[117].mxu0  ;;  %v6164_v20 = vpop.f32.mrb[101].mxu1 }
 0x863   : > { %v3885_v34 = vpop.f32.mrb[118].mxu0  ;;  %v3917_v21 = vpop.f32.mrb[102].mxu1  ;;  %v6835_v33 = vld [vmem:[%s8313_s11 + $0x170] sm:$0xff]  }
 0x864   : > { %v3920_v36 = vpack.c.bf16 %v3885_v34, %v3882_v32  ;;  %v6149_v49 = vpop.f32.mrb[119].mxu0  ;;  %v6165_v23 = vpop.f32.mrb[103].mxu1  ;;  %v6834_v32 = vld [vmem:[%s8313_s11 + $0x168] sm:$0xff]   ;;  %v6836_v34 = vld [vmem:[%s8313_s11 + $0x178] sm:$0xff]  }
 0x865   : > { %v6838_v49 = vld [vmem:[%s8313_s11 + $0x188] sm:$0xff]  }
 0x866   : > { %6183 = vmatmul.mubr.bf16.vlgmr.msra.gmra.mrb[132].mxu0 %v3920_v36  ;;  %v4050_v53 = vrot.slane %v3920_v36, 4 }
 0x867   : > { %6187 = vmatpush3.bf16.msra.mxu0 %v6796_v35  ;;  %6202 = vmatprep.mubr.msk.bf16.mxu0 %vm6951_vm2, %v6950_v46  ;;  %v6837_v35 = vld [vmem:[%s8313_s11 + $0x180] sm:$0xff]  }
 0x868   : > { %6188 = vmatprep.subr.bf16.mxu0 %v6950_v46 }
 0x869   : > { %v3890_v58 = vpop.f32.mrb[120].mxu0 }
 0x86a   : > { %v6152_v61 = vpop.f32.mrb[121].mxu0 }
 0x86b   : > { %6189 = vmatpush3.bf16.msra.mxu0 %v6797_v51  ;;  %v3893_v4 = vpop.f32.mrb[122].mxu0  ;;  %v6839_v51 = vld [vmem:[%s8313_s11 + $0x190] sm:$0xff]   ;;  %v6841_v61 = vld [vmem:[%s8313_s11 + $0x1a0] sm:$0xff]  }
 0x86c   : > { %6190 = vmatprep.subr.bf16.mxu0 %v6950_v46  ;;  %v7978_v7 = vpack.c.bf16 %v3893_v4, %v3890_v58  ;;  %v6153_v9 = vpop.f32.mrb[123].mxu0  ;;  %v6840_v58 = vld [vmem:[%s8313_s11 + $0x198] sm:$0xff]   ;;  %v6843_v4 = vld [vmem:[%s8313_s11 + $0x1b0] sm:$0xff]  }
 0x86d   : > { %v6845_v9 = vld [vmem:[%s8313_s11 + $0x1c0] sm:$0xff]  }
 0x86e   : > { %v4265_v6 = vrot.slane %v7978_v7, 4 }
 0x86f   : > { %6191 = vmatpush3.bf16.msra.mxu0 %v6798_v63  ;;  %v6842_v63 = vld [vmem:[%s8313_s11 + $0x1a8] sm:$0xff]  }
 0x870   : > { %6192 = vmatprep.subr.bf16.mxu0 %v6950_v46 }
 0x871   : > { %v3898_v17 = vpop.f32.mrb[124].mxu0 }
 0x872   : > { %v6156_v19 = vpop.f32.mrb[125].mxu0 }
 0x873   : > { %6193 = vmatpush3.bf16.msra.mxu0 %v6799_v14  ;;  %v3901_v26 = vpop.f32.mrb[126].mxu0  ;;  %v6846_v14 = vld [vmem:[%s8313_s11 + $0x1c8] sm:$0xff]   ;;  %v6848_v19 = vld [vmem:[%s8313_s11 + $0x1d8] sm:$0xff]  }
 0x874   : > { %6194 = vmatprep.subr.bf16.mxu0 %v6950_v46  ;;  %v7988_v28 = vpack.c.bf16 %v3901_v26, %v3898_v17  ;;  %v6157_v31 = vpop.f32.mrb[127].mxu0  ;;  %v6847_v17 = vld [vmem:[%s8313_s11 + $0x1d0] sm:$0xff]   ;;  %v6850_v26 = vld [vmem:[%s8313_s11 + $0x1e8] sm:$0xff]  }
 0x875   : > { %v6852_v31 = vld [vmem:[%s8313_s11 + $0x1f8] sm:$0xff]  }
 0x876   : > { %v4480_v36 = vrot.slane %v7988_v28, 4 }
 0x877   : > { %6195 = vmatpush3.bf16.msra.mxu0 %v6800_v24  ;;  %v6849_v24 = vld [vmem:[%s8313_s11 + $0x1e0] sm:$0xff]  }
 0x878   : > { %6196 = vmatprep.subr.bf16.mxu0 %v6950_v46 }
 0x879   : > { %v3906_v48 = vpop.f32.mrb[128].mxu0 }
 0x87a   : > { %v6160_v52 = vpop.f32.mrb[129].mxu0 }
 0x87b   : > { %6197 = vmatpush3.bf16.msra.mxu0 %v6801_v38  ;;  %v3909_v54 = vpop.f32.mrb[130].mxu0  ;;  %v6853_v38 = vld [vmem:[%s8313_s11 + $0x200] sm:$0xff]  }
 0x87c   : > { %6198 = vmatprep.subr.bf16.mxu0 %v6950_v46  ;;  %v6161_v55 = vpop.f32.mrb[131].mxu0  ;;  %v8039_v57 = vpack.c.bf16 %v3909_v54, %v3906_v48 }
 0x87f   : > { %6199 = vmatpush3.bf16.msra.mxu0 %v6802_v40  ;;  %v4695_v40 = vrot.slane %v8039_v57, 4 }
 0x880   : > { %6200 = vmatprep.subr.bf16.mxu0 %v6950_v46 }
 0x883   : > { %6201 = vmatpush3.bf16.msra.mxu0 %v6803_v43  ;;  %v6854_v43 = vld [vmem:[%s8313_s11 + $0x208] sm:$0xff]  }
 0x884   : > { %6206 = vmatprep.subr.bf16.mxu0 %v6950_v46 }
 0x886   : > { %6203 = vmatmul.mubr.bf16.vlgmr.msra.gmra.mrb[132].mxu0 %v4050_v53  ;;  %v6856_v53 = vld [vmem:[%s8313_s11 + $0x218] sm:$0xff]  }
 0x887   : > { %6207 = vmatpush3.bf16.msra.mxu0 %v6804_v50  ;;  %6222 = vmatprep.mubr.msk.bf16.mxu0 %vm6951_vm2, %v6950_v46  ;;  %v6855_v50 = vld [vmem:[%s8313_s11 + $0x210] sm:$0xff]  }
 0x888   : > { %6208 = vmatprep.subr.bf16.mxu0 %v6950_v46 }
 0x88b   : > { %6209 = vmatpush3.bf16.msra.mxu0 %v6805_v37  ;;  %v6857_v37 = vld [vmem:[%s8313_s11 + $0x220] sm:$0xff]  }
 0x88c   : > { %6210 = vmatprep.subr.bf16.mxu0 %v6950_v46 }
 0x88f   : > { %6211 = vmatpush3.bf16.msra.mxu0 %v6806_v39  ;;  %v6858_v39 = vld [vmem:[%s8313_s11 + $0x228] sm:$0xff]  }
 0x890   : > { %6212 = vmatprep.subr.bf16.mxu0 %v6950_v46 }
 0x893   : > { %6213 = vmatpush3.bf16.msra.mxu0 %v6808_v41  ;;  %v6859_v41 = vld [vmem:[%s8313_s11 + $0x230] sm:$0xff]  }
 0x894   : > { %6214 = vmatprep.subr.bf16.mxu0 %v6950_v46 }
 0x897   : > { %6215 = vmatpush3.bf16.msra.mxu0 %v6809_v42  ;;  %v6860_v42 = vld [vmem:[%s8313_s11 + $0x238] sm:$0xff]  }
 0x898   : > { %6216 = vmatprep.subr.bf16.mxu0 %v6950_v46 }
 0x89b   : > { %6217 = vmatpush3.bf16.msra.mxu0 %v6810_v44  ;;  %v3924_v44 = vpack.c.bf16 %v8108_v18, %v8108_v18 }
 0x89c   : > { %6218 = vmatprep.subr.bf16.mxu0 %v6950_v46 }
 0x89f   : > { %6219 = vmatpush3.bf16.msra.mxu0 %v6811_v45  ;;  %v3925_v45 = vld [vmem:[%s8314_s12] sm:$0x1] }
 0x8a0   : > { %6220 = vmatprep.subr.bf16.mxu0 %v6950_v46 }
 0x8a3   : > { %6221 = vmatpush3.bf16.msra.mxu0 %v6812_v47 }
 0x8a4   : > { %6226 = vmatprep.subr.bf16.mxu0 %v6950_v46 }
 0x8a6   : > { %6223 = vmatmul.mubr.bf16.vlgmr.msra.gmra.mrb[132].mxu0 %v7978_v7  ;;  %v6844_v7 = vld [vmem:[%s8313_s11 + $0x1b8] sm:$0xff]  }
 0x8a7   : > { %6227 = vmatpush3.bf16.msra.mxu0 %v6813_v56  ;;  %6242 = vmatprep.mubr.msk.bf16.mxu0 %vm6951_vm2, %v6950_v46 }
 0x8a8   : > { %6228 = vmatprep.subr.bf16.mxu0 %v6950_v46 }
 0x8ab   : > { %6229 = vmatpush3.bf16.msra.mxu0 %v6814_v59 }
 0x8ac   : > { %6230 = vmatprep.subr.bf16.mxu0 %v6950_v46 }
 0x8af   : > { %6231 = vmatpush3.bf16.msra.mxu0 %v6815_v60 }
 0x8b0   : > { %6232 = vmatprep.subr.bf16.mxu0 %v6950_v46 }
 0x8b3   : > { %6233 = vmatpush3.bf16.msra.mxu0 %v6816_v62  ;;  %v4897_v62 = vld [vmem:[#allocation2] sm:$0x1] }
 0x8b4   : > { %6234 = vmatprep.subr.bf16.mxu0 %v6950_v46 }
 0x8b7   : > { %6235 = vmatpush3.bf16.msra.mxu0 %v6817_v0 }
 0x8b8   : > { %6236 = vmatprep.subr.bf16.mxu0 %v6950_v46 }
 0x8bb   : > { %6237 = vmatpush3.bf16.msra.mxu0 %v6818_v1 }
 0x8bc   : > { %6238 = vmatprep.subr.bf16.mxu0 %v6950_v46 }
 0x8bf   : > { %6239 = vmatpush3.bf16.msra.mxu0 %v6819_v2 }
 0x8c0   : > { %6240 = vmatprep.subr.bf16.mxu0 %v6950_v46 }
 0x8c3   : > { %6241 = vmatpush3.bf16.msra.mxu0 %v6820_v3 }
 0x8c4   : > { %6246 = vmatprep.subr.bf16.mxu0 %v6950_v46 }
 0x8c6   : > { %6243 = vmatmul.mubr.bf16.vlgmr.msra.gmra.mrb[132].mxu0 %v4265_v6 }
 0x8c7   : > { %6247 = vmatpush3.bf16.msra.mxu0 %v6821_v5  ;;  %6262 = vmatprep.mubr.msk.bf16.mxu0 %vm6951_vm2, %v6950_v46 }
 0x8c8   : > { %6248 = vmatprep.subr.bf16.mxu0 %v6950_v46 }
 0x8cb   : > { %6249 = vmatpush3.bf16.msra.mxu0 %v6822_v8 }
 0x8cc   : > { %6250 = vmatprep.subr.bf16.mxu0 %v6950_v46 }
 0x8cf   : > { %6251 = vmatpush3.bf16.msra.mxu0 %v6823_v10 }
 0x8d0   : > { %6252 = vmatprep.subr.bf16.mxu0 %v6950_v46 }
 0x8d3   : > { %6253 = vmatpush3.bf16.msra.mxu0 %v6824_v11 }
 0x8d4   : > { %6254 = vmatprep.subr.bf16.mxu0 %v6950_v46 }
 0x8d7   : > { %6255 = vmatpush3.bf16.msra.mxu0 %v6825_v12 }
 0x8d8   : > { %6256 = vmatprep.subr.bf16.mxu0 %v6950_v46 }
 0x8db   : > { %6257 = vmatpush3.bf16.msra.mxu0 %v6826_v13 }
 0x8dc   : > { %6258 = vmatprep.subr.bf16.mxu0 %v6950_v46 }
 0x8df   : > { %6259 = vmatpush3.bf16.msra.mxu0 %v6827_v15 }
 0x8e0   : > { %6260 = vmatprep.subr.bf16.mxu0 %v6950_v46 }
 0x8e3   : > { %6261 = vmatpush3.bf16.msra.mxu0 %v6828_v16 }
 0x8e4   : > { %6266 = vmatprep.subr.bf16.mxu0 %v6950_v46 }
 0x8e6   : > { %6263 = vmatmul.mubr.bf16.vlgmr.msra.gmra.mrb[132].mxu0 %v7988_v28  ;;  %v6851_v28 = vld [vmem:[%s8313_s11 + $0x1f0] sm:$0xff]  }
 0x8e7   : > { %6267 = vmatpush3.bf16.msra.mxu0 %v6829_v22  ;;  %6282 = vmatprep.mubr.msk.bf16.mxu0 %vm6951_vm2, %v6950_v46 }
 0x8e8   : > { %6268 = vmatprep.subr.bf16.mxu0 %v6950_v46 }
 0x8eb   : > { %6269 = vmatpush3.bf16.msra.mxu0 %v6830_v25 }
 0x8ec   : > { %6270 = vmatprep.subr.bf16.mxu0 %v6950_v46 }
 0x8ef   : > { %6271 = vmatpush3.bf16.msra.mxu0 %v6831_v27 }
 0x8f0   : > { %6272 = vmatprep.subr.bf16.mxu0 %v6950_v46 }
 0x8f3   : > { %6273 = vmatpush3.bf16.msra.mxu0 %v6832_v29 }
 0x8f4   : > { %6274 = vmatprep.subr.bf16.mxu0 %v6950_v46 }
 0x8f7   : > { %6275 = vmatpush3.bf16.msra.mxu0 %v6833_v30 }
 0x8f8   : > { %6276 = vmatprep.subr.bf16.mxu0 %v6950_v46 }
 0x8fb   : > { %6277 = vmatpush3.bf16.msra.mxu0 %v6834_v32 }
 0x8fc   : > { %6278 = vmatprep.subr.bf16.mxu0 %v6950_v46 }
 0x8ff   : > { %6279 = vmatpush3.bf16.msra.mxu0 %v6835_v33 }
 0x900   : > { %6280 = vmatprep.subr.bf16.mxu0 %v6950_v46 }
 0x903   : > { %6281 = vmatpush3.bf16.msra.mxu0 %v6836_v34 }
 0x904   : > { %6286 = vmatprep.subr.bf16.mxu0 %v6950_v46 }
 0x906   : > { %6283 = vmatmul.mubr.bf16.vlgmr.msra.gmra.mrb[132].mxu0 %v4480_v36 }
 0x907   : > { %6287 = vmatpush3.bf16.msra.mxu0 %v6837_v35  ;;  %6302 = vmatprep.mubr.msk.bf16.mxu0 %vm6951_vm2, %v6950_v46 }
 0x908   : > { %6288 = vmatprep.subr.bf16.mxu0 %v6950_v46 }
 0x90b   : > { %6289 = vmatpush3.bf16.msra.mxu0 %v6838_v49 }
 0x90c   : > { %6290 = vmatprep.subr.bf16.mxu0 %v6950_v46 }
 0x90f   : > { %6291 = vmatpush3.bf16.msra.mxu0 %v6839_v51 }
 0x910   : > { %6292 = vmatprep.subr.bf16.mxu0 %v6950_v46 }
 0x913   : > { %6293 = vmatpush3.bf16.msra.mxu0 %v6840_v58 }
 0x914   : > { %6294 = vmatprep.subr.bf16.mxu0 %v6950_v46 }
 0x917   : > { %6295 = vmatpush3.bf16.msra.mxu0 %v6841_v61 }
 0x918   : > { %6296 = vmatprep.subr.bf16.mxu0 %v6950_v46 }
 0x91b   : > { %6297 = vmatpush3.bf16.msra.mxu0 %v6842_v63 }
 0x91c   : > { %6298 = vmatprep.subr.bf16.mxu0 %v6950_v46 }
 0x91f   : > { %6299 = vmatpush3.bf16.msra.mxu0 %v6843_v4 }
 0x920   : > { %6300 = vmatprep.subr.bf16.mxu0 %v6950_v46 }
 0x923   : > { %6301 = vmatpush3.bf16.msra.mxu0 %v6844_v7 }
 0x924   : > { %6306 = vmatprep.subr.bf16.mxu0 %v6950_v46 }
 0x926   : > { %6303 = vmatmul.mubr.bf16.vlgmr.msra.gmra.mrb[132].mxu0 %v8039_v57 }
 0x927   : > { %6307 = vmatpush3.bf16.msra.mxu0 %v6845_v9  ;;  %6322 = vmatprep.mubr.msk.bf16.mxu0 %vm6951_vm2, %v6950_v46 }
 0x928   : > { %6308 = vmatprep.subr.bf16.mxu0 %v6950_v46 }
 0x92b   : > { %6309 = vmatpush3.bf16.msra.mxu0 %v6846_v14 }
 0x92c   : > { %6310 = vmatprep.subr.bf16.mxu0 %v6950_v46 }
 0x92f   : > { %6311 = vmatpush3.bf16.msra.mxu0 %v6847_v17 }
 0x930   : > { %6312 = vmatprep.subr.bf16.mxu0 %v6950_v46 }
 0x933   : > { %6313 = vmatpush3.bf16.msra.mxu0 %v6848_v19 }
 0x934   : > { %6314 = vmatprep.subr.bf16.mxu0 %v6950_v46 }
 0x937   : > { %6315 = vmatpush3.bf16.msra.mxu0 %v6849_v24 }
 0x938   : > { %6316 = vmatprep.subr.bf16.mxu0 %v6950_v46 }
 0x93b   : > { %6317 = vmatpush3.bf16.msra.mxu0 %v6850_v26 }
 0x93c   : > { %6318 = vmatprep.subr.bf16.mxu0 %v6950_v46 }
 0x93f   : > { %6319 = vmatpush3.bf16.msra.mxu0 %v6851_v28 }
 0x940   : > { %6320 = vmatprep.subr.bf16.mxu0 %v6950_v46 }
 0x943   : > { %6321 = vmatpush3.bf16.msra.mxu0 %v6852_v31 }
 0x944   : > { %6326 = vmatprep.subr.bf16.mxu0 %v6950_v46 }
 0x946   : > { %6323 = vmatmul.mubr.bf16.vlgmr.msra.gmra.mrb[132].mxu0 %v4695_v40 }
 0x947   : > { %6327 = vmatpush3.bf16.msra.mxu0 %v6853_v38  ;;  %6342 = vmatprep.mubr.msk.bf16.mxu0 %vm6951_vm2, %v6950_v46 }
 0x948   : > { %6328 = vmatprep.subr.bf16.mxu0 %v6950_v46 }
 0x94b   : > { %6329 = vmatpush3.bf16.msra.mxu0 %v6854_v43 }
 0x94c   : > { %6330 = vmatprep.subr.bf16.mxu0 %v6950_v46 }
 0x94f   : > { %6331 = vmatpush3.bf16.msra.mxu0 %v6855_v50 }
 0x950   : > { %6332 = vmatprep.subr.bf16.mxu0 %v6950_v46 }
 0x953   : > { %6333 = vmatpush3.bf16.msra.mxu0 %v6856_v53 }
 0x954   : > { %6334 = vmatprep.subr.bf16.mxu0 %v6950_v46 }
 0x957   : > { %6335 = vmatpush3.bf16.msra.mxu0 %v6857_v37 }
 0x958   : > { %6336 = vmatprep.subr.bf16.mxu0 %v6950_v46 }
 0x95b   : > { %6337 = vmatpush3.bf16.msra.mxu0 %v6858_v39 }
 0x95c   : > { %6338 = vmatprep.subr.bf16.mxu0 %v6950_v46 }
 0x95f   : > { %6339 = vmatpush3.bf16.msra.mxu0 %v6859_v41 }
 0x960   : > { %6340 = vmatprep.subr.bf16.mxu0 %v6950_v46 }
 0x963   : > { %6341 = vmatpush3.bf16.msra.mxu0 %v6860_v42 }
 0x966   : > { %6343 = vmatmul.mubr.bf16.vlgmr.msra.gmra.mrb[132].mxu0 %v3924_v44 }
 0xa39   : > { %v4885_v47 = vpop.f32.mrb[132].mxu0 }
 0xa3a   : > { %v6396_v48 = vadd.f32 %v4885_v47, %v3925_v45  ;;  %v6344_v52 = vpop.f32.mrb[133].mxu0 }
 0xa3b   : > { %v4888_v54 = vpop.f32.mrb[134].mxu0 }
 0xa3c   : > { %v4893_v55 = vmul.f32 0.70710677, %v6396_v48  ;;  %v6345_v56 = vpop.f32.mrb[135].mxu0  ;;  %v4892_v46 = vmul.f32 0.5, %v6396_v48 }
 0xa3e   : > { %6883 = verf.f32 %v4893_v55 }
 0xa48   : > { %v6884_v57 = vpop.eup %6883 }
 0xa49   : > { %v4895_v59 = vadd.f32 1.0, %v6884_v57 }
 0xa4b   : > { %v4896_v60 = vmul.f32 %v4895_v59, %v4892_v46 }
 0xa4d   : > { %6347 = vmatpush3.msk.msra.mxu1 %vm4902_vm6, %v4896_v60 }
 0xa4e   : > { %6349 = vmatmul.mubr.msk.f32.vlgmr.msra.gmra.mrb[104].mxu1 %vm4898_vm7, %v4897_v62 }
 0xb21   : > { %v4972_v0 = vpop.f32.mrb[104].mxu1 }
 0xb22   : > { %4977 = vst.msk [vmem:[%s461_s27] sm:$0x1] %vm4976_vm8, %v4972_v0  ;;  %v6350_v1 = vpop.f32.mrb[105].mxu1 }
 0xb23   : > { %6898 = shalt.err (!%p6895_p3)
}
 0xb24   : > { %s6899_s22 = scalar_lea.hbm %s8260_s29, 16  ;;  %s6903_s23 = scalar_lea.hbm %s8316_s14, 32 }
 0xb25   : > { %p6900_p4 = scmp.ne.s32.totalorder %s8260_s29, %s6899_s22  ;;  %p6904_p9 = scmp.lt.u32.totalorder %s8260_s29, %s8316_s14 }
 0xb26   : > { %p6905_p10 = scmp.lt.u32.totalorder %s6903_s23, %s6899_s22  ;;  %p6907_p12 = scmp.lt.u32.totalorder %s6899_s22, %s8260_s29 }
 0xb27   : > { %p6901_p7 = pnand %p6900_p4, %p7069_p5 }
 0xb28   : > { %p6906_p11 = por %p6905_p10, %p6904_p9 }
 0xb29   : > { %p6902_p8 = pneg %p6901_p7 }
 0xb2a   : > { %p6908_p13 = por %p6907_p12, %p6906_p11 }
 0xb2c   : > { %p6909_p0 = pnand %p6908_p13, %p6902_p8 }
 0xb2e   : > { %6912 = shalt.err (!%p6909_p0)
}
 0xb2f   : > { %6566 = dma.vmem_to_hbm [thread:$0]  (%p7069_p5), %s8262_s28, 16, %s8260_s29, %s4979_s30  }
 0xb30 PF: > { %p6572_p1 = scmp.ge.s32.totalorder %s6947_s18, 2  ;;  %s5003_s19 = sand.u32 1, %s6935_s15  }
 0xb31   : > { %s5004_s0 = scalar_lea.sflag [#allocation4], %s5003_s19 }
 0xb32   : > { %p6569_p2 = pnand %p6572_p1, %p7073_p6 }
 0xb34   : > { %6930 = dma.done.wait (!%p6569_p2), %s5004_s0, 16  }
 0xb35   : > { %6932 = vsyncadd (!%p6569_p2), %s5004_s0, 4294967280  ;;  %s8322_s22 = sld [smem:[#allocation6_spill]]  ;;  %p26_p3 = scmp.ge.s32.totalorder %s7056_s20, 4  }
 0xb36   : > { %s8323_s15 = smov %s6939_s16  ;;  %s8324_s16 = smov %s6943_s17 }
 0xb37   : > { %s8326_s18 = smov %s7056_s20  ;;  %28 = sbr.rel (!%p26_p3) target bundleno = 6 (0x6), region = 143 }
 0xb3b   : > { %s8325_s17 = smov %s8322_s22 }
 0xb3e   :  { %5008 = vsyncpa [#allocation4], 1 }
 0xb3f   :  { %5010 = vsyncpa [#allocation4 + $0x1], 1 }

</bundles_post_ra>
